<compile_context>
chip_gen: v7x
topology: tpu7x:2x2x1
jax: 0.10.0
libtpu: 0.0.40
codegen_flags: <defaults>
</compile_context>

<pallas_src>
import jax
import jax.numpy as jnp
from jax.experimental import pallas as pl
from jax.experimental.pallas import tpu as pltpu

# --- constants mirroring AELoss.__init__ -------------------------------------
DEC_LAYERS = 2          # dec_layers
NUM_CLASSES = 2         # SetCriterion(num_classes=2)
EOS_COEF = 0.1          # eos_coef, weight of the background class in CE
COST_CLASS = 1.0        # build_matcher(1, 1, 3, bsize)
COST_BBOX = 3.0

# fused argmin-key parameters (one lane reduce per target instead of two)
_COST_LO = -2.0                  # cls_cost >= -COST_CLASS (with approx-recip slack)
_COST_HI = 14.0                  # cost <= COST_CLASS + COST_BBOX*D = 13 for [0,1] boxes
_KEY_SCALE = 65536.0             # 2^16: keys stay exact integers in f32 (< 2^24)
_SENTINEL_KEY = float(1 << 24)   # > any valid key; marks already-used queries
_OUT_LANES = 128                 # lane-dense output slab width


def build_weight_dict(dec_layers=DEC_LAYERS, aux_loss=True):
    weight_dict = {'loss_ce': 1, 'loss_boxes': 3, 'loss_class': 1, 'loss_box': 3}
    if aux_loss:
        aux = {}
        for i in range(dec_layers - 1):
            aux.update({k + f'_{i}': v for k, v in weight_dict.items()})
        weight_dict.update(aux)
    return weight_dict


def _per_layer_weights(num_layers):
    # set_loss = sum_k loss_dict[k] * weight_dict[k]; the CE value appears under
    # both 'loss_ce' and 'loss_class', the L1 value under both 'loss_boxes' and
    # 'loss_box'  ->  effective per-layer weights (2x CE, 6x L1), same for aux.
    wd = build_weight_dict(num_layers, aux_loss=(num_layers > 1))
    ws = []
    for l in range(num_layers):
        sfx = '' if l == num_layers - 1 else f'_{l}'
        ws.append((float(wd['loss_ce' + sfx] + wd['loss_class' + sfx]),
                   float(wd['loss_boxes' + sfx] + wd['loss_box' + sfx])))
    return tuple(ws)


# --- fused Pallas kernel: both layers, cost + greedy matching + losses --------
def criterion_kernel(logits_ref, boxes_ref, tpack_ref, out_ref):
    # logits_ref : (L, C, B, Q)   class logits, queries on the lane dim
    # boxes_ref  : (L, D, B, Q)   predicted boxes, queries on the lane dim
    # tpack_ref  : (T, D+2, B, Q) per-target [box_0..box_{D-1}, class, valid],
    #                             replicated over query lanes (host plumbing)
    # out_ref    : (8, 128)       row 0: [set_loss, loss_ce[0..L-1], loss_l1[0..L-1], 0...]
    lg = logits_ref[...]
    bx = boxes_ref[...]
    tp = tpack_ref[...]

    L, C, B, Q = lg.shape
    D = bx.shape[1]
    T = tp.shape[0]

    # ---- target-side, layer-independent quantities (hoisted) -----------------
    tcls = tp[:, D]                                   # (T, B, Q) target class id (f32)
    tval = tp[:, D + 1]                               # (T, B, Q) 1.0 for valid slots
    is_c = [(tcls == float(c)).astype(jnp.float32) for c in range(C)]
    cw = [EOS_COEF] + [1.0] * (C - 1)                 # CE class weights (bg = eos_coef)
    tw = cw[0] * is_c[0]
    for c in range(1, C):
        tw = tw + cw[c] * is_c[c]                     # (T, B, Q) weight of target's class

    q_iota = jax.lax.broadcasted_iota(jnp.int32, (B, Q), 1).astype(jnp.float32)

    layer_w = _per_layer_weights(L)
    layer_ce = []
    layer_l1 = []

    for l in range(L):                                # static unroll over decoder layers
        # --- shared softmax / log-softmax over the tiny static class dim ------
        lgc = [lg[l, c] for c in range(C)]            # C x (B, Q)
        m = lgc[0]
        for c in range(1, C):
            m = jnp.maximum(m, lgc[c])
        ec = [jnp.exp(x - m) for x in lgc]
        se = ec[0]
        for c in range(1, C):
            se = se + ec[c]
        inv = pl.reciprocal(se, approx=True)          # EUP; matching cost only
        prob = [e * inv for e in ec]                  # softmax(dim=-1)
        logse = jnp.log(se)
        logp = [(x - m) - logse for x in lgc]         # exact log_softmax (CE)

        # --- cost matrix pieces, (T, B, Q): VPU broadcast MACs, no MXU --------
        cls_cost = jnp.zeros((T, B, Q), jnp.float32)  # -prob[q, tgt_class[t]]
        logp_sel = jnp.zeros((T, B, Q), jnp.float32)  # logp[q, tgt_class[t]]
        for c in range(C):
            cls_cost = cls_cost - is_c[c] * prob[c][None]
            logp_sel = logp_sel + is_c[c] * logp[c][None]

        l1_cost = jnp.zeros((T, B, Q), jnp.float32)   # sum_d |pred - tgt|
        for d in range(D):
            l1_cost = l1_cost + jnp.abs(bx[l, d][None] - tp[:, d])

        cost = COST_CLASS * cls_cost + COST_BBOX * l1_cost

        # fused (min-cost, first-argmin) key; quantizes cost to 2^-16 which only
        # affects near-tie matches (matching is greedy / approximate anyway).
        shifted = jnp.clip(cost, _COST_LO, _COST_HI) - _COST_LO
        base_key = jnp.floor(shifted * _KEY_SCALE) * Q + q_iota[None]   # (T, B, Q)

        # --- greedy column-wise assignment, serial over T through `used` ------
        # TODO(synk): greedy approximation of Hungarian matching (header note).
        used = jnp.zeros((B, Q), jnp.float32)         # query already matched
        wnll = jnp.zeros((B, Q), jnp.float32)         # weighted CE nll of matched queries
        wsum = jnp.zeros((B, Q), jnp.float32)         # CE weight of matched queries
        l1acc = jnp.zeros((B, Q), jnp.float32)        # L1 box loss of matched queries
        for t in range(T):                            # static T, fully unrolled
            key_t = jnp.where(used > 0.0, _SENTINEL_KEY, base_key[t])
            min_key = jnp.min(key_t, axis=-1, keepdims=True)          # (B,1) one lane reduce
            sel = jnp.logical_and(key_t == min_key, key_t < _SENTINEL_KEY)
            w = sel.astype(jnp.float32) * tval[t]     # one-hot over Q (or all-zero)
            wnll = wnll + w * tw[t] * (-logp_sel[t])
            wsum = wsum + w * tw[t]
            l1acc = l1acc + w * l1_cost[t]
            used = used + w

        # --- weighted CE (unmatched queries -> background class 0) + L1 -------
        unmatched = 1.0 - used
        ce_num = (jnp.sum(wnll, keepdims=True)
                  + EOS_COEF * jnp.sum(unmatched * (-logp[0]), keepdims=True))
        ce_den = (jnp.sum(wsum, keepdims=True)
                  + EOS_COEF * jnp.sum(unmatched, keepdims=True))
        l1_sum = jnp.sum(l1acc, keepdims=True)
        nbox = jnp.sum(used, keepdims=True)

        layer_ce.append(ce_num / jnp.maximum(ce_den, 1e-6))           # (1,1)
        layer_l1.append(l1_sum / jnp.maximum(nbox, 1.0))              # (1,1)

    # --- weighted set_loss + per-layer losses, single lane-dense store --------
    set_loss = jnp.zeros((1, 1), jnp.float32)
    for l in range(L):
        set_loss = set_loss + layer_w[l][0] * layer_ce[l] + layer_w[l][1] * layer_l1[l]

    lane = jax.lax.broadcasted_iota(jnp.int32, (1, _OUT_LANES), 1)
    row = jnp.where(lane == 0, set_loss, 0.0)
    for l in range(L):
        row = row + jnp.where(lane == 1 + l, layer_ce[l], 0.0)
        row = row + jnp.where(lane == 1 + L + l, layer_l1[l], 0.0)
    out_ref[...] = jnp.broadcast_to(row, out_ref.shape)               # unmasked (8,128) store


def fused_criterion(logits_t, boxes_t, tpack):
    L, C, B, Q = logits_t.shape
    D = boxes_t.shape[1]
    T = tpack.shape[0]
    return pl.pallas_call(
        criterion_kernel,
        out_shape=jax.ShapeDtypeStruct((8, _OUT_LANES), jnp.float32),
        grid_spec=pltpu.PrefetchScalarGridSpec(
            num_scalar_prefetch=0,
            grid=(1,),                                # single fused invocation
            in_specs=[
                pl.BlockSpec((L, C, B, Q), lambda i: (0, 0, 0, 0)),
                pl.BlockSpec((L, D, B, Q), lambda i: (0, 0, 0, 0)),
                pl.BlockSpec((T, D + 2, B, Q), lambda i: (0, 0, 0, 0)),
            ],
            out_specs=pl.BlockSpec((8, _OUT_LANES), lambda i: (0, 0)),
        ),
        compiler_params=pltpu.CompilerParams(
            dimension_semantics=("arbitrary",)),      # no fake L-split across cores
    )(logits_t, boxes_t, tpack)


# --- AELoss.forward equivalent ------------------------------------------------
@jax.jit
def ae_loss_forward(pred_logits, pred_boxes, tgt_cls, tgt_boxes, tgt_valid):
    L, B, Q, C = pred_logits.shape
    D = pred_boxes.shape[-1]
    T = tgt_cls.shape[-1]

    # host-side layout plumbing only: queries onto the lane dim, and all
    # target-side data packed into ONE VMEM stream (kernel builds one-hots,
    # class weights and validity masks itself).
    logits_t = jnp.transpose(pred_logits.astype(jnp.float32), (0, 3, 1, 2))    # (L,C,B,Q)
    boxes_t = jnp.transpose(pred_boxes.astype(jnp.float32), (0, 3, 1, 2))      # (L,D,B,Q)

    tbox_t = jnp.transpose(tgt_boxes.astype(jnp.float32), (1, 2, 0))           # (T,D,B)
    tcls_t = jnp.transpose(tgt_cls.astype(jnp.float32), (1, 0))[:, None, :]    # (T,1,B)
    tval_t = jnp.transpose(tgt_valid.astype(jnp.float32), (1, 0))[:, None, :]  # (T,1,B)
    tpack = jnp.concatenate([tbox_t, tcls_t, tval_t], axis=1)                  # (T,D+2,B)
    tpack = jnp.broadcast_to(tpack[..., None], (T, D + 2, B, Q))               # (T,D+2,B,Q)

    out = fused_criterion(logits_t, boxes_t, tpack)   # (8,128), row 0 holds the losses

    set_loss = out[0, 0]
    loss_ce = out[0, 1:1 + L]
    loss_l1 = out[0, 1 + L:1 + 2 * L]

    loss_dict = {
        'loss_ce': loss_ce[L - 1], 'loss_boxes': loss_l1[L - 1],
        'loss_class': loss_ce[L - 1], 'loss_box': loss_l1[L - 1],
    }
    for i in range(L - 1):  # aux decoder layers
        loss_dict[f'loss_ce_{i}'] = loss_ce[i]
        loss_dict[f'loss_boxes_{i}'] = loss_l1[i]
        loss_dict[f'loss_class_{i}'] = loss_ce[i]
        loss_dict[f'loss_box_{i}'] = loss_l1[i]

    return set_loss[None], loss_dict   # mirrors (set_loss.unsqueeze(0), loss_dict)


if __name__ == "__main__":
    key = jax.random.PRNGKey(0)
    k1, k2, k3 = jax.random.split(key, 3)

    # small shapes consistent with the module:
    # dec_layers=2, batch=2, num_queries=8, max_targets=8, classes=2, box dim=4
    Ld, B, Q, T, C, D = DEC_LAYERS, 2, 8, 8, NUM_CLASSES, 4

    pred_logits = jax.random.normal(k1, (Ld, B, Q, C), jnp.float32)                 # 'pred_classes'
    pred_boxes = jax.nn.sigmoid(jax.random.normal(k2, (Ld, B, Q, D), jnp.float32))  # 'pred_boxes'

    n_tgt = jnp.array([3, 2], jnp.int32)                              # valid slots per image
    tgt_valid = (jnp.arange(T)[None, :] < n_tgt[:, None]).astype(jnp.float32)  # [B,T]
    tgt_cls = jnp.where(tgt_valid > 0, 1, 0).astype(jnp.int32)        # class 1 = parking slot
    tgt_boxes = jax.random.uniform(k3, (B, T, D), jnp.float32) * tgt_valid[..., None]

    set_loss, loss_dict = ae_loss_forward(pred_logits, pred_boxes, tgt_cls,
                                          tgt_boxes, tgt_valid)
    jax.block_until_ready(set_loss)
    jax.block_until_ready(loss_dict)
    print("KERNEL_OK")
</pallas_src>

<mosaic_0001>
module attributes {stable_mosaic.version = 11 : i64} {
  func.func @criterion_kernel(%arg0: i32, %arg1: memref<2x2x2x8xf32, #tpu.memory_space<vmem>>, %arg2: memref<2x4x2x8xf32, #tpu.memory_space<vmem>>, %arg3: memref<8x6x2x8xf32, #tpu.memory_space<vmem>>, %arg4: memref<8x128xf32, #tpu.memory_space<vmem>>) attributes {dimension_semantics = [#tpu.dimension_semantics<arbitrary>], iteration_bounds = array<i64: 1>, scalar_prefetch = 0 : i64, scratch_operands = 0 : i64, tpu.core_type = #tpu.core_type<tc>, window_params = [{pipeline_mode = #tpu.pipeline_mode<synchronous>, transform_indices = @transform_0, window_bounds = array<i64: 2, 2, 2, 8>}, {pipeline_mode = #tpu.pipeline_mode<synchronous>, transform_indices = @transform_1, window_bounds = array<i64: 2, 4, 2, 8>}, {pipeline_mode = #tpu.pipeline_mode<synchronous>, transform_indices = @transform_2, window_bounds = array<i64: 8, 6, 2, 8>}, {pipeline_mode = #tpu.pipeline_mode<synchronous>, transform_indices = @transform_3, window_bounds = array<i64: 8, 128>}]} {
    %c0 = arith.constant 0 : index
    %c0_0 = arith.constant 0 : index
    %c0_1 = arith.constant 0 : index
    %c0_2 = arith.constant 0 : index
    %0 = vector.load %arg1[%c0, %c0_0, %c0_1, %c0_2] : memref<2x2x2x8xf32, #tpu.memory_space<vmem>>, vector<2x2x2x8xf32>
    %c0_3 = arith.constant 0 : index
    %c0_4 = arith.constant 0 : index
    %c0_5 = arith.constant 0 : index
    %c0_6 = arith.constant 0 : index
    %1 = vector.load %arg2[%c0_3, %c0_4, %c0_5, %c0_6] : memref<2x4x2x8xf32, #tpu.memory_space<vmem>>, vector<2x4x2x8xf32>
    %c0_7 = arith.constant 0 : index
    %c0_8 = arith.constant 0 : index
    %c0_9 = arith.constant 0 : index
    %c0_10 = arith.constant 0 : index
    %2 = vector.load %arg3[%c0_7, %c0_8, %c0_9, %c0_10] : memref<8x6x2x8xf32, #tpu.memory_space<vmem>>, vector<8x6x2x8xf32>
    %3 = vector.extract_strided_slice %2 {offsets = [0, 4, 0, 0], sizes = [8, 1, 2, 8], strides = [1, 1, 1, 1]} : vector<8x6x2x8xf32> to vector<8x1x2x8xf32>
    %4 = vector.shape_cast %3 : vector<8x1x2x8xf32> to vector<8x2x8xf32>
    %5 = vector.extract_strided_slice %2 {offsets = [0, 5, 0, 0], sizes = [8, 1, 2, 8], strides = [1, 1, 1, 1]} : vector<8x6x2x8xf32> to vector<8x1x2x8xf32>
    %6 = vector.shape_cast %5 : vector<8x1x2x8xf32> to vector<8x2x8xf32>
    %cst = arith.constant 0.000000e+00 : f32
    %7 = vector.broadcast %cst : f32 to vector<8x2x8xf32>
    %8 = arith.cmpf oeq, %4, %7 : vector<8x2x8xf32>
    %9 = arith.extui %8 : vector<8x2x8xi1> to vector<8x2x8xi32>
    %10 = arith.sitofp %9 : vector<8x2x8xi32> to vector<8x2x8xf32>
    %cst_11 = arith.constant 1.000000e+00 : f32
    %11 = vector.broadcast %cst_11 : f32 to vector<8x2x8xf32>
    %12 = arith.cmpf oeq, %4, %11 : vector<8x2x8xf32>
    %13 = arith.extui %12 : vector<8x2x8xi1> to vector<8x2x8xi32>
    %14 = arith.sitofp %13 : vector<8x2x8xi32> to vector<8x2x8xf32>
    %cst_12 = arith.constant 1.000000e-01 : f32
    %15 = vector.broadcast %cst_12 : f32 to vector<8x2x8xf32>
    %16 = arith.mulf %15, %10 : vector<8x2x8xf32>
    %cst_13 = arith.constant 1.000000e+00 : f32
    %17 = vector.broadcast %cst_13 : f32 to vector<8x2x8xf32>
    %18 = arith.mulf %17, %14 : vector<8x2x8xf32>
    %19 = arith.addf %16, %18 : vector<8x2x8xf32>
    %20 = tpu.iota {dimensions = array<i32: 1>} : vector<2x8xi32>
    %21 = arith.sitofp %20 : vector<2x8xi32> to vector<2x8xf32>
    %22 = vector.extract_strided_slice %0 {offsets = [0, 0, 0, 0], sizes = [1, 1, 2, 8], strides = [1, 1, 1, 1]} : vector<2x2x2x8xf32> to vector<1x1x2x8xf32>
    %23 = vector.shape_cast %22 : vector<1x1x2x8xf32> to vector<2x8xf32>
    %24 = vector.extract_strided_slice %0 {offsets = [0, 1, 0, 0], sizes = [1, 1, 2, 8], strides = [1, 1, 1, 1]} : vector<2x2x2x8xf32> to vector<1x1x2x8xf32>
    %25 = vector.shape_cast %24 : vector<1x1x2x8xf32> to vector<2x8xf32>
    %26 = arith.maximumf %23, %25 : vector<2x8xf32>
    %27 = arith.subf %23, %26 : vector<2x8xf32>
    %28 = math.exp %27 : vector<2x8xf32>
    %29 = arith.subf %25, %26 : vector<2x8xf32>
    %30 = math.exp %29 : vector<2x8xf32>
    %31 = arith.addf %28, %30 : vector<2x8xf32>
    %32 = tpu.reciprocal %31 {approx = true} : vector<2x8xf32> -> vector<2x8xf32>
    %33 = arith.mulf %28, %32 : vector<2x8xf32>
    %34 = arith.mulf %30, %32 : vector<2x8xf32>
    %35 = math.log %31 : vector<2x8xf32>
    %36 = arith.subf %23, %26 : vector<2x8xf32>
    %37 = arith.subf %36, %35 : vector<2x8xf32>
    %38 = arith.subf %25, %26 : vector<2x8xf32>
    %39 = arith.subf %38, %35 : vector<2x8xf32>
    %cst_14 = arith.constant 0.000000e+00 : f32
    %40 = vector.broadcast %cst_14 : f32 to vector<8x2x8xf32>
    %cst_15 = arith.constant 0.000000e+00 : f32
    %41 = vector.broadcast %cst_15 : f32 to vector<8x2x8xf32>
    %42 = vector.shape_cast %33 : vector<2x8xf32> to vector<1x2x8xf32>
    %43 = vector.broadcast %42 : vector<1x2x8xf32> to vector<8x2x8xf32>
    %44 = arith.mulf %10, %43 : vector<8x2x8xf32>
    %45 = arith.subf %40, %44 : vector<8x2x8xf32>
    %46 = vector.shape_cast %37 : vector<2x8xf32> to vector<1x2x8xf32>
    %47 = vector.broadcast %46 : vector<1x2x8xf32> to vector<8x2x8xf32>
    %48 = arith.mulf %10, %47 : vector<8x2x8xf32>
    %49 = arith.addf %41, %48 : vector<8x2x8xf32>
    %50 = vector.shape_cast %34 : vector<2x8xf32> to vector<1x2x8xf32>
    %51 = vector.broadcast %50 : vector<1x2x8xf32> to vector<8x2x8xf32>
    %52 = arith.mulf %14, %51 : vector<8x2x8xf32>
    %53 = arith.subf %45, %52 : vector<8x2x8xf32>
    %54 = vector.shape_cast %39 : vector<2x8xf32> to vector<1x2x8xf32>
    %55 = vector.broadcast %54 : vector<1x2x8xf32> to vector<8x2x8xf32>
    %56 = arith.mulf %14, %55 : vector<8x2x8xf32>
    %57 = arith.addf %49, %56 : vector<8x2x8xf32>
    %cst_16 = arith.constant 0.000000e+00 : f32
    %58 = vector.broadcast %cst_16 : f32 to vector<8x2x8xf32>
    %59 = vector.extract_strided_slice %1 {offsets = [0, 0, 0, 0], sizes = [1, 1, 2, 8], strides = [1, 1, 1, 1]} : vector<2x4x2x8xf32> to vector<1x1x2x8xf32>
    %60 = vector.shape_cast %59 : vector<1x1x2x8xf32> to vector<2x8xf32>
    %61 = vector.shape_cast %60 : vector<2x8xf32> to vector<1x2x8xf32>
    %62 = vector.extract_strided_slice %2 {offsets = [0, 0, 0, 0], sizes = [8, 1, 2, 8], strides = [1, 1, 1, 1]} : vector<8x6x2x8xf32> to vector<8x1x2x8xf32>
    %63 = vector.shape_cast %62 : vector<8x1x2x8xf32> to vector<8x2x8xf32>
    %64 = vector.broadcast %61 : vector<1x2x8xf32> to vector<8x2x8xf32>
    %65 = arith.subf %64, %63 : vector<8x2x8xf32>
    %66 = math.absf %65 : vector<8x2x8xf32>
    %67 = arith.addf %58, %66 : vector<8x2x8xf32>
    %68 = vector.extract_strided_slice %1 {offsets = [0, 1, 0, 0], sizes = [1, 1, 2, 8], strides = [1, 1, 1, 1]} : vector<2x4x2x8xf32> to vector<1x1x2x8xf32>
    %69 = vector.shape_cast %68 : vector<1x1x2x8xf32> to vector<2x8xf32>
    %70 = vector.shape_cast %69 : vector<2x8xf32> to vector<1x2x8xf32>
    %71 = vector.extract_strided_slice %2 {offsets = [0, 1, 0, 0], sizes = [8, 1, 2, 8], strides = [1, 1, 1, 1]} : vector<8x6x2x8xf32> to vector<8x1x2x8xf32>
    %72 = vector.shape_cast %71 : vector<8x1x2x8xf32> to vector<8x2x8xf32>
    %73 = vector.broadcast %70 : vector<1x2x8xf32> to vector<8x2x8xf32>
    %74 = arith.subf %73, %72 : vector<8x2x8xf32>
    %75 = math.absf %74 : vector<8x2x8xf32>
    %76 = arith.addf %67, %75 : vector<8x2x8xf32>
    %77 = vector.extract_strided_slice %1 {offsets = [0, 2, 0, 0], sizes = [1, 1, 2, 8], strides = [1, 1, 1, 1]} : vector<2x4x2x8xf32> to vector<1x1x2x8xf32>
    %78 = vector.shape_cast %77 : vector<1x1x2x8xf32> to vector<2x8xf32>
    %79 = vector.shape_cast %78 : vector<2x8xf32> to vector<1x2x8xf32>
    %80 = vector.extract_strided_slice %2 {offsets = [0, 2, 0, 0], sizes = [8, 1, 2, 8], strides = [1, 1, 1, 1]} : vector<8x6x2x8xf32> to vector<8x1x2x8xf32>
    %81 = vector.shape_cast %80 : vector<8x1x2x8xf32> to vector<8x2x8xf32>
    %82 = vector.broadcast %79 : vector<1x2x8xf32> to vector<8x2x8xf32>
    %83 = arith.subf %82, %81 : vector<8x2x8xf32>
    %84 = math.absf %83 : vector<8x2x8xf32>
    %85 = arith.addf %76, %84 : vector<8x2x8xf32>
    %86 = vector.extract_strided_slice %1 {offsets = [0, 3, 0, 0], sizes = [1, 1, 2, 8], strides = [1, 1, 1, 1]} : vector<2x4x2x8xf32> to vector<1x1x2x8xf32>
    %87 = vector.shape_cast %86 : vector<1x1x2x8xf32> to vector<2x8xf32>
    %88 = vector.shape_cast %87 : vector<2x8xf32> to vector<1x2x8xf32>
    %89 = vector.extract_strided_slice %2 {offsets = [0, 3, 0, 0], sizes = [8, 1, 2, 8], strides = [1, 1, 1, 1]} : vector<8x6x2x8xf32> to vector<8x1x2x8xf32>
    %90 = vector.shape_cast %89 : vector<8x1x2x8xf32> to vector<8x2x8xf32>
    %91 = vector.broadcast %88 : vector<1x2x8xf32> to vector<8x2x8xf32>
    %92 = arith.subf %91, %90 : vector<8x2x8xf32>
    %93 = math.absf %92 : vector<8x2x8xf32>
    %94 = arith.addf %85, %93 : vector<8x2x8xf32>
    %cst_17 = arith.constant 1.000000e+00 : f32
    %95 = vector.broadcast %cst_17 : f32 to vector<8x2x8xf32>
    %96 = arith.mulf %95, %53 : vector<8x2x8xf32>
    %cst_18 = arith.constant 3.000000e+00 : f32
    %97 = vector.broadcast %cst_18 : f32 to vector<8x2x8xf32>
    %98 = arith.mulf %97, %94 : vector<8x2x8xf32>
    %99 = arith.addf %96, %98 : vector<8x2x8xf32>
    %cst_19 = arith.constant -2.000000e+00 : f32
    %cst_20 = arith.constant 1.400000e+01 : f32
    %100 = vector.broadcast %cst_19 : f32 to vector<8x2x8xf32>
    %101 = arith.maximumf %100, %99 : vector<8x2x8xf32>
    %102 = vector.broadcast %cst_20 : f32 to vector<8x2x8xf32>
    %103 = arith.minimumf %102, %101 : vector<8x2x8xf32>
    %cst_21 = arith.constant -2.000000e+00 : f32
    %104 = vector.broadcast %cst_21 : f32 to vector<8x2x8xf32>
    %105 = arith.subf %103, %104 : vector<8x2x8xf32>
    %cst_22 = arith.constant 6.553600e+04 : f32
    %106 = vector.broadcast %cst_22 : f32 to vector<8x2x8xf32>
    %107 = arith.mulf %105, %106 : vector<8x2x8xf32>
    %108 = math.floor %107 : vector<8x2x8xf32>
    %cst_23 = arith.constant 8.000000e+00 : f32
    %109 = vector.broadcast %cst_23 : f32 to vector<8x2x8xf32>
    %110 = arith.mulf %108, %109 : vector<8x2x8xf32>
    %111 = vector.shape_cast %21 : vector<2x8xf32> to vector<1x2x8xf32>
    %112 = vector.broadcast %111 : vector<1x2x8xf32> to vector<8x2x8xf32>
    %113 = arith.addf %110, %112 : vector<8x2x8xf32>
    %cst_24 = arith.constant 0.000000e+00 : f32
    %114 = vector.broadcast %cst_24 : f32 to vector<2x8xf32>
    %cst_25 = arith.constant 0.000000e+00 : f32
    %115 = vector.broadcast %cst_25 : f32 to vector<2x8xf32>
    %cst_26 = arith.constant 0.000000e+00 : f32
    %116 = vector.broadcast %cst_26 : f32 to vector<2x8xf32>
    %cst_27 = arith.constant 0.000000e+00 : f32
    %117 = vector.broadcast %cst_27 : f32 to vector<2x8xf32>
    %cst_28 = arith.constant 0.000000e+00 : f32
    %118 = vector.broadcast %cst_28 : f32 to vector<2x8xf32>
    %119 = arith.cmpf ogt, %114, %118 : vector<2x8xf32>
    %120 = vector.extract_strided_slice %113 {offsets = [0, 0, 0], sizes = [1, 2, 8], strides = [1, 1, 1]} : vector<8x2x8xf32> to vector<1x2x8xf32>
    %121 = vector.shape_cast %120 : vector<1x2x8xf32> to vector<2x8xf32>
    %cst_29 = arith.constant 0x4B800000 : f32
    %122 = vector.broadcast %cst_29 : f32 to vector<2x8xf32>
    %123 = arith.select %119, %122, %121 : vector<2x8xi1>, vector<2x8xf32>
    %cst_30 = arith.constant dense<0x7F800000> : vector<2xf32>
    %124 = vector.multi_reduction <minimumf>, %123, %cst_30 [1] : vector<2x8xf32> to vector<2xf32>
    %125 = vector.shape_cast %124 : vector<2xf32> to vector<2x1xf32>
    %126 = vector.broadcast %125 : vector<2x1xf32> to vector<2x8xf32>
    %127 = arith.cmpf oeq, %123, %126 : vector<2x8xf32>
    %cst_31 = arith.constant 0x4B800000 : f32
    %128 = vector.broadcast %cst_31 : f32 to vector<2x8xf32>
    %129 = arith.cmpf olt, %123, %128 : vector<2x8xf32>
    %130 = arith.andi %127, %129 : vector<2x8xi1>
    %131 = arith.extui %130 : vector<2x8xi1> to vector<2x8xi32>
    %132 = arith.sitofp %131 : vector<2x8xi32> to vector<2x8xf32>
    %133 = vector.extract_strided_slice %6 {offsets = [0, 0, 0], sizes = [1, 2, 8], strides = [1, 1, 1]} : vector<8x2x8xf32> to vector<1x2x8xf32>
    %134 = vector.shape_cast %133 : vector<1x2x8xf32> to vector<2x8xf32>
    %135 = arith.mulf %132, %134 : vector<2x8xf32>
    %136 = vector.extract_strided_slice %19 {offsets = [0, 0, 0], sizes = [1, 2, 8], strides = [1, 1, 1]} : vector<8x2x8xf32> to vector<1x2x8xf32>
    %137 = vector.shape_cast %136 : vector<1x2x8xf32> to vector<2x8xf32>
    %138 = arith.mulf %135, %137 : vector<2x8xf32>
    %139 = vector.extract_strided_slice %57 {offsets = [0, 0, 0], sizes = [1, 2, 8], strides = [1, 1, 1]} : vector<8x2x8xf32> to vector<1x2x8xf32>
    %140 = vector.shape_cast %139 : vector<1x2x8xf32> to vector<2x8xf32>
    %cst_32 = arith.constant 0.000000e+00 : f32
    %141 = vector.broadcast %cst_32 : f32 to vector<2x8xf32>
    %142 = arith.subf %141, %140 : vector<2x8xf32>
    %143 = arith.mulf %138, %142 : vector<2x8xf32>
    %144 = arith.addf %115, %143 : vector<2x8xf32>
    %145 = vector.extract_strided_slice %19 {offsets = [0, 0, 0], sizes = [1, 2, 8], strides = [1, 1, 1]} : vector<8x2x8xf32> to vector<1x2x8xf32>
    %146 = vector.shape_cast %145 : vector<1x2x8xf32> to vector<2x8xf32>
    %147 = arith.mulf %135, %146 : vector<2x8xf32>
    %148 = arith.addf %116, %147 : vector<2x8xf32>
    %149 = vector.extract_strided_slice %94 {offsets = [0, 0, 0], sizes = [1, 2, 8], strides = [1, 1, 1]} : vector<8x2x8xf32> to vector<1x2x8xf32>
    %150 = vector.shape_cast %149 : vector<1x2x8xf32> to vector<2x8xf32>
    %151 = arith.mulf %135, %150 : vector<2x8xf32>
    %152 = arith.addf %117, %151 : vector<2x8xf32>
    %153 = arith.addf %114, %135 : vector<2x8xf32>
    %cst_33 = arith.constant 0.000000e+00 : f32
    %154 = vector.broadcast %cst_33 : f32 to vector<2x8xf32>
    %155 = arith.cmpf ogt, %153, %154 : vector<2x8xf32>
    %156 = vector.extract_strided_slice %113 {offsets = [1, 0, 0], sizes = [1, 2, 8], strides = [1, 1, 1]} : vector<8x2x8xf32> to vector<1x2x8xf32>
    %157 = vector.shape_cast %156 : vector<1x2x8xf32> to vector<2x8xf32>
    %cst_34 = arith.constant 0x4B800000 : f32
    %158 = vector.broadcast %cst_34 : f32 to vector<2x8xf32>
    %159 = arith.select %155, %158, %157 : vector<2x8xi1>, vector<2x8xf32>
    %cst_35 = arith.constant dense<0x7F800000> : vector<2xf32>
    %160 = vector.multi_reduction <minimumf>, %159, %cst_35 [1] : vector<2x8xf32> to vector<2xf32>
    %161 = vector.shape_cast %160 : vector<2xf32> to vector<2x1xf32>
    %162 = vector.broadcast %161 : vector<2x1xf32> to vector<2x8xf32>
    %163 = arith.cmpf oeq, %159, %162 : vector<2x8xf32>
    %cst_36 = arith.constant 0x4B800000 : f32
    %164 = vector.broadcast %cst_36 : f32 to vector<2x8xf32>
    %165 = arith.cmpf olt, %159, %164 : vector<2x8xf32>
    %166 = arith.andi %163, %165 : vector<2x8xi1>
    %167 = arith.extui %166 : vector<2x8xi1> to vector<2x8xi32>
    %168 = arith.sitofp %167 : vector<2x8xi32> to vector<2x8xf32>
    %169 = vector.extract_strided_slice %6 {offsets = [1, 0, 0], sizes = [1, 2, 8], strides = [1, 1, 1]} : vector<8x2x8xf32> to vector<1x2x8xf32>
    %170 = vector.shape_cast %169 : vector<1x2x8xf32> to vector<2x8xf32>
    %171 = arith.mulf %168, %170 : vector<2x8xf32>
    %172 = vector.extract_strided_slice %19 {offsets = [1, 0, 0], sizes = [1, 2, 8], strides = [1, 1, 1]} : vector<8x2x8xf32> to vector<1x2x8xf32>
    %173 = vector.shape_cast %172 : vector<1x2x8xf32> to vector<2x8xf32>
    %174 = arith.mulf %171, %173 : vector<2x8xf32>
    %175 = vector.extract_strided_slice %57 {offsets = [1, 0, 0], sizes = [1, 2, 8], strides = [1, 1, 1]} : vector<8x2x8xf32> to vector<1x2x8xf32>
    %176 = vector.shape_cast %175 : vector<1x2x8xf32> to vector<2x8xf32>
    %cst_37 = arith.constant 0.000000e+00 : f32
    %177 = vector.broadcast %cst_37 : f32 to vector<2x8xf32>
    %178 = arith.subf %177, %176 : vector<2x8xf32>
    %179 = arith.mulf %174, %178 : vector<2x8xf32>
    %180 = arith.addf %144, %179 : vector<2x8xf32>
    %181 = vector.extract_strided_slice %19 {offsets = [1, 0, 0], sizes = [1, 2, 8], strides = [1, 1, 1]} : vector<8x2x8xf32> to vector<1x2x8xf32>
    %182 = vector.shape_cast %181 : vector<1x2x8xf32> to vector<2x8xf32>
    %183 = arith.mulf %171, %182 : vector<2x8xf32>
    %184 = arith.addf %148, %183 : vector<2x8xf32>
    %185 = vector.extract_strided_slice %94 {offsets = [1, 0, 0], sizes = [1, 2, 8], strides = [1, 1, 1]} : vector<8x2x8xf32> to vector<1x2x8xf32>
    %186 = vector.shape_cast %185 : vector<1x2x8xf32> to vector<2x8xf32>
    %187 = arith.mulf %171, %186 : vector<2x8xf32>
    %188 = arith.addf %152, %187 : vector<2x8xf32>
    %189 = arith.addf %153, %171 : vector<2x8xf32>
    %cst_38 = arith.constant 0.000000e+00 : f32
    %190 = vector.broadcast %cst_38 : f32 to vector<2x8xf32>
    %191 = arith.cmpf ogt, %189, %190 : vector<2x8xf32>
    %192 = vector.extract_strided_slice %113 {offsets = [2, 0, 0], sizes = [1, 2, 8], strides = [1, 1, 1]} : vector<8x2x8xf32> to vector<1x2x8xf32>
    %193 = vector.shape_cast %192 : vector<1x2x8xf32> to vector<2x8xf32>
    %cst_39 = arith.constant 0x4B800000 : f32
    %194 = vector.broadcast %cst_39 : f32 to vector<2x8xf32>
    %195 = arith.select %191, %194, %193 : vector<2x8xi1>, vector<2x8xf32>
    %cst_40 = arith.constant dense<0x7F800000> : vector<2xf32>
    %196 = vector.multi_reduction <minimumf>, %195, %cst_40 [1] : vector<2x8xf32> to vector<2xf32>
    %197 = vector.shape_cast %196 : vector<2xf32> to vector<2x1xf32>
    %198 = vector.broadcast %197 : vector<2x1xf32> to vector<2x8xf32>
    %199 = arith.cmpf oeq, %195, %198 : vector<2x8xf32>
    %cst_41 = arith.constant 0x4B800000 : f32
    %200 = vector.broadcast %cst_41 : f32 to vector<2x8xf32>
    %201 = arith.cmpf olt, %195, %200 : vector<2x8xf32>
    %202 = arith.andi %199, %201 : vector<2x8xi1>
    %203 = arith.extui %202 : vector<2x8xi1> to vector<2x8xi32>
    %204 = arith.sitofp %203 : vector<2x8xi32> to vector<2x8xf32>
    %205 = vector.extract_strided_slice %6 {offsets = [2, 0, 0], sizes = [1, 2, 8], strides = [1, 1, 1]} : vector<8x2x8xf32> to vector<1x2x8xf32>
    %206 = vector.shape_cast %205 : vector<1x2x8xf32> to vector<2x8xf32>
    %207 = arith.mulf %204, %206 : vector<2x8xf32>
    %208 = vector.extract_strided_slice %19 {offsets = [2, 0, 0], sizes = [1, 2, 8], strides = [1, 1, 1]} : vector<8x2x8xf32> to vector<1x2x8xf32>
    %209 = vector.shape_cast %208 : vector<1x2x8xf32> to vector<2x8xf32>
    %210 = arith.mulf %207, %209 : vector<2x8xf32>
    %211 = vector.extract_strided_slice %57 {offsets = [2, 0, 0], sizes = [1, 2, 8], strides = [1, 1, 1]} : vector<8x2x8xf32> to vector<1x2x8xf32>
    %212 = vector.shape_cast %211 : vector<1x2x8xf32> to vector<2x8xf32>
    %cst_42 = arith.constant 0.000000e+00 : f32
    %213 = vector.broadcast %cst_42 : f32 to vector<2x8xf32>
    %214 = arith.subf %213, %212 : vector<2x8xf32>
    %215 = arith.mulf %210, %214 : vector<2x8xf32>
    %216 = arith.addf %180, %215 : vector<2x8xf32>
    %217 = vector.extract_strided_slice %19 {offsets = [2, 0, 0], sizes = [1, 2, 8], strides = [1, 1, 1]} : vector<8x2x8xf32> to vector<1x2x8xf32>
    %218 = vector.shape_cast %217 : vector<1x2x8xf32> to vector<2x8xf32>
    %219 = arith.mulf %207, %218 : vector<2x8xf32>
    %220 = arith.addf %184, %219 : vector<2x8xf32>
    %221 = vector.extract_strided_slice %94 {offsets = [2, 0, 0], sizes = [1, 2, 8], strides = [1, 1, 1]} : vector<8x2x8xf32> to vector<1x2x8xf32>
    %222 = vector.shape_cast %221 : vector<1x2x8xf32> to vector<2x8xf32>
    %223 = arith.mulf %207, %222 : vector<2x8xf32>
    %224 = arith.addf %188, %223 : vector<2x8xf32>
    %225 = arith.addf %189, %207 : vector<2x8xf32>
    %cst_43 = arith.constant 0.000000e+00 : f32
    %226 = vector.broadcast %cst_43 : f32 to vector<2x8xf32>
    %227 = arith.cmpf ogt, %225, %226 : vector<2x8xf32>
    %228 = vector.extract_strided_slice %113 {offsets = [3, 0, 0], sizes = [1, 2, 8], strides = [1, 1, 1]} : vector<8x2x8xf32> to vector<1x2x8xf32>
    %229 = vector.shape_cast %228 : vector<1x2x8xf32> to vector<2x8xf32>
    %cst_44 = arith.constant 0x4B800000 : f32
    %230 = vector.broadcast %cst_44 : f32 to vector<2x8xf32>
    %231 = arith.select %227, %230, %229 : vector<2x8xi1>, vector<2x8xf32>
    %cst_45 = arith.constant dense<0x7F800000> : vector<2xf32>
    %232 = vector.multi_reduction <minimumf>, %231, %cst_45 [1] : vector<2x8xf32> to vector<2xf32>
    %233 = vector.shape_cast %232 : vector<2xf32> to vector<2x1xf32>
    %234 = vector.broadcast %233 : vector<2x1xf32> to vector<2x8xf32>
    %235 = arith.cmpf oeq, %231, %234 : vector<2x8xf32>
    %cst_46 = arith.constant 0x4B800000 : f32
    %236 = vector.broadcast %cst_46 : f32 to vector<2x8xf32>
    %237 = arith.cmpf olt, %231, %236 : vector<2x8xf32>
    %238 = arith.andi %235, %237 : vector<2x8xi1>
    %239 = arith.extui %238 : vector<2x8xi1> to vector<2x8xi32>
    %240 = arith.sitofp %239 : vector<2x8xi32> to vector<2x8xf32>
    %241 = vector.extract_strided_slice %6 {offsets = [3, 0, 0], sizes = [1, 2, 8], strides = [1, 1, 1]} : vector<8x2x8xf32> to vector<1x2x8xf32>
    %242 = vector.shape_cast %241 : vector<1x2x8xf32> to vector<2x8xf32>
    %243 = arith.mulf %240, %242 : vector<2x8xf32>
    %244 = vector.extract_strided_slice %19 {offsets = [3, 0, 0], sizes = [1, 2, 8], strides = [1, 1, 1]} : vector<8x2x8xf32> to vector<1x2x8xf32>
    %245 = vector.shape_cast %244 : vector<1x2x8xf32> to vector<2x8xf32>
    %246 = arith.mulf %243, %245 : vector<2x8xf32>
    %247 = vector.extract_strided_slice %57 {offsets = [3, 0, 0], sizes = [1, 2, 8], strides = [1, 1, 1]} : vector<8x2x8xf32> to vector<1x2x8xf32>
    %248 = vector.shape_cast %247 : vector<1x2x8xf32> to vector<2x8xf32>
    %cst_47 = arith.constant 0.000000e+00 : f32
    %249 = vector.broadcast %cst_47 : f32 to vector<2x8xf32>
    %250 = arith.subf %249, %248 : vector<2x8xf32>
    %251 = arith.mulf %246, %250 : vector<2x8xf32>
    %252 = arith.addf %216, %251 : vector<2x8xf32>
    %253 = vector.extract_strided_slice %19 {offsets = [3, 0, 0], sizes = [1, 2, 8], strides = [1, 1, 1]} : vector<8x2x8xf32> to vector<1x2x8xf32>
    %254 = vector.shape_cast %253 : vector<1x2x8xf32> to vector<2x8xf32>
    %255 = arith.mulf %243, %254 : vector<2x8xf32>
    %256 = arith.addf %220, %255 : vector<2x8xf32>
    %257 = vector.extract_strided_slice %94 {offsets = [3, 0, 0], sizes = [1, 2, 8], strides = [1, 1, 1]} : vector<8x2x8xf32> to vector<1x2x8xf32>
    %258 = vector.shape_cast %257 : vector<1x2x8xf32> to vector<2x8xf32>
    %259 = arith.mulf %243, %258 : vector<2x8xf32>
    %260 = arith.addf %224, %259 : vector<2x8xf32>
    %261 = arith.addf %225, %243 : vector<2x8xf32>
    %cst_48 = arith.constant 0.000000e+00 : f32
    %262 = vector.broadcast %cst_48 : f32 to vector<2x8xf32>
    %263 = arith.cmpf ogt, %261, %262 : vector<2x8xf32>
    %264 = vector.extract_strided_slice %113 {offsets = [4, 0, 0], sizes = [1, 2, 8], strides = [1, 1, 1]} : vector<8x2x8xf32> to vector<1x2x8xf32>
    %265 = vector.shape_cast %264 : vector<1x2x8xf32> to vector<2x8xf32>
    %cst_49 = arith.constant 0x4B800000 : f32
    %266 = vector.broadcast %cst_49 : f32 to vector<2x8xf32>
    %267 = arith.select %263, %266, %265 : vector<2x8xi1>, vector<2x8xf32>
    %cst_50 = arith.constant dense<0x7F800000> : vector<2xf32>
    %268 = vector.multi_reduction <minimumf>, %267, %cst_50 [1] : vector<2x8xf32> to vector<2xf32>
    %269 = vector.shape_cast %268 : vector<2xf32> to vector<2x1xf32>
    %270 = vector.broadcast %269 : vector<2x1xf32> to vector<2x8xf32>
    %271 = arith.cmpf oeq, %267, %270 : vector<2x8xf32>
    %cst_51 = arith.constant 0x4B800000 : f32
    %272 = vector.broadcast %cst_51 : f32 to vector<2x8xf32>
    %273 = arith.cmpf olt, %267, %272 : vector<2x8xf32>
    %274 = arith.andi %271, %273 : vector<2x8xi1>
    %275 = arith.extui %274 : vector<2x8xi1> to vector<2x8xi32>
    %276 = arith.sitofp %275 : vector<2x8xi32> to vector<2x8xf32>
    %277 = vector.extract_strided_slice %6 {offsets = [4, 0, 0], sizes = [1, 2, 8], strides = [1, 1, 1]} : vector<8x2x8xf32> to vector<1x2x8xf32>
    %278 = vector.shape_cast %277 : vector<1x2x8xf32> to vector<2x8xf32>
    %279 = arith.mulf %276, %278 : vector<2x8xf32>
    %280 = vector.extract_strided_slice %19 {offsets = [4, 0, 0], sizes = [1, 2, 8], strides = [1, 1, 1]} : vector<8x2x8xf32> to vector<1x2x8xf32>
    %281 = vector.shape_cast %280 : vector<1x2x8xf32> to vector<2x8xf32>
    %282 = arith.mulf %279, %281 : vector<2x8xf32>
    %283 = vector.extract_strided_slice %57 {offsets = [4, 0, 0], sizes = [1, 2, 8], strides = [1, 1, 1]} : vector<8x2x8xf32> to vector<1x2x8xf32>
    %284 = vector.shape_cast %283 : vector<1x2x8xf32> to vector<2x8xf32>
    %cst_52 = arith.constant 0.000000e+00 : f32
    %285 = vector.broadcast %cst_52 : f32 to vector<2x8xf32>
    %286 = arith.subf %285, %284 : vector<2x8xf32>
    %287 = arith.mulf %282, %286 : vector<2x8xf32>
    %288 = arith.addf %252, %287 : vector<2x8xf32>
    %289 = vector.extract_strided_slice %19 {offsets = [4, 0, 0], sizes = [1, 2, 8], strides = [1, 1, 1]} : vector<8x2x8xf32> to vector<1x2x8xf32>
    %290 = vector.shape_cast %289 : vector<1x2x8xf32> to vector<2x8xf32>
    %291 = arith.mulf %279, %290 : vector<2x8xf32>
    %292 = arith.addf %256, %291 : vector<2x8xf32>
    %293 = vector.extract_strided_slice %94 {offsets = [4, 0, 0], sizes = [1, 2, 8], strides = [1, 1, 1]} : vector<8x2x8xf32> to vector<1x2x8xf32>
    %294 = vector.shape_cast %293 : vector<1x2x8xf32> to vector<2x8xf32>
    %295 = arith.mulf %279, %294 : vector<2x8xf32>
    %296 = arith.addf %260, %295 : vector<2x8xf32>
    %297 = arith.addf %261, %279 : vector<2x8xf32>
    %cst_53 = arith.constant 0.000000e+00 : f32
    %298 = vector.broadcast %cst_53 : f32 to vector<2x8xf32>
    %299 = arith.cmpf ogt, %297, %298 : vector<2x8xf32>
    %300 = vector.extract_strided_slice %113 {offsets = [5, 0, 0], sizes = [1, 2, 8], strides = [1, 1, 1]} : vector<8x2x8xf32> to vector<1x2x8xf32>
    %301 = vector.shape_cast %300 : vector<1x2x8xf32> to vector<2x8xf32>
    %cst_54 = arith.constant 0x4B800000 : f32
    %302 = vector.broadcast %cst_54 : f32 to vector<2x8xf32>
    %303 = arith.select %299, %302, %301 : vector<2x8xi1>, vector<2x8xf32>
    %cst_55 = arith.constant dense<0x7F800000> : vector<2xf32>
    %304 = vector.multi_reduction <minimumf>, %303, %cst_55 [1] : vector<2x8xf32> to vector<2xf32>
    %305 = vector.shape_cast %304 : vector<2xf32> to vector<2x1xf32>
    %306 = vector.broadcast %305 : vector<2x1xf32> to vector<2x8xf32>
    %307 = arith.cmpf oeq, %303, %306 : vector<2x8xf32>
    %cst_56 = arith.constant 0x4B800000 : f32
    %308 = vector.broadcast %cst_56 : f32 to vector<2x8xf32>
    %309 = arith.cmpf olt, %303, %308 : vector<2x8xf32>
    %310 = arith.andi %307, %309 : vector<2x8xi1>
    %311 = arith.extui %310 : vector<2x8xi1> to vector<2x8xi32>
    %312 = arith.sitofp %311 : vector<2x8xi32> to vector<2x8xf32>
    %313 = vector.extract_strided_slice %6 {offsets = [5, 0, 0], sizes = [1, 2, 8], strides = [1, 1, 1]} : vector<8x2x8xf32> to vector<1x2x8xf32>
    %314 = vector.shape_cast %313 : vector<1x2x8xf32> to vector<2x8xf32>
    %315 = arith.mulf %312, %314 : vector<2x8xf32>
    %316 = vector.extract_strided_slice %19 {offsets = [5, 0, 0], sizes = [1, 2, 8], strides = [1, 1, 1]} : vector<8x2x8xf32> to vector<1x2x8xf32>
    %317 = vector.shape_cast %316 : vector<1x2x8xf32> to vector<2x8xf32>
    %318 = arith.mulf %315, %317 : vector<2x8xf32>
    %319 = vector.extract_strided_slice %57 {offsets = [5, 0, 0], sizes = [1, 2, 8], strides = [1, 1, 1]} : vector<8x2x8xf32> to vector<1x2x8xf32>
    %320 = vector.shape_cast %319 : vector<1x2x8xf32> to vector<2x8xf32>
    %cst_57 = arith.constant 0.000000e+00 : f32
    %321 = vector.broadcast %cst_57 : f32 to vector<2x8xf32>
    %322 = arith.subf %321, %320 : vector<2x8xf32>
    %323 = arith.mulf %318, %322 : vector<2x8xf32>
    %324 = arith.addf %288, %323 : vector<2x8xf32>
    %325 = vector.extract_strided_slice %19 {offsets = [5, 0, 0], sizes = [1, 2, 8], strides = [1, 1, 1]} : vector<8x2x8xf32> to vector<1x2x8xf32>
    %326 = vector.shape_cast %325 : vector<1x2x8xf32> to vector<2x8xf32>
    %327 = arith.mulf %315, %326 : vector<2x8xf32>
    %328 = arith.addf %292, %327 : vector<2x8xf32>
    %329 = vector.extract_strided_slice %94 {offsets = [5, 0, 0], sizes = [1, 2, 8], strides = [1, 1, 1]} : vector<8x2x8xf32> to vector<1x2x8xf32>
    %330 = vector.shape_cast %329 : vector<1x2x8xf32> to vector<2x8xf32>
    %331 = arith.mulf %315, %330 : vector<2x8xf32>
    %332 = arith.addf %296, %331 : vector<2x8xf32>
    %333 = arith.addf %297, %315 : vector<2x8xf32>
    %cst_58 = arith.constant 0.000000e+00 : f32
    %334 = vector.broadcast %cst_58 : f32 to vector<2x8xf32>
    %335 = arith.cmpf ogt, %333, %334 : vector<2x8xf32>
    %336 = vector.extract_strided_slice %113 {offsets = [6, 0, 0], sizes = [1, 2, 8], strides = [1, 1, 1]} : vector<8x2x8xf32> to vector<1x2x8xf32>
    %337 = vector.shape_cast %336 : vector<1x2x8xf32> to vector<2x8xf32>
    %cst_59 = arith.constant 0x4B800000 : f32
    %338 = vector.broadcast %cst_59 : f32 to vector<2x8xf32>
    %339 = arith.select %335, %338, %337 : vector<2x8xi1>, vector<2x8xf32>
    %cst_60 = arith.constant dense<0x7F800000> : vector<2xf32>
    %340 = vector.multi_reduction <minimumf>, %339, %cst_60 [1] : vector<2x8xf32> to vector<2xf32>
    %341 = vector.shape_cast %340 : vector<2xf32> to vector<2x1xf32>
    %342 = vector.broadcast %341 : vector<2x1xf32> to vector<2x8xf32>
    %343 = arith.cmpf oeq, %339, %342 : vector<2x8xf32>
    %cst_61 = arith.constant 0x4B800000 : f32
    %344 = vector.broadcast %cst_61 : f32 to vector<2x8xf32>
    %345 = arith.cmpf olt, %339, %344 : vector<2x8xf32>
    %346 = arith.andi %343, %345 : vector<2x8xi1>
    %347 = arith.extui %346 : vector<2x8xi1> to vector<2x8xi32>
    %348 = arith.sitofp %347 : vector<2x8xi32> to vector<2x8xf32>
    %349 = vector.extract_strided_slice %6 {offsets = [6, 0, 0], sizes = [1, 2, 8], strides = [1, 1, 1]} : vector<8x2x8xf32> to vector<1x2x8xf32>
    %350 = vector.shape_cast %349 : vector<1x2x8xf32> to vector<2x8xf32>
    %351 = arith.mulf %348, %350 : vector<2x8xf32>
    %352 = vector.extract_strided_slice %19 {offsets = [6, 0, 0], sizes = [1, 2, 8], strides = [1, 1, 1]} : vector<8x2x8xf32> to vector<1x2x8xf32>
    %353 = vector.shape_cast %352 : vector<1x2x8xf32> to vector<2x8xf32>
    %354 = arith.mulf %351, %353 : vector<2x8xf32>
    %355 = vector.extract_strided_slice %57 {offsets = [6, 0, 0], sizes = [1, 2, 8], strides = [1, 1, 1]} : vector<8x2x8xf32> to vector<1x2x8xf32>
    %356 = vector.shape_cast %355 : vector<1x2x8xf32> to vector<2x8xf32>
    %cst_62 = arith.constant 0.000000e+00 : f32
    %357 = vector.broadcast %cst_62 : f32 to vector<2x8xf32>
    %358 = arith.subf %357, %356 : vector<2x8xf32>
    %359 = arith.mulf %354, %358 : vector<2x8xf32>
    %360 = arith.addf %324, %359 : vector<2x8xf32>
    %361 = vector.extract_strided_slice %19 {offsets = [6, 0, 0], sizes = [1, 2, 8], strides = [1, 1, 1]} : vector<8x2x8xf32> to vector<1x2x8xf32>
    %362 = vector.shape_cast %361 : vector<1x2x8xf32> to vector<2x8xf32>
    %363 = arith.mulf %351, %362 : vector<2x8xf32>
    %364 = arith.addf %328, %363 : vector<2x8xf32>
    %365 = vector.extract_strided_slice %94 {offsets = [6, 0, 0], sizes = [1, 2, 8], strides = [1, 1, 1]} : vector<8x2x8xf32> to vector<1x2x8xf32>
    %366 = vector.shape_cast %365 : vector<1x2x8xf32> to vector<2x8xf32>
    %367 = arith.mulf %351, %366 : vector<2x8xf32>
    %368 = arith.addf %332, %367 : vector<2x8xf32>
    %369 = arith.addf %333, %351 : vector<2x8xf32>
    %cst_63 = arith.constant 0.000000e+00 : f32
    %370 = vector.broadcast %cst_63 : f32 to vector<2x8xf32>
    %371 = arith.cmpf ogt, %369, %370 : vector<2x8xf32>
    %372 = vector.extract_strided_slice %113 {offsets = [7, 0, 0], sizes = [1, 2, 8], strides = [1, 1, 1]} : vector<8x2x8xf32> to vector<1x2x8xf32>
    %373 = vector.shape_cast %372 : vector<1x2x8xf32> to vector<2x8xf32>
    %cst_64 = arith.constant 0x4B800000 : f32
    %374 = vector.broadcast %cst_64 : f32 to vector<2x8xf32>
    %375 = arith.select %371, %374, %373 : vector<2x8xi1>, vector<2x8xf32>
    %cst_65 = arith.constant dense<0x7F800000> : vector<2xf32>
    %376 = vector.multi_reduction <minimumf>, %375, %cst_65 [1] : vector<2x8xf32> to vector<2xf32>
    %377 = vector.shape_cast %376 : vector<2xf32> to vector<2x1xf32>
    %378 = vector.broadcast %377 : vector<2x1xf32> to vector<2x8xf32>
    %379 = arith.cmpf oeq, %375, %378 : vector<2x8xf32>
    %cst_66 = arith.constant 0x4B800000 : f32
    %380 = vector.broadcast %cst_66 : f32 to vector<2x8xf32>
    %381 = arith.cmpf olt, %375, %380 : vector<2x8xf32>
    %382 = arith.andi %379, %381 : vector<2x8xi1>
    %383 = arith.extui %382 : vector<2x8xi1> to vector<2x8xi32>
    %384 = arith.sitofp %383 : vector<2x8xi32> to vector<2x8xf32>
    %385 = vector.extract_strided_slice %6 {offsets = [7, 0, 0], sizes = [1, 2, 8], strides = [1, 1, 1]} : vector<8x2x8xf32> to vector<1x2x8xf32>
    %386 = vector.shape_cast %385 : vector<1x2x8xf32> to vector<2x8xf32>
    %387 = arith.mulf %384, %386 : vector<2x8xf32>
    %388 = vector.extract_strided_slice %19 {offsets = [7, 0, 0], sizes = [1, 2, 8], strides = [1, 1, 1]} : vector<8x2x8xf32> to vector<1x2x8xf32>
    %389 = vector.shape_cast %388 : vector<1x2x8xf32> to vector<2x8xf32>
    %390 = arith.mulf %387, %389 : vector<2x8xf32>
    %391 = vector.extract_strided_slice %57 {offsets = [7, 0, 0], sizes = [1, 2, 8], strides = [1, 1, 1]} : vector<8x2x8xf32> to vector<1x2x8xf32>
    %392 = vector.shape_cast %391 : vector<1x2x8xf32> to vector<2x8xf32>
    %cst_67 = arith.constant 0.000000e+00 : f32
    %393 = vector.broadcast %cst_67 : f32 to vector<2x8xf32>
    %394 = arith.subf %393, %392 : vector<2x8xf32>
    %395 = arith.mulf %390, %394 : vector<2x8xf32>
    %396 = arith.addf %360, %395 : vector<2x8xf32>
    %397 = vector.extract_strided_slice %19 {offsets = [7, 0, 0], sizes = [1, 2, 8], strides = [1, 1, 1]} : vector<8x2x8xf32> to vector<1x2x8xf32>
    %398 = vector.shape_cast %397 : vector<1x2x8xf32> to vector<2x8xf32>
    %399 = arith.mulf %387, %398 : vector<2x8xf32>
    %400 = arith.addf %364, %399 : vector<2x8xf32>
    %401 = vector.extract_strided_slice %94 {offsets = [7, 0, 0], sizes = [1, 2, 8], strides = [1, 1, 1]} : vector<8x2x8xf32> to vector<1x2x8xf32>
    %402 = vector.shape_cast %401 : vector<1x2x8xf32> to vector<2x8xf32>
    %403 = arith.mulf %387, %402 : vector<2x8xf32>
    %404 = arith.addf %368, %403 : vector<2x8xf32>
    %405 = arith.addf %369, %387 : vector<2x8xf32>
    %cst_68 = arith.constant 1.000000e+00 : f32
    %406 = vector.broadcast %cst_68 : f32 to vector<2x8xf32>
    %407 = arith.subf %406, %405 : vector<2x8xf32>
    %408 = vector.shape_cast %396 : vector<2x8xf32> to vector<1x2x8xf32>
    %cst_69 = arith.constant dense<0.000000e+00> : vector<1xf32>
    %409 = vector.multi_reduction <add>, %408, %cst_69 [1, 2] : vector<1x2x8xf32> to vector<1xf32>
    %410 = vector.shape_cast %409 : vector<1xf32> to vector<1x1x1xf32>
    %411 = vector.extract %410[0, 0, 0] : f32 from vector<1x1x1xf32>
    %412 = vector.broadcast %411 : f32 to vector<1x1xf32>
    %cst_70 = arith.constant 0.000000e+00 : f32
    %413 = vector.broadcast %cst_70 : f32 to vector<2x8xf32>
    %414 = arith.subf %413, %37 : vector<2x8xf32>
    %415 = arith.mulf %407, %414 : vector<2x8xf32>
    %416 = vector.shape_cast %415 : vector<2x8xf32> to vector<1x2x8xf32>
    %cst_71 = arith.constant dense<0.000000e+00> : vector<1xf32>
    %417 = vector.multi_reduction <add>, %416, %cst_71 [1, 2] : vector<1x2x8xf32> to vector<1xf32>
    %418 = vector.shape_cast %417 : vector<1xf32> to vector<1x1x1xf32>
    %419 = vector.extract %418[0, 0, 0] : f32 from vector<1x1x1xf32>
    %420 = vector.broadcast %419 : f32 to vector<1x1xf32>
    %cst_72 = arith.constant 1.000000e-01 : f32
    %421 = vector.broadcast %cst_72 : f32 to vector<1x1xf32>
    %422 = arith.mulf %421, %420 : vector<1x1xf32>
    %423 = arith.addf %412, %422 : vector<1x1xf32>
    %424 = vector.shape_cast %400 : vector<2x8xf32> to vector<1x2x8xf32>
    %cst_73 = arith.constant dense<0.000000e+00> : vector<1xf32>
    %425 = vector.multi_reduction <add>, %424, %cst_73 [1, 2] : vector<1x2x8xf32> to vector<1xf32>
    %426 = vector.shape_cast %425 : vector<1xf32> to vector<1x1x1xf32>
    %427 = vector.extract %426[0, 0, 0] : f32 from vector<1x1x1xf32>
    %428 = vector.broadcast %427 : f32 to vector<1x1xf32>
    %429 = vector.shape_cast %407 : vector<2x8xf32> to vector<1x2x8xf32>
    %cst_74 = arith.constant dense<0.000000e+00> : vector<1xf32>
    %430 = vector.multi_reduction <add>, %429, %cst_74 [1, 2] : vector<1x2x8xf32> to vector<1xf32>
    %431 = vector.shape_cast %430 : vector<1xf32> to vector<1x1x1xf32>
    %432 = vector.extract %431[0, 0, 0] : f32 from vector<1x1x1xf32>
    %433 = vector.broadcast %432 : f32 to vector<1x1xf32>
    %cst_75 = arith.constant 1.000000e-01 : f32
    %434 = vector.broadcast %cst_75 : f32 to vector<1x1xf32>
    %435 = arith.mulf %434, %433 : vector<1x1xf32>
    %436 = arith.addf %428, %435 : vector<1x1xf32>
    %437 = vector.shape_cast %404 : vector<2x8xf32> to vector<1x2x8xf32>
    %cst_76 = arith.constant dense<0.000000e+00> : vector<1xf32>
    %438 = vector.multi_reduction <add>, %437, %cst_76 [1, 2] : vector<1x2x8xf32> to vector<1xf32>
    %439 = vector.shape_cast %438 : vector<1xf32> to vector<1x1x1xf32>
    %440 = vector.extract %439[0, 0, 0] : f32 from vector<1x1x1xf32>
    %441 = vector.broadcast %440 : f32 to vector<1x1xf32>
    %442 = vector.shape_cast %405 : vector<2x8xf32> to vector<1x2x8xf32>
    %cst_77 = arith.constant dense<0.000000e+00> : vector<1xf32>
    %443 = vector.multi_reduction <add>, %442, %cst_77 [1, 2] : vector<1x2x8xf32> to vector<1xf32>
    %444 = vector.shape_cast %443 : vector<1xf32> to vector<1x1x1xf32>
    %445 = vector.extract %444[0, 0, 0] : f32 from vector<1x1x1xf32>
    %446 = vector.broadcast %445 : f32 to vector<1x1xf32>
    %cst_78 = arith.constant 9.99999997E-7 : f32
    %447 = vector.broadcast %cst_78 : f32 to vector<1x1xf32>
    %448 = arith.maximumf %436, %447 : vector<1x1xf32>
    %449 = arith.divf %423, %448 : vector<1x1xf32>
    %cst_79 = arith.constant 1.000000e+00 : f32
    %450 = vector.broadcast %cst_79 : f32 to vector<1x1xf32>
    %451 = arith.maximumf %446, %450 : vector<1x1xf32>
    %452 = arith.divf %441, %451 : vector<1x1xf32>
    %453 = vector.extract_strided_slice %0 {offsets = [1, 0, 0, 0], sizes = [1, 1, 2, 8], strides = [1, 1, 1, 1]} : vector<2x2x2x8xf32> to vector<1x1x2x8xf32>
    %454 = vector.shape_cast %453 : vector<1x1x2x8xf32> to vector<2x8xf32>
    %455 = vector.extract_strided_slice %0 {offsets = [1, 1, 0, 0], sizes = [1, 1, 2, 8], strides = [1, 1, 1, 1]} : vector<2x2x2x8xf32> to vector<1x1x2x8xf32>
    %456 = vector.shape_cast %455 : vector<1x1x2x8xf32> to vector<2x8xf32>
    %457 = arith.maximumf %454, %456 : vector<2x8xf32>
    %458 = arith.subf %454, %457 : vector<2x8xf32>
    %459 = math.exp %458 : vector<2x8xf32>
    %460 = arith.subf %456, %457 : vector<2x8xf32>
    %461 = math.exp %460 : vector<2x8xf32>
    %462 = arith.addf %459, %461 : vector<2x8xf32>
    %463 = tpu.reciprocal %462 {approx = true} : vector<2x8xf32> -> vector<2x8xf32>
    %464 = arith.mulf %459, %463 : vector<2x8xf32>
    %465 = arith.mulf %461, %463 : vector<2x8xf32>
    %466 = math.log %462 : vector<2x8xf32>
    %467 = arith.subf %454, %457 : vector<2x8xf32>
    %468 = arith.subf %467, %466 : vector<2x8xf32>
    %469 = arith.subf %456, %457 : vector<2x8xf32>
    %470 = arith.subf %469, %466 : vector<2x8xf32>
    %cst_80 = arith.constant 0.000000e+00 : f32
    %471 = vector.broadcast %cst_80 : f32 to vector<8x2x8xf32>
    %cst_81 = arith.constant 0.000000e+00 : f32
    %472 = vector.broadcast %cst_81 : f32 to vector<8x2x8xf32>
    %473 = vector.shape_cast %464 : vector<2x8xf32> to vector<1x2x8xf32>
    %474 = vector.broadcast %473 : vector<1x2x8xf32> to vector<8x2x8xf32>
    %475 = arith.mulf %10, %474 : vector<8x2x8xf32>
    %476 = arith.subf %471, %475 : vector<8x2x8xf32>
    %477 = vector.shape_cast %468 : vector<2x8xf32> to vector<1x2x8xf32>
    %478 = vector.broadcast %477 : vector<1x2x8xf32> to vector<8x2x8xf32>
    %479 = arith.mulf %10, %478 : vector<8x2x8xf32>
    %480 = arith.addf %472, %479 : vector<8x2x8xf32>
    %481 = vector.shape_cast %465 : vector<2x8xf32> to vector<1x2x8xf32>
    %482 = vector.broadcast %481 : vector<1x2x8xf32> to vector<8x2x8xf32>
    %483 = arith.mulf %14, %482 : vector<8x2x8xf32>
    %484 = arith.subf %476, %483 : vector<8x2x8xf32>
    %485 = vector.shape_cast %470 : vector<2x8xf32> to vector<1x2x8xf32>
    %486 = vector.broadcast %485 : vector<1x2x8xf32> to vector<8x2x8xf32>
    %487 = arith.mulf %14, %486 : vector<8x2x8xf32>
    %488 = arith.addf %480, %487 : vector<8x2x8xf32>
    %cst_82 = arith.constant 0.000000e+00 : f32
    %489 = vector.broadcast %cst_82 : f32 to vector<8x2x8xf32>
    %490 = vector.extract_strided_slice %1 {offsets = [1, 0, 0, 0], sizes = [1, 1, 2, 8], strides = [1, 1, 1, 1]} : vector<2x4x2x8xf32> to vector<1x1x2x8xf32>
    %491 = vector.shape_cast %490 : vector<1x1x2x8xf32> to vector<2x8xf32>
    %492 = vector.shape_cast %491 : vector<2x8xf32> to vector<1x2x8xf32>
    %493 = vector.extract_strided_slice %2 {offsets = [0, 0, 0, 0], sizes = [8, 1, 2, 8], strides = [1, 1, 1, 1]} : vector<8x6x2x8xf32> to vector<8x1x2x8xf32>
    %494 = vector.shape_cast %493 : vector<8x1x2x8xf32> to vector<8x2x8xf32>
    %495 = vector.broadcast %492 : vector<1x2x8xf32> to vector<8x2x8xf32>
    %496 = arith.subf %495, %494 : vector<8x2x8xf32>
    %497 = math.absf %496 : vector<8x2x8xf32>
    %498 = arith.addf %489, %497 : vector<8x2x8xf32>
    %499 = vector.extract_strided_slice %1 {offsets = [1, 1, 0, 0], sizes = [1, 1, 2, 8], strides = [1, 1, 1, 1]} : vector<2x4x2x8xf32> to vector<1x1x2x8xf32>
    %500 = vector.shape_cast %499 : vector<1x1x2x8xf32> to vector<2x8xf32>
    %501 = vector.shape_cast %500 : vector<2x8xf32> to vector<1x2x8xf32>
    %502 = vector.extract_strided_slice %2 {offsets = [0, 1, 0, 0], sizes = [8, 1, 2, 8], strides = [1, 1, 1, 1]} : vector<8x6x2x8xf32> to vector<8x1x2x8xf32>
    %503 = vector.shape_cast %502 : vector<8x1x2x8xf32> to vector<8x2x8xf32>
    %504 = vector.broadcast %501 : vector<1x2x8xf32> to vector<8x2x8xf32>
    %505 = arith.subf %504, %503 : vector<8x2x8xf32>
    %506 = math.absf %505 : vector<8x2x8xf32>
    %507 = arith.addf %498, %506 : vector<8x2x8xf32>
    %508 = vector.extract_strided_slice %1 {offsets = [1, 2, 0, 0], sizes = [1, 1, 2, 8], strides = [1, 1, 1, 1]} : vector<2x4x2x8xf32> to vector<1x1x2x8xf32>
    %509 = vector.shape_cast %508 : vector<1x1x2x8xf32> to vector<2x8xf32>
    %510 = vector.shape_cast %509 : vector<2x8xf32> to vector<1x2x8xf32>
    %511 = vector.extract_strided_slice %2 {offsets = [0, 2, 0, 0], sizes = [8, 1, 2, 8], strides = [1, 1, 1, 1]} : vector<8x6x2x8xf32> to vector<8x1x2x8xf32>
    %512 = vector.shape_cast %511 : vector<8x1x2x8xf32> to vector<8x2x8xf32>
    %513 = vector.broadcast %510 : vector<1x2x8xf32> to vector<8x2x8xf32>
    %514 = arith.subf %513, %512 : vector<8x2x8xf32>
    %515 = math.absf %514 : vector<8x2x8xf32>
    %516 = arith.addf %507, %515 : vector<8x2x8xf32>
    %517 = vector.extract_strided_slice %1 {offsets = [1, 3, 0, 0], sizes = [1, 1, 2, 8], strides = [1, 1, 1, 1]} : vector<2x4x2x8xf32> to vector<1x1x2x8xf32>
    %518 = vector.shape_cast %517 : vector<1x1x2x8xf32> to vector<2x8xf32>
    %519 = vector.shape_cast %518 : vector<2x8xf32> to vector<1x2x8xf32>
    %520 = vector.extract_strided_slice %2 {offsets = [0, 3, 0, 0], sizes = [8, 1, 2, 8], strides = [1, 1, 1, 1]} : vector<8x6x2x8xf32> to vector<8x1x2x8xf32>
    %521 = vector.shape_cast %520 : vector<8x1x2x8xf32> to vector<8x2x8xf32>
    %522 = vector.broadcast %519 : vector<1x2x8xf32> to vector<8x2x8xf32>
    %523 = arith.subf %522, %521 : vector<8x2x8xf32>
    %524 = math.absf %523 : vector<8x2x8xf32>
    %525 = arith.addf %516, %524 : vector<8x2x8xf32>
    %cst_83 = arith.constant 1.000000e+00 : f32
    %526 = vector.broadcast %cst_83 : f32 to vector<8x2x8xf32>
    %527 = arith.mulf %526, %484 : vector<8x2x8xf32>
    %cst_84 = arith.constant 3.000000e+00 : f32
    %528 = vector.broadcast %cst_84 : f32 to vector<8x2x8xf32>
    %529 = arith.mulf %528, %525 : vector<8x2x8xf32>
    %530 = arith.addf %527, %529 : vector<8x2x8xf32>
    %cst_85 = arith.constant -2.000000e+00 : f32
    %cst_86 = arith.constant 1.400000e+01 : f32
    %531 = vector.broadcast %cst_85 : f32 to vector<8x2x8xf32>
    %532 = arith.maximumf %531, %530 : vector<8x2x8xf32>
    %533 = vector.broadcast %cst_86 : f32 to vector<8x2x8xf32>
    %534 = arith.minimumf %533, %532 : vector<8x2x8xf32>
    %cst_87 = arith.constant -2.000000e+00 : f32
    %535 = vector.broadcast %cst_87 : f32 to vector<8x2x8xf32>
    %536 = arith.subf %534, %535 : vector<8x2x8xf32>
    %cst_88 = arith.constant 6.553600e+04 : f32
    %537 = vector.broadcast %cst_88 : f32 to vector<8x2x8xf32>
    %538 = arith.mulf %536, %537 : vector<8x2x8xf32>
    %539 = math.floor %538 : vector<8x2x8xf32>
    %cst_89 = arith.constant 8.000000e+00 : f32
    %540 = vector.broadcast %cst_89 : f32 to vector<8x2x8xf32>
    %541 = arith.mulf %539, %540 : vector<8x2x8xf32>
    %542 = vector.shape_cast %21 : vector<2x8xf32> to vector<1x2x8xf32>
    %543 = vector.broadcast %542 : vector<1x2x8xf32> to vector<8x2x8xf32>
    %544 = arith.addf %541, %543 : vector<8x2x8xf32>
    %cst_90 = arith.constant 0.000000e+00 : f32
    %545 = vector.broadcast %cst_90 : f32 to vector<2x8xf32>
    %cst_91 = arith.constant 0.000000e+00 : f32
    %546 = vector.broadcast %cst_91 : f32 to vector<2x8xf32>
    %cst_92 = arith.constant 0.000000e+00 : f32
    %547 = vector.broadcast %cst_92 : f32 to vector<2x8xf32>
    %cst_93 = arith.constant 0.000000e+00 : f32
    %548 = vector.broadcast %cst_93 : f32 to vector<2x8xf32>
    %cst_94 = arith.constant 0.000000e+00 : f32
    %549 = vector.broadcast %cst_94 : f32 to vector<2x8xf32>
    %550 = arith.cmpf ogt, %545, %549 : vector<2x8xf32>
    %551 = vector.extract_strided_slice %544 {offsets = [0, 0, 0], sizes = [1, 2, 8], strides = [1, 1, 1]} : vector<8x2x8xf32> to vector<1x2x8xf32>
    %552 = vector.shape_cast %551 : vector<1x2x8xf32> to vector<2x8xf32>
    %cst_95 = arith.constant 0x4B800000 : f32
    %553 = vector.broadcast %cst_95 : f32 to vector<2x8xf32>
    %554 = arith.select %550, %553, %552 : vector<2x8xi1>, vector<2x8xf32>
    %cst_96 = arith.constant dense<0x7F800000> : vector<2xf32>
    %555 = vector.multi_reduction <minimumf>, %554, %cst_96 [1] : vector<2x8xf32> to vector<2xf32>
    %556 = vector.shape_cast %555 : vector<2xf32> to vector<2x1xf32>
    %557 = vector.broadcast %556 : vector<2x1xf32> to vector<2x8xf32>
    %558 = arith.cmpf oeq, %554, %557 : vector<2x8xf32>
    %cst_97 = arith.constant 0x4B800000 : f32
    %559 = vector.broadcast %cst_97 : f32 to vector<2x8xf32>
    %560 = arith.cmpf olt, %554, %559 : vector<2x8xf32>
    %561 = arith.andi %558, %560 : vector<2x8xi1>
    %562 = arith.extui %561 : vector<2x8xi1> to vector<2x8xi32>
    %563 = arith.sitofp %562 : vector<2x8xi32> to vector<2x8xf32>
    %564 = vector.extract_strided_slice %6 {offsets = [0, 0, 0], sizes = [1, 2, 8], strides = [1, 1, 1]} : vector<8x2x8xf32> to vector<1x2x8xf32>
    %565 = vector.shape_cast %564 : vector<1x2x8xf32> to vector<2x8xf32>
    %566 = arith.mulf %563, %565 : vector<2x8xf32>
    %567 = vector.extract_strided_slice %19 {offsets = [0, 0, 0], sizes = [1, 2, 8], strides = [1, 1, 1]} : vector<8x2x8xf32> to vector<1x2x8xf32>
    %568 = vector.shape_cast %567 : vector<1x2x8xf32> to vector<2x8xf32>
    %569 = arith.mulf %566, %568 : vector<2x8xf32>
    %570 = vector.extract_strided_slice %488 {offsets = [0, 0, 0], sizes = [1, 2, 8], strides = [1, 1, 1]} : vector<8x2x8xf32> to vector<1x2x8xf32>
    %571 = vector.shape_cast %570 : vector<1x2x8xf32> to vector<2x8xf32>
    %cst_98 = arith.constant 0.000000e+00 : f32
    %572 = vector.broadcast %cst_98 : f32 to vector<2x8xf32>
    %573 = arith.subf %572, %571 : vector<2x8xf32>
    %574 = arith.mulf %569, %573 : vector<2x8xf32>
    %575 = arith.addf %546, %574 : vector<2x8xf32>
    %576 = vector.extract_strided_slice %19 {offsets = [0, 0, 0], sizes = [1, 2, 8], strides = [1, 1, 1]} : vector<8x2x8xf32> to vector<1x2x8xf32>
    %577 = vector.shape_cast %576 : vector<1x2x8xf32> to vector<2x8xf32>
    %578 = arith.mulf %566, %577 : vector<2x8xf32>
    %579 = arith.addf %547, %578 : vector<2x8xf32>
    %580 = vector.extract_strided_slice %525 {offsets = [0, 0, 0], sizes = [1, 2, 8], strides = [1, 1, 1]} : vector<8x2x8xf32> to vector<1x2x8xf32>
    %581 = vector.shape_cast %580 : vector<1x2x8xf32> to vector<2x8xf32>
    %582 = arith.mulf %566, %581 : vector<2x8xf32>
    %583 = arith.addf %548, %582 : vector<2x8xf32>
    %584 = arith.addf %545, %566 : vector<2x8xf32>
    %cst_99 = arith.constant 0.000000e+00 : f32
    %585 = vector.broadcast %cst_99 : f32 to vector<2x8xf32>
    %586 = arith.cmpf ogt, %584, %585 : vector<2x8xf32>
    %587 = vector.extract_strided_slice %544 {offsets = [1, 0, 0], sizes = [1, 2, 8], strides = [1, 1, 1]} : vector<8x2x8xf32> to vector<1x2x8xf32>
    %588 = vector.shape_cast %587 : vector<1x2x8xf32> to vector<2x8xf32>
    %cst_100 = arith.constant 0x4B800000 : f32
    %589 = vector.broadcast %cst_100 : f32 to vector<2x8xf32>
    %590 = arith.select %586, %589, %588 : vector<2x8xi1>, vector<2x8xf32>
    %cst_101 = arith.constant dense<0x7F800000> : vector<2xf32>
    %591 = vector.multi_reduction <minimumf>, %590, %cst_101 [1] : vector<2x8xf32> to vector<2xf32>
    %592 = vector.shape_cast %591 : vector<2xf32> to vector<2x1xf32>
    %593 = vector.broadcast %592 : vector<2x1xf32> to vector<2x8xf32>
    %594 = arith.cmpf oeq, %590, %593 : vector<2x8xf32>
    %cst_102 = arith.constant 0x4B800000 : f32
    %595 = vector.broadcast %cst_102 : f32 to vector<2x8xf32>
    %596 = arith.cmpf olt, %590, %595 : vector<2x8xf32>
    %597 = arith.andi %594, %596 : vector<2x8xi1>
    %598 = arith.extui %597 : vector<2x8xi1> to vector<2x8xi32>
    %599 = arith.sitofp %598 : vector<2x8xi32> to vector<2x8xf32>
    %600 = vector.extract_strided_slice %6 {offsets = [1, 0, 0], sizes = [1, 2, 8], strides = [1, 1, 1]} : vector<8x2x8xf32> to vector<1x2x8xf32>
    %601 = vector.shape_cast %600 : vector<1x2x8xf32> to vector<2x8xf32>
    %602 = arith.mulf %599, %601 : vector<2x8xf32>
    %603 = vector.extract_strided_slice %19 {offsets = [1, 0, 0], sizes = [1, 2, 8], strides = [1, 1, 1]} : vector<8x2x8xf32> to vector<1x2x8xf32>
    %604 = vector.shape_cast %603 : vector<1x2x8xf32> to vector<2x8xf32>
    %605 = arith.mulf %602, %604 : vector<2x8xf32>
    %606 = vector.extract_strided_slice %488 {offsets = [1, 0, 0], sizes = [1, 2, 8], strides = [1, 1, 1]} : vector<8x2x8xf32> to vector<1x2x8xf32>
    %607 = vector.shape_cast %606 : vector<1x2x8xf32> to vector<2x8xf32>
    %cst_103 = arith.constant 0.000000e+00 : f32
    %608 = vector.broadcast %cst_103 : f32 to vector<2x8xf32>
    %609 = arith.subf %608, %607 : vector<2x8xf32>
    %610 = arith.mulf %605, %609 : vector<2x8xf32>
    %611 = arith.addf %575, %610 : vector<2x8xf32>
    %612 = vector.extract_strided_slice %19 {offsets = [1, 0, 0], sizes = [1, 2, 8], strides = [1, 1, 1]} : vector<8x2x8xf32> to vector<1x2x8xf32>
    %613 = vector.shape_cast %612 : vector<1x2x8xf32> to vector<2x8xf32>
    %614 = arith.mulf %602, %613 : vector<2x8xf32>
    %615 = arith.addf %579, %614 : vector<2x8xf32>
    %616 = vector.extract_strided_slice %525 {offsets = [1, 0, 0], sizes = [1, 2, 8], strides = [1, 1, 1]} : vector<8x2x8xf32> to vector<1x2x8xf32>
    %617 = vector.shape_cast %616 : vector<1x2x8xf32> to vector<2x8xf32>
    %618 = arith.mulf %602, %617 : vector<2x8xf32>
    %619 = arith.addf %583, %618 : vector<2x8xf32>
    %620 = arith.addf %584, %602 : vector<2x8xf32>
    %cst_104 = arith.constant 0.000000e+00 : f32
    %621 = vector.broadcast %cst_104 : f32 to vector<2x8xf32>
    %622 = arith.cmpf ogt, %620, %621 : vector<2x8xf32>
    %623 = vector.extract_strided_slice %544 {offsets = [2, 0, 0], sizes = [1, 2, 8], strides = [1, 1, 1]} : vector<8x2x8xf32> to vector<1x2x8xf32>
    %624 = vector.shape_cast %623 : vector<1x2x8xf32> to vector<2x8xf32>
    %cst_105 = arith.constant 0x4B800000 : f32
    %625 = vector.broadcast %cst_105 : f32 to vector<2x8xf32>
    %626 = arith.select %622, %625, %624 : vector<2x8xi1>, vector<2x8xf32>
    %cst_106 = arith.constant dense<0x7F800000> : vector<2xf32>
    %627 = vector.multi_reduction <minimumf>, %626, %cst_106 [1] : vector<2x8xf32> to vector<2xf32>
    %628 = vector.shape_cast %627 : vector<2xf32> to vector<2x1xf32>
    %629 = vector.broadcast %628 : vector<2x1xf32> to vector<2x8xf32>
    %630 = arith.cmpf oeq, %626, %629 : vector<2x8xf32>
    %cst_107 = arith.constant 0x4B800000 : f32
    %631 = vector.broadcast %cst_107 : f32 to vector<2x8xf32>
    %632 = arith.cmpf olt, %626, %631 : vector<2x8xf32>
    %633 = arith.andi %630, %632 : vector<2x8xi1>
    %634 = arith.extui %633 : vector<2x8xi1> to vector<2x8xi32>
    %635 = arith.sitofp %634 : vector<2x8xi32> to vector<2x8xf32>
    %636 = vector.extract_strided_slice %6 {offsets = [2, 0, 0], sizes = [1, 2, 8], strides = [1, 1, 1]} : vector<8x2x8xf32> to vector<1x2x8xf32>
    %637 = vector.shape_cast %636 : vector<1x2x8xf32> to vector<2x8xf32>
    %638 = arith.mulf %635, %637 : vector<2x8xf32>
    %639 = vector.extract_strided_slice %19 {offsets = [2, 0, 0], sizes = [1, 2, 8], strides = [1, 1, 1]} : vector<8x2x8xf32> to vector<1x2x8xf32>
    %640 = vector.shape_cast %639 : vector<1x2x8xf32> to vector<2x8xf32>
    %641 = arith.mulf %638, %640 : vector<2x8xf32>
    %642 = vector.extract_strided_slice %488 {offsets = [2, 0, 0], sizes = [1, 2, 8], strides = [1, 1, 1]} : vector<8x2x8xf32> to vector<1x2x8xf32>
    %643 = vector.shape_cast %642 : vector<1x2x8xf32> to vector<2x8xf32>
    %cst_108 = arith.constant 0.000000e+00 : f32
    %644 = vector.broadcast %cst_108 : f32 to vector<2x8xf32>
    %645 = arith.subf %644, %643 : vector<2x8xf32>
    %646 = arith.mulf %641, %645 : vector<2x8xf32>
    %647 = arith.addf %611, %646 : vector<2x8xf32>
    %648 = vector.extract_strided_slice %19 {offsets = [2, 0, 0], sizes = [1, 2, 8], strides = [1, 1, 1]} : vector<8x2x8xf32> to vector<1x2x8xf32>
    %649 = vector.shape_cast %648 : vector<1x2x8xf32> to vector<2x8xf32>
    %650 = arith.mulf %638, %649 : vector<2x8xf32>
    %651 = arith.addf %615, %650 : vector<2x8xf32>
    %652 = vector.extract_strided_slice %525 {offsets = [2, 0, 0], sizes = [1, 2, 8], strides = [1, 1, 1]} : vector<8x2x8xf32> to vector<1x2x8xf32>
    %653 = vector.shape_cast %652 : vector<1x2x8xf32> to vector<2x8xf32>
    %654 = arith.mulf %638, %653 : vector<2x8xf32>
    %655 = arith.addf %619, %654 : vector<2x8xf32>
    %656 = arith.addf %620, %638 : vector<2x8xf32>
    %cst_109 = arith.constant 0.000000e+00 : f32
    %657 = vector.broadcast %cst_109 : f32 to vector<2x8xf32>
    %658 = arith.cmpf ogt, %656, %657 : vector<2x8xf32>
    %659 = vector.extract_strided_slice %544 {offsets = [3, 0, 0], sizes = [1, 2, 8], strides = [1, 1, 1]} : vector<8x2x8xf32> to vector<1x2x8xf32>
    %660 = vector.shape_cast %659 : vector<1x2x8xf32> to vector<2x8xf32>
    %cst_110 = arith.constant 0x4B800000 : f32
    %661 = vector.broadcast %cst_110 : f32 to vector<2x8xf32>
    %662 = arith.select %658, %661, %660 : vector<2x8xi1>, vector<2x8xf32>
    %cst_111 = arith.constant dense<0x7F800000> : vector<2xf32>
    %663 = vector.multi_reduction <minimumf>, %662, %cst_111 [1] : vector<2x8xf32> to vector<2xf32>
    %664 = vector.shape_cast %663 : vector<2xf32> to vector<2x1xf32>
    %665 = vector.broadcast %664 : vector<2x1xf32> to vector<2x8xf32>
    %666 = arith.cmpf oeq, %662, %665 : vector<2x8xf32>
    %cst_112 = arith.constant 0x4B800000 : f32
    %667 = vector.broadcast %cst_112 : f32 to vector<2x8xf32>
    %668 = arith.cmpf olt, %662, %667 : vector<2x8xf32>
    %669 = arith.andi %666, %668 : vector<2x8xi1>
    %670 = arith.extui %669 : vector<2x8xi1> to vector<2x8xi32>
    %671 = arith.sitofp %670 : vector<2x8xi32> to vector<2x8xf32>
    %672 = vector.extract_strided_slice %6 {offsets = [3, 0, 0], sizes = [1, 2, 8], strides = [1, 1, 1]} : vector<8x2x8xf32> to vector<1x2x8xf32>
    %673 = vector.shape_cast %672 : vector<1x2x8xf32> to vector<2x8xf32>
    %674 = arith.mulf %671, %673 : vector<2x8xf32>
    %675 = vector.extract_strided_slice %19 {offsets = [3, 0, 0], sizes = [1, 2, 8], strides = [1, 1, 1]} : vector<8x2x8xf32> to vector<1x2x8xf32>
    %676 = vector.shape_cast %675 : vector<1x2x8xf32> to vector<2x8xf32>
    %677 = arith.mulf %674, %676 : vector<2x8xf32>
    %678 = vector.extract_strided_slice %488 {offsets = [3, 0, 0], sizes = [1, 2, 8], strides = [1, 1, 1]} : vector<8x2x8xf32> to vector<1x2x8xf32>
    %679 = vector.shape_cast %678 : vector<1x2x8xf32> to vector<2x8xf32>
    %cst_113 = arith.constant 0.000000e+00 : f32
    %680 = vector.broadcast %cst_113 : f32 to vector<2x8xf32>
    %681 = arith.subf %680, %679 : vector<2x8xf32>
    %682 = arith.mulf %677, %681 : vector<2x8xf32>
    %683 = arith.addf %647, %682 : vector<2x8xf32>
    %684 = vector.extract_strided_slice %19 {offsets = [3, 0, 0], sizes = [1, 2, 8], strides = [1, 1, 1]} : vector<8x2x8xf32> to vector<1x2x8xf32>
    %685 = vector.shape_cast %684 : vector<1x2x8xf32> to vector<2x8xf32>
    %686 = arith.mulf %674, %685 : vector<2x8xf32>
    %687 = arith.addf %651, %686 : vector<2x8xf32>
    %688 = vector.extract_strided_slice %525 {offsets = [3, 0, 0], sizes = [1, 2, 8], strides = [1, 1, 1]} : vector<8x2x8xf32> to vector<1x2x8xf32>
    %689 = vector.shape_cast %688 : vector<1x2x8xf32> to vector<2x8xf32>
    %690 = arith.mulf %674, %689 : vector<2x8xf32>
    %691 = arith.addf %655, %690 : vector<2x8xf32>
    %692 = arith.addf %656, %674 : vector<2x8xf32>
    %cst_114 = arith.constant 0.000000e+00 : f32
    %693 = vector.broadcast %cst_114 : f32 to vector<2x8xf32>
    %694 = arith.cmpf ogt, %692, %693 : vector<2x8xf32>
    %695 = vector.extract_strided_slice %544 {offsets = [4, 0, 0], sizes = [1, 2, 8], strides = [1, 1, 1]} : vector<8x2x8xf32> to vector<1x2x8xf32>
    %696 = vector.shape_cast %695 : vector<1x2x8xf32> to vector<2x8xf32>
    %cst_115 = arith.constant 0x4B800000 : f32
    %697 = vector.broadcast %cst_115 : f32 to vector<2x8xf32>
    %698 = arith.select %694, %697, %696 : vector<2x8xi1>, vector<2x8xf32>
    %cst_116 = arith.constant dense<0x7F800000> : vector<2xf32>
    %699 = vector.multi_reduction <minimumf>, %698, %cst_116 [1] : vector<2x8xf32> to vector<2xf32>
    %700 = vector.shape_cast %699 : vector<2xf32> to vector<2x1xf32>
    %701 = vector.broadcast %700 : vector<2x1xf32> to vector<2x8xf32>
    %702 = arith.cmpf oeq, %698, %701 : vector<2x8xf32>
    %cst_117 = arith.constant 0x4B800000 : f32
    %703 = vector.broadcast %cst_117 : f32 to vector<2x8xf32>
    %704 = arith.cmpf olt, %698, %703 : vector<2x8xf32>
    %705 = arith.andi %702, %704 : vector<2x8xi1>
    %706 = arith.extui %705 : vector<2x8xi1> to vector<2x8xi32>
    %707 = arith.sitofp %706 : vector<2x8xi32> to vector<2x8xf32>
    %708 = vector.extract_strided_slice %6 {offsets = [4, 0, 0], sizes = [1, 2, 8], strides = [1, 1, 1]} : vector<8x2x8xf32> to vector<1x2x8xf32>
    %709 = vector.shape_cast %708 : vector<1x2x8xf32> to vector<2x8xf32>
    %710 = arith.mulf %707, %709 : vector<2x8xf32>
    %711 = vector.extract_strided_slice %19 {offsets = [4, 0, 0], sizes = [1, 2, 8], strides = [1, 1, 1]} : vector<8x2x8xf32> to vector<1x2x8xf32>
    %712 = vector.shape_cast %711 : vector<1x2x8xf32> to vector<2x8xf32>
    %713 = arith.mulf %710, %712 : vector<2x8xf32>
    %714 = vector.extract_strided_slice %488 {offsets = [4, 0, 0], sizes = [1, 2, 8], strides = [1, 1, 1]} : vector<8x2x8xf32> to vector<1x2x8xf32>
    %715 = vector.shape_cast %714 : vector<1x2x8xf32> to vector<2x8xf32>
    %cst_118 = arith.constant 0.000000e+00 : f32
    %716 = vector.broadcast %cst_118 : f32 to vector<2x8xf32>
    %717 = arith.subf %716, %715 : vector<2x8xf32>
    %718 = arith.mulf %713, %717 : vector<2x8xf32>
    %719 = arith.addf %683, %718 : vector<2x8xf32>
    %720 = vector.extract_strided_slice %19 {offsets = [4, 0, 0], sizes = [1, 2, 8], strides = [1, 1, 1]} : vector<8x2x8xf32> to vector<1x2x8xf32>
    %721 = vector.shape_cast %720 : vector<1x2x8xf32> to vector<2x8xf32>
    %722 = arith.mulf %710, %721 : vector<2x8xf32>
    %723 = arith.addf %687, %722 : vector<2x8xf32>
    %724 = vector.extract_strided_slice %525 {offsets = [4, 0, 0], sizes = [1, 2, 8], strides = [1, 1, 1]} : vector<8x2x8xf32> to vector<1x2x8xf32>
    %725 = vector.shape_cast %724 : vector<1x2x8xf32> to vector<2x8xf32>
    %726 = arith.mulf %710, %725 : vector<2x8xf32>
    %727 = arith.addf %691, %726 : vector<2x8xf32>
    %728 = arith.addf %692, %710 : vector<2x8xf32>
    %cst_119 = arith.constant 0.000000e+00 : f32
    %729 = vector.broadcast %cst_119 : f32 to vector<2x8xf32>
    %730 = arith.cmpf ogt, %728, %729 : vector<2x8xf32>
    %731 = vector.extract_strided_slice %544 {offsets = [5, 0, 0], sizes = [1, 2, 8], strides = [1, 1, 1]} : vector<8x2x8xf32> to vector<1x2x8xf32>
    %732 = vector.shape_cast %731 : vector<1x2x8xf32> to vector<2x8xf32>
    %cst_120 = arith.constant 0x4B800000 : f32
    %733 = vector.broadcast %cst_120 : f32 to vector<2x8xf32>
    %734 = arith.select %730, %733, %732 : vector<2x8xi1>, vector<2x8xf32>
    %cst_121 = arith.constant dense<0x7F800000> : vector<2xf32>
    %735 = vector.multi_reduction <minimumf>, %734, %cst_121 [1] : vector<2x8xf32> to vector<2xf32>
    %736 = vector.shape_cast %735 : vector<2xf32> to vector<2x1xf32>
    %737 = vector.broadcast %736 : vector<2x1xf32> to vector<2x8xf32>
    %738 = arith.cmpf oeq, %734, %737 : vector<2x8xf32>
    %cst_122 = arith.constant 0x4B800000 : f32
    %739 = vector.broadcast %cst_122 : f32 to vector<2x8xf32>
    %740 = arith.cmpf olt, %734, %739 : vector<2x8xf32>
    %741 = arith.andi %738, %740 : vector<2x8xi1>
    %742 = arith.extui %741 : vector<2x8xi1> to vector<2x8xi32>
    %743 = arith.sitofp %742 : vector<2x8xi32> to vector<2x8xf32>
    %744 = vector.extract_strided_slice %6 {offsets = [5, 0, 0], sizes = [1, 2, 8], strides = [1, 1, 1]} : vector<8x2x8xf32> to vector<1x2x8xf32>
    %745 = vector.shape_cast %744 : vector<1x2x8xf32> to vector<2x8xf32>
    %746 = arith.mulf %743, %745 : vector<2x8xf32>
    %747 = vector.extract_strided_slice %19 {offsets = [5, 0, 0], sizes = [1, 2, 8], strides = [1, 1, 1]} : vector<8x2x8xf32> to vector<1x2x8xf32>
    %748 = vector.shape_cast %747 : vector<1x2x8xf32> to vector<2x8xf32>
    %749 = arith.mulf %746, %748 : vector<2x8xf32>
    %750 = vector.extract_strided_slice %488 {offsets = [5, 0, 0], sizes = [1, 2, 8], strides = [1, 1, 1]} : vector<8x2x8xf32> to vector<1x2x8xf32>
    %751 = vector.shape_cast %750 : vector<1x2x8xf32> to vector<2x8xf32>
    %cst_123 = arith.constant 0.000000e+00 : f32
    %752 = vector.broadcast %cst_123 : f32 to vector<2x8xf32>
    %753 = arith.subf %752, %751 : vector<2x8xf32>
    %754 = arith.mulf %749, %753 : vector<2x8xf32>
    %755 = arith.addf %719, %754 : vector<2x8xf32>
    %756 = vector.extract_strided_slice %19 {offsets = [5, 0, 0], sizes = [1, 2, 8], strides = [1, 1, 1]} : vector<8x2x8xf32> to vector<1x2x8xf32>
    %757 = vector.shape_cast %756 : vector<1x2x8xf32> to vector<2x8xf32>
    %758 = arith.mulf %746, %757 : vector<2x8xf32>
    %759 = arith.addf %723, %758 : vector<2x8xf32>
    %760 = vector.extract_strided_slice %525 {offsets = [5, 0, 0], sizes = [1, 2, 8], strides = [1, 1, 1]} : vector<8x2x8xf32> to vector<1x2x8xf32>
    %761 = vector.shape_cast %760 : vector<1x2x8xf32> to vector<2x8xf32>
    %762 = arith.mulf %746, %761 : vector<2x8xf32>
    %763 = arith.addf %727, %762 : vector<2x8xf32>
    %764 = arith.addf %728, %746 : vector<2x8xf32>
    %cst_124 = arith.constant 0.000000e+00 : f32
    %765 = vector.broadcast %cst_124 : f32 to vector<2x8xf32>
    %766 = arith.cmpf ogt, %764, %765 : vector<2x8xf32>
    %767 = vector.extract_strided_slice %544 {offsets = [6, 0, 0], sizes = [1, 2, 8], strides = [1, 1, 1]} : vector<8x2x8xf32> to vector<1x2x8xf32>
    %768 = vector.shape_cast %767 : vector<1x2x8xf32> to vector<2x8xf32>
    %cst_125 = arith.constant 0x4B800000 : f32
    %769 = vector.broadcast %cst_125 : f32 to vector<2x8xf32>
    %770 = arith.select %766, %769, %768 : vector<2x8xi1>, vector<2x8xf32>
    %cst_126 = arith.constant dense<0x7F800000> : vector<2xf32>
    %771 = vector.multi_reduction <minimumf>, %770, %cst_126 [1] : vector<2x8xf32> to vector<2xf32>
    %772 = vector.shape_cast %771 : vector<2xf32> to vector<2x1xf32>
    %773 = vector.broadcast %772 : vector<2x1xf32> to vector<2x8xf32>
    %774 = arith.cmpf oeq, %770, %773 : vector<2x8xf32>
    %cst_127 = arith.constant 0x4B800000 : f32
    %775 = vector.broadcast %cst_127 : f32 to vector<2x8xf32>
    %776 = arith.cmpf olt, %770, %775 : vector<2x8xf32>
    %777 = arith.andi %774, %776 : vector<2x8xi1>
    %778 = arith.extui %777 : vector<2x8xi1> to vector<2x8xi32>
    %779 = arith.sitofp %778 : vector<2x8xi32> to vector<2x8xf32>
    %780 = vector.extract_strided_slice %6 {offsets = [6, 0, 0], sizes = [1, 2, 8], strides = [1, 1, 1]} : vector<8x2x8xf32> to vector<1x2x8xf32>
    %781 = vector.shape_cast %780 : vector<1x2x8xf32> to vector<2x8xf32>
    %782 = arith.mulf %779, %781 : vector<2x8xf32>
    %783 = vector.extract_strided_slice %19 {offsets = [6, 0, 0], sizes = [1, 2, 8], strides = [1, 1, 1]} : vector<8x2x8xf32> to vector<1x2x8xf32>
    %784 = vector.shape_cast %783 : vector<1x2x8xf32> to vector<2x8xf32>
    %785 = arith.mulf %782, %784 : vector<2x8xf32>
    %786 = vector.extract_strided_slice %488 {offsets = [6, 0, 0], sizes = [1, 2, 8], strides = [1, 1, 1]} : vector<8x2x8xf32> to vector<1x2x8xf32>
    %787 = vector.shape_cast %786 : vector<1x2x8xf32> to vector<2x8xf32>
    %cst_128 = arith.constant 0.000000e+00 : f32
    %788 = vector.broadcast %cst_128 : f32 to vector<2x8xf32>
    %789 = arith.subf %788, %787 : vector<2x8xf32>
    %790 = arith.mulf %785, %789 : vector<2x8xf32>
    %791 = arith.addf %755, %790 : vector<2x8xf32>
    %792 = vector.extract_strided_slice %19 {offsets = [6, 0, 0], sizes = [1, 2, 8], strides = [1, 1, 1]} : vector<8x2x8xf32> to vector<1x2x8xf32>
    %793 = vector.shape_cast %792 : vector<1x2x8xf32> to vector<2x8xf32>
    %794 = arith.mulf %782, %793 : vector<2x8xf32>
    %795 = arith.addf %759, %794 : vector<2x8xf32>
    %796 = vector.extract_strided_slice %525 {offsets = [6, 0, 0], sizes = [1, 2, 8], strides = [1, 1, 1]} : vector<8x2x8xf32> to vector<1x2x8xf32>
    %797 = vector.shape_cast %796 : vector<1x2x8xf32> to vector<2x8xf32>
    %798 = arith.mulf %782, %797 : vector<2x8xf32>
    %799 = arith.addf %763, %798 : vector<2x8xf32>
    %800 = arith.addf %764, %782 : vector<2x8xf32>
    %cst_129 = arith.constant 0.000000e+00 : f32
    %801 = vector.broadcast %cst_129 : f32 to vector<2x8xf32>
    %802 = arith.cmpf ogt, %800, %801 : vector<2x8xf32>
    %803 = vector.extract_strided_slice %544 {offsets = [7, 0, 0], sizes = [1, 2, 8], strides = [1, 1, 1]} : vector<8x2x8xf32> to vector<1x2x8xf32>
    %804 = vector.shape_cast %803 : vector<1x2x8xf32> to vector<2x8xf32>
    %cst_130 = arith.constant 0x4B800000 : f32
    %805 = vector.broadcast %cst_130 : f32 to vector<2x8xf32>
    %806 = arith.select %802, %805, %804 : vector<2x8xi1>, vector<2x8xf32>
    %cst_131 = arith.constant dense<0x7F800000> : vector<2xf32>
    %807 = vector.multi_reduction <minimumf>, %806, %cst_131 [1] : vector<2x8xf32> to vector<2xf32>
    %808 = vector.shape_cast %807 : vector<2xf32> to vector<2x1xf32>
    %809 = vector.broadcast %808 : vector<2x1xf32> to vector<2x8xf32>
    %810 = arith.cmpf oeq, %806, %809 : vector<2x8xf32>
    %cst_132 = arith.constant 0x4B800000 : f32
    %811 = vector.broadcast %cst_132 : f32 to vector<2x8xf32>
    %812 = arith.cmpf olt, %806, %811 : vector<2x8xf32>
    %813 = arith.andi %810, %812 : vector<2x8xi1>
    %814 = arith.extui %813 : vector<2x8xi1> to vector<2x8xi32>
    %815 = arith.sitofp %814 : vector<2x8xi32> to vector<2x8xf32>
    %816 = vector.extract_strided_slice %6 {offsets = [7, 0, 0], sizes = [1, 2, 8], strides = [1, 1, 1]} : vector<8x2x8xf32> to vector<1x2x8xf32>
    %817 = vector.shape_cast %816 : vector<1x2x8xf32> to vector<2x8xf32>
    %818 = arith.mulf %815, %817 : vector<2x8xf32>
    %819 = vector.extract_strided_slice %19 {offsets = [7, 0, 0], sizes = [1, 2, 8], strides = [1, 1, 1]} : vector<8x2x8xf32> to vector<1x2x8xf32>
    %820 = vector.shape_cast %819 : vector<1x2x8xf32> to vector<2x8xf32>
    %821 = arith.mulf %818, %820 : vector<2x8xf32>
    %822 = vector.extract_strided_slice %488 {offsets = [7, 0, 0], sizes = [1, 2, 8], strides = [1, 1, 1]} : vector<8x2x8xf32> to vector<1x2x8xf32>
    %823 = vector.shape_cast %822 : vector<1x2x8xf32> to vector<2x8xf32>
    %cst_133 = arith.constant 0.000000e+00 : f32
    %824 = vector.broadcast %cst_133 : f32 to vector<2x8xf32>
    %825 = arith.subf %824, %823 : vector<2x8xf32>
    %826 = arith.mulf %821, %825 : vector<2x8xf32>
    %827 = arith.addf %791, %826 : vector<2x8xf32>
    %828 = vector.extract_strided_slice %19 {offsets = [7, 0, 0], sizes = [1, 2, 8], strides = [1, 1, 1]} : vector<8x2x8xf32> to vector<1x2x8xf32>
    %829 = vector.shape_cast %828 : vector<1x2x8xf32> to vector<2x8xf32>
    %830 = arith.mulf %818, %829 : vector<2x8xf32>
    %831 = arith.addf %795, %830 : vector<2x8xf32>
    %832 = vector.extract_strided_slice %525 {offsets = [7, 0, 0], sizes = [1, 2, 8], strides = [1, 1, 1]} : vector<8x2x8xf32> to vector<1x2x8xf32>
    %833 = vector.shape_cast %832 : vector<1x2x8xf32> to vector<2x8xf32>
    %834 = arith.mulf %818, %833 : vector<2x8xf32>
    %835 = arith.addf %799, %834 : vector<2x8xf32>
    %836 = arith.addf %800, %818 : vector<2x8xf32>
    %cst_134 = arith.constant 1.000000e+00 : f32
    %837 = vector.broadcast %cst_134 : f32 to vector<2x8xf32>
    %838 = arith.subf %837, %836 : vector<2x8xf32>
    %839 = vector.shape_cast %827 : vector<2x8xf32> to vector<1x2x8xf32>
    %cst_135 = arith.constant dense<0.000000e+00> : vector<1xf32>
    %840 = vector.multi_reduction <add>, %839, %cst_135 [1, 2] : vector<1x2x8xf32> to vector<1xf32>
    %841 = vector.shape_cast %840 : vector<1xf32> to vector<1x1x1xf32>
    %842 = vector.extract %841[0, 0, 0] : f32 from vector<1x1x1xf32>
    %843 = vector.broadcast %842 : f32 to vector<1x1xf32>
    %cst_136 = arith.constant 0.000000e+00 : f32
    %844 = vector.broadcast %cst_136 : f32 to vector<2x8xf32>
    %845 = arith.subf %844, %468 : vector<2x8xf32>
    %846 = arith.mulf %838, %845 : vector<2x8xf32>
    %847 = vector.shape_cast %846 : vector<2x8xf32> to vector<1x2x8xf32>
    %cst_137 = arith.constant dense<0.000000e+00> : vector<1xf32>
    %848 = vector.multi_reduction <add>, %847, %cst_137 [1, 2] : vector<1x2x8xf32> to vector<1xf32>
    %849 = vector.shape_cast %848 : vector<1xf32> to vector<1x1x1xf32>
    %850 = vector.extract %849[0, 0, 0] : f32 from vector<1x1x1xf32>
    %851 = vector.broadcast %850 : f32 to vector<1x1xf32>
    %cst_138 = arith.constant 1.000000e-01 : f32
    %852 = vector.broadcast %cst_138 : f32 to vector<1x1xf32>
    %853 = arith.mulf %852, %851 : vector<1x1xf32>
    %854 = arith.addf %843, %853 : vector<1x1xf32>
    %855 = vector.shape_cast %831 : vector<2x8xf32> to vector<1x2x8xf32>
    %cst_139 = arith.constant dense<0.000000e+00> : vector<1xf32>
    %856 = vector.multi_reduction <add>, %855, %cst_139 [1, 2] : vector<1x2x8xf32> to vector<1xf32>
    %857 = vector.shape_cast %856 : vector<1xf32> to vector<1x1x1xf32>
    %858 = vector.extract %857[0, 0, 0] : f32 from vector<1x1x1xf32>
    %859 = vector.broadcast %858 : f32 to vector<1x1xf32>
    %860 = vector.shape_cast %838 : vector<2x8xf32> to vector<1x2x8xf32>
    %cst_140 = arith.constant dense<0.000000e+00> : vector<1xf32>
    %861 = vector.multi_reduction <add>, %860, %cst_140 [1, 2] : vector<1x2x8xf32> to vector<1xf32>
    %862 = vector.shape_cast %861 : vector<1xf32> to vector<1x1x1xf32>
    %863 = vector.extract %862[0, 0, 0] : f32 from vector<1x1x1xf32>
    %864 = vector.broadcast %863 : f32 to vector<1x1xf32>
    %cst_141 = arith.constant 1.000000e-01 : f32
    %865 = vector.broadcast %cst_141 : f32 to vector<1x1xf32>
    %866 = arith.mulf %865, %864 : vector<1x1xf32>
    %867 = arith.addf %859, %866 : vector<1x1xf32>
    %868 = vector.shape_cast %835 : vector<2x8xf32> to vector<1x2x8xf32>
    %cst_142 = arith.constant dense<0.000000e+00> : vector<1xf32>
    %869 = vector.multi_reduction <add>, %868, %cst_142 [1, 2] : vector<1x2x8xf32> to vector<1xf32>
    %870 = vector.shape_cast %869 : vector<1xf32> to vector<1x1x1xf32>
    %871 = vector.extract %870[0, 0, 0] : f32 from vector<1x1x1xf32>
    %872 = vector.broadcast %871 : f32 to vector<1x1xf32>
    %873 = vector.shape_cast %836 : vector<2x8xf32> to vector<1x2x8xf32>
    %cst_143 = arith.constant dense<0.000000e+00> : vector<1xf32>
    %874 = vector.multi_reduction <add>, %873, %cst_143 [1, 2] : vector<1x2x8xf32> to vector<1xf32>
    %875 = vector.shape_cast %874 : vector<1xf32> to vector<1x1x1xf32>
    %876 = vector.extract %875[0, 0, 0] : f32 from vector<1x1x1xf32>
    %877 = vector.broadcast %876 : f32 to vector<1x1xf32>
    %cst_144 = arith.constant 9.99999997E-7 : f32
    %878 = vector.broadcast %cst_144 : f32 to vector<1x1xf32>
    %879 = arith.maximumf %867, %878 : vector<1x1xf32>
    %880 = arith.divf %854, %879 : vector<1x1xf32>
    %cst_145 = arith.constant 1.000000e+00 : f32
    %881 = vector.broadcast %cst_145 : f32 to vector<1x1xf32>
    %882 = arith.maximumf %877, %881 : vector<1x1xf32>
    %883 = arith.divf %872, %882 : vector<1x1xf32>
    %cst_146 = arith.constant 0.000000e+00 : f32
    %884 = vector.broadcast %cst_146 : f32 to vector<1x1xf32>
    %cst_147 = arith.constant 2.000000e+00 : f32
    %885 = vector.broadcast %cst_147 : f32 to vector<1x1xf32>
    %886 = arith.mulf %885, %449 : vector<1x1xf32>
    %887 = arith.addf %884, %886 : vector<1x1xf32>
    %cst_148 = arith.constant 6.000000e+00 : f32
    %888 = vector.broadcast %cst_148 : f32 to vector<1x1xf32>
    %889 = arith.mulf %888, %452 : vector<1x1xf32>
    %890 = arith.addf %887, %889 : vector<1x1xf32>
    %cst_149 = arith.constant 2.000000e+00 : f32
    %891 = vector.broadcast %cst_149 : f32 to vector<1x1xf32>
    %892 = arith.mulf %891, %880 : vector<1x1xf32>
    %893 = arith.addf %890, %892 : vector<1x1xf32>
    %cst_150 = arith.constant 6.000000e+00 : f32
    %894 = vector.broadcast %cst_150 : f32 to vector<1x1xf32>
    %895 = arith.mulf %894, %883 : vector<1x1xf32>
    %896 = arith.addf %893, %895 : vector<1x1xf32>
    %897 = tpu.iota {dimensions = array<i32: 1>} : vector<1x128xi32>
    %c0_i32 = arith.constant 0 : i32
    %898 = vector.broadcast %c0_i32 : i32 to vector<1x128xi32>
    %899 = arith.cmpi eq, %897, %898 : vector<1x128xi32>
    %cst_151 = arith.constant 0.000000e+00 : f32
    %900 = vector.shape_cast %896 : vector<1x1xf32> to vector<1x1xf32>
    %901 = vector.broadcast %900 : vector<1x1xf32> to vector<1x128xf32>
    %902 = vector.broadcast %cst_151 : f32 to vector<1x128xf32>
    %903 = arith.select %899, %901, %902 : vector<1x128xi1>, vector<1x128xf32>
    %c1_i32 = arith.constant 1 : i32
    %904 = vector.broadcast %c1_i32 : i32 to vector<1x128xi32>
    %905 = arith.cmpi eq, %897, %904 : vector<1x128xi32>
    %cst_152 = arith.constant 0.000000e+00 : f32
    %906 = vector.shape_cast %449 : vector<1x1xf32> to vector<1x1xf32>
    %907 = vector.broadcast %906 : vector<1x1xf32> to vector<1x128xf32>
    %908 = vector.broadcast %cst_152 : f32 to vector<1x128xf32>
    %909 = arith.select %905, %907, %908 : vector<1x128xi1>, vector<1x128xf32>
    %910 = arith.addf %903, %909 : vector<1x128xf32>
    %c3_i32 = arith.constant 3 : i32
    %911 = vector.broadcast %c3_i32 : i32 to vector<1x128xi32>
    %912 = arith.cmpi eq, %897, %911 : vector<1x128xi32>
    %cst_153 = arith.constant 0.000000e+00 : f32
    %913 = vector.shape_cast %452 : vector<1x1xf32> to vector<1x1xf32>
    %914 = vector.broadcast %913 : vector<1x1xf32> to vector<1x128xf32>
    %915 = vector.broadcast %cst_153 : f32 to vector<1x128xf32>
    %916 = arith.select %912, %914, %915 : vector<1x128xi1>, vector<1x128xf32>
    %917 = arith.addf %910, %916 : vector<1x128xf32>
    %c2_i32 = arith.constant 2 : i32
    %918 = vector.broadcast %c2_i32 : i32 to vector<1x128xi32>
    %919 = arith.cmpi eq, %897, %918 : vector<1x128xi32>
    %cst_154 = arith.constant 0.000000e+00 : f32
    %920 = vector.shape_cast %880 : vector<1x1xf32> to vector<1x1xf32>
    %921 = vector.broadcast %920 : vector<1x1xf32> to vector<1x128xf32>
    %922 = vector.broadcast %cst_154 : f32 to vector<1x128xf32>
    %923 = arith.select %919, %921, %922 : vector<1x128xi1>, vector<1x128xf32>
    %924 = arith.addf %917, %923 : vector<1x128xf32>
    %c4_i32 = arith.constant 4 : i32
    %925 = vector.broadcast %c4_i32 : i32 to vector<1x128xi32>
    %926 = arith.cmpi eq, %897, %925 : vector<1x128xi32>
    %cst_155 = arith.constant 0.000000e+00 : f32
    %927 = vector.shape_cast %883 : vector<1x1xf32> to vector<1x1xf32>
    %928 = vector.broadcast %927 : vector<1x1xf32> to vector<1x128xf32>
    %929 = vector.broadcast %cst_155 : f32 to vector<1x128xf32>
    %930 = arith.select %926, %928, %929 : vector<1x128xi1>, vector<1x128xf32>
    %931 = arith.addf %924, %930 : vector<1x128xf32>
    %932 = vector.shape_cast %931 : vector<1x128xf32> to vector<1x128xf32>
    %933 = vector.broadcast %932 : vector<1x128xf32> to vector<8x128xf32>
    %c0_156 = arith.constant 0 : index
    %c0_157 = arith.constant 0 : index
    %934 = vector.load %arg4[%c0_156, %c0_157] : memref<8x128xf32, #tpu.memory_space<vmem>>, vector<8x128xf32>
    tpu.vector_store %arg4[%c0_156, %c0_157], %933 {strides = array<i32>} : memref<8x128xf32, #tpu.memory_space<vmem>>, vector<8x128xf32>,
    return
  }
  func.func @transform_0(%arg0: i32) -> (i32, i32, i32, i32) {
    %c0_i32 = arith.constant 0 : i32
    %c0_i32_0 = arith.constant 0 : i32
    %c0_i32_1 = arith.constant 0 : i32
    %c0_i32_2 = arith.constant 0 : i32
    %c0_i32_3 = arith.constant 0 : i32
    return %c0_i32, %c0_i32_0, %c0_i32_1, %c0_i32_2 : i32, i32, i32, i32
  }
  func.func @transform_1(%arg0: i32) -> (i32, i32, i32, i32) {
    %c0_i32 = arith.constant 0 : i32
    %c0_i32_0 = arith.constant 0 : i32
    %c0_i32_1 = arith.constant 0 : i32
    %c0_i32_2 = arith.constant 0 : i32
    %c0_i32_3 = arith.constant 0 : i32
    return %c0_i32, %c0_i32_0, %c0_i32_1, %c0_i32_2 : i32, i32, i32, i32
  }
  func.func @transform_2(%arg0: i32) -> (i32, i32, i32, i32) {
    %c0_i32 = arith.constant 0 : i32
    %c0_i32_0 = arith.constant 0 : i32
    %c0_i32_1 = arith.constant 0 : i32
    %c0_i32_2 = arith.constant 0 : i32
    %c0_i32_3 = arith.constant 0 : i32
    return %c0_i32, %c0_i32_0, %c0_i32_1, %c0_i32_2 : i32, i32, i32, i32
  }
  func.func @transform_3(%arg0: i32) -> (i32, i32) {
    %c0_i32 = arith.constant 0 : i32
    %c0_i32_0 = arith.constant 0 : i32
    %c0_i32_1 = arith.constant 0 : i32
    return %c0_i32, %c0_i32_0 : i32, i32
  }
}

</mosaic_0001>

<bundles_post_ra>
// kernel: ae_loss_forward.1
= control target key start
LH: loop header
LB: loop body
LE: loop exit
PB: predicated region body
PF: predicated region fallthrough
CT: control target
= control target key end

     0   :  { %v2180_v52 = vmov 0.0   ;;  %vm390_vm2 = vcmask 58368   ;;  %s2176_s0 = inlined_call_operand.vmem [shape: f32[2,2,2,8], index: 0, kind: input, shape index: {}]   ;;  %s2177_s1 = inlined_call_operand.vmem [shape: f32[2,4,2,8], index: 1, kind: input, shape index: {}]   ;;  %s2178_s2 = inlined_call_operand.vmem [shape: f32[8,6,2,8], index: 2, kind: input, shape index: {}]   ;;  %s2179_s3 = inlined_call_operand.vmem [shape: f32[8,128], index: 3, kind: output, shape index: {}]  }
   0x1   :  { %v14_v0 = vld [vmem:[%s2176_s0] sm:$0x3]  ;;  %v15_v1 = vld [vmem:[%s2176_s0 + $0x2] sm:$0x3]  ;;  %v16_v5 = vld [vmem:[%s2176_s0 + $0x4] sm:$0x3] }
   0x2   :  { %v141_v2 = vmax.f32 %v14_v0, %v15_v1  ;;  %v17_v6 = vld [vmem:[%s2176_s0 + $0x6] sm:$0x3]  ;;  %v1277_v14 = vld [vmem:[%s2177_s1] sm:$0x3]  ;;  %v1282_v15 = vld [vmem:[%s2177_s1 + $0x2] sm:$0x3] }
   0x3   :  { %v620_v9 = vmax.f32 %v16_v5, %v17_v6  ;;  %v26_v16 = vld [vmem:[%s2178_s2] sm:$0x3]  ;;  %v27_v17 = vld [vmem:[%s2178_s2 + $0x2] sm:$0x3]  ;;  %v1295_v21 = vld [vmem:[%s2177_s1 + $0x4] sm:$0x3] }
   0x4   :  { %v1256_v3 = vsub.f32 %v14_v0, %v141_v2  ;;  %v1258_v4 = vsub.f32 %v15_v1, %v141_v2  ;;  %v220_v18 = vsub.f32 %v1277_v14, %v26_v16  ;;  %v244_v19 = vsub.f32 %v1282_v15, %v27_v17  ;;  %v28_v22 = vld [vmem:[%s2178_s2 + $0x4] sm:$0x3]  ;;  %v1303_v25 = vld [vmem:[%s2177_s1 + $0x8] sm:$0x3]  ;;  %v1308_v26 = vld [vmem:[%s2177_s1 + $0xa] sm:$0x3] }
   0x5   :  { %v1268_v10 = vsub.f32 %v16_v5, %v620_v9  ;;  %v1270_v11 = vsub.f32 %v17_v6, %v620_v9  ;;  %v268_v29 = vsub.f32 %v1295_v21, %v28_v22  ;;  %v1314_v30 = vld [vmem:[%s2177_s1 + $0x6] sm:$0x3]  ;;  %v699_v32 = vsub.f32 %v1303_v25, %v26_v16  ;;  %v1324_v35 = vld [vmem:[%s2177_s1 + $0xc] sm:$0x3]  ;;  %v30_v40 = vld [vmem:[%s2178_s2 + $0x8] sm:$0x3] }
   0x6   :  { %v143_v7 = vmul.f32 1.442695, %v1256_v3  ;;  %v146_v8 = vmul.f32 1.442695, %v1258_v4  ;;  %v228_v27 = vand.u32 2147483647, %v220_v18  ;;  %v723_v33 = vsub.f32 %v1308_v26, %v27_v17 }
   0x7   :  { %v622_v12 = vmul.f32 1.442695, %v1268_v10  ;;  %v625_v13 = vmul.f32 1.442695, %v1270_v11  ;;  %v252_v28 = vand.u32 2147483647, %v244_v19  ;;  %v747_v44 = vsub.f32 %v1324_v35, %v28_v22 }
   0x8   :  { %1197 = vpow2.f32 %v143_v7  ;;  %v29_v31 = vld [vmem:[%s2178_s2 + $0x6] sm:$0x3]  ;;  %v276_v38 = vand.u32 2147483647, %v268_v29  ;;  %v707_v42 = vand.u32 2147483647, %v699_v32  ;;  %v138_v19 = vlaneseq }
   0x9   :  { %1199 = vpow2.f32 %v146_v8  ;;  %v260_v37 = vadd.f32 %v252_v28, %v228_v27  ;;  %v292_v39 = vsub.f32 %v1314_v30, %v29_v31  ;;  %v731_v43 = vand.u32 2147483647, %v723_v33  ;;  %v1336_v45 = vld [vmem:[%s2177_s1 + $0xe] sm:$0x3] }
   0xa   :  { %1201 = vpow2.f32 %v622_v12  ;;  %vm74_vm0 = vcmp.eq.f32.partialorder %v30_v40, 0.0  ;;  %vm98_vm1 = vcmp.eq.f32.partialorder %v30_v40, 1.0  ;;  %v755_v49 = vand.u32 2147483647, %v747_v44 }
   0xb   :  { %1203 = vpow2.f32 %v625_v13  ;;  %v284_v46 = vadd.f32 %v276_v38, %v260_v37  ;;  %v300_v47 = vand.u32 2147483647, %v292_v39  ;;  %v739_v48 = vadd.f32 %v731_v43, %v707_v42 }
   0xc   :  { %v771_v50 = vsub.f32 %v1336_v45, %v29_v31  ;;  %v1341_v53 = vsel %vm74_vm0, 1.0, %v2180_v52  ;;  %v1344_v54 = vsel %vm98_vm1, 1.0, %v2180_v52  ;;  %v1380_v28 = vand.u32 127, %v138_v19 }
   0xd   :  { %v1350_v58 = vadd.f32 %v300_v47, %v284_v46  ;;  %v763_v62 = vadd.f32 %v755_v49, %v739_v48  ;;  %v36_v49 = vld [vmem:[%s2178_s2 + $0x14] sm:$0x3] }
   0xe   :  { %v779_v63 = vand.u32 2147483647, %v771_v50  ;;  %2185 = vst [vmem:[#allocation2_spill] sm:$0xff] %v1380_v28  ;;  %vm75_vm3 = vcmp.eq.f32.partialorder %v36_v49, 0.0  ;;  %vm99_vm4 = vcmp.eq.f32.partialorder %v36_v49, 1.0 }
   0xf   :  { %v316_v5 = vmul.f32 3.0, %v1350_v58  ;;  %v1399_v50 = vsel %vm75_vm3, 1.0, %v2180_v52 }
  0x12   :  { %v1198_v20 = vpop.eup %1197 }
  0x13   :  { %v1200_v23 = vpop.eup %1199 }
  0x14   :  { %v148_v24 = vadd.f32 %v1200_v23, %v1198_v20  ;;  %v1202_v34 = vpop.eup %1201 }
  0x15   :  { %v1204_v36 = vpop.eup %1203 }
  0x16   :  { %1205 = vrcp.f32 %v148_v24  ;;  %v1330_v41 = vadd.f32 %v1204_v36, %v1202_v34 }
  0x17   :  { %1207 = vlog2.f32 %v148_v24 }
  0x18   :  { %1209 = vrcp.f32 %v1330_v41 }
  0x19   :  { %1211 = vlog2.f32 %v1330_v41 }
  0x20   :  { %v1206_v51 = vpop.eup %1205 }
  0x21   :  { %v1208_v55 = vpop.eup %1207  ;;  %v1346_v56 = vmul.f32 %v1206_v51, %v1198_v20  ;;  %v1348_v57 = vmul.f32 %v1206_v51, %v1200_v23  ;;  %v1402_v51 = vsel %vm99_vm4, 1.0, %v2180_v52 }
  0x22   :  { %v153_v59 = vmul.f32 0.6931472, %v1208_v55  ;;  %v1210_v6 = vpop.eup %1209 }
  0x23   :  { %v156_v60 = vmul.f32 %v1341_v53, %v1346_v56  ;;  %v188_v61 = vmul.f32 %v1344_v54, %v1348_v57  ;;  %v1367_v12 = vmul.f32 %v1210_v6, %v1202_v34  ;;  %v1369_v13 = vmul.f32 %v1210_v6, %v1204_v36 }
  0x24   :  { %v1357_v0 = vsub.f32 %v1256_v3, %v153_v59  ;;  %v1360_v1 = vsub.f32 %v1258_v4, %v153_v59  ;;  %v1371_v3 = vadd.f32 %v779_v63, %v763_v62  ;;  %v1383_v34 = vcvt.s32.f32 %v1380_v28  ;;  %v33_v62 = vld [vmem:[%s2178_s2 + $0xe] sm:$0x3] }
  0x25   :  { %v164_v2 = vsub.f32 0.0, %v156_v60  ;;  %v635_v17 = vmul.f32 %v1341_v53, %v1367_v12  ;;  %v667_v18 = vmul.f32 %v1344_v54, %v1369_v13 }
  0x26   :  { %v172_v7 = vmul.f32 %v1341_v53, %v1357_v0  ;;  %v204_v8 = vmul.f32 %v1344_v54, %v1360_v1  ;;  %v795_v23 = vmul.f32 3.0, %v1371_v3  ;;  %v173_v55 = vmul.f32 %v1399_v50, %v1357_v0 }
  0x27   :  { %v196_v9 = vsub.f32 %v164_v2, %v188_v61  ;;  %v643_v22 = vsub.f32 0.0, %v635_v17  ;;  %v205_v59 = vmul.f32 %v1402_v51, %v1360_v1  ;;  %v32_v61 = vld [vmem:[%s2178_s2 + $0xc] sm:$0x3]  ;;  %v245_v2 = vsub.f32 %v1282_v15, %v33_v62 }
  0x28   :  { %v1373_v16 = vadd.f32 %v204_v8, %v172_v7  ;;  %v221_v63 = vsub.f32 %v1277_v14, %v32_v61  ;;  %v724_v17 = vsub.f32 %v1308_v26, %v33_v62 }
  0x29   :  { %v324_v4 = vadd.f32 %v316_v5, %v196_v9  ;;  %v675_v27 = vsub.f32 %v643_v22, %v667_v18  ;;  %v1408_v60 = vadd.f32 %v205_v59, %v173_v55  ;;  %v34_v5 = vld [vmem:[%s2178_s2 + $0x10] sm:$0x3]  ;;  %v253_v7 = vand.u32 2147483647, %v245_v2  ;;  %v35_v9 = vld [vmem:[%s2178_s2 + $0x12] sm:$0x3] }
  0x2a   :  { %v229_v6 = vand.u32 2147483647, %v221_v63  ;;  %v269_v8 = vsub.f32 %v1295_v21, %v34_v5  ;;  %v668_v55 = vmul.f32 %v1402_v51, %v1369_v13 }
  0x2b   :  { %v332_v20 = vmax.f32 %v324_v4, -2.0  ;;  %v803_v31 = vadd.f32 %v795_v23, %v675_v27  ;;  %v700_v4 = vsub.f32 %v1303_v25, %v32_v61  ;;  %v732_v23 = vand.u32 2147483647, %v724_v17 }
  0x2c   :  { %v261_v18 = vadd.f32 %v253_v7, %v229_v6  ;;  %v277_v19 = vand.u32 2147483647, %v269_v8  ;;  %v157_v27 = vmul.f32 %v1399_v50, %v1346_v56 }
  0x2d   :  { %v340_v24 = vmin.f32 %v332_v20, 14.0  ;;  %v811_v33 = vmax.f32 %v803_v31, -2.0  ;;  %v293_v20 = vsub.f32 %v1314_v30, %v35_v9  ;;  %v708_v22 = vand.u32 2147483647, %v700_v4 }
  0x2f   :  { %v1140_v29 = vadd.f32 2.0, %v340_v24  ;;  %v819_v37 = vmin.f32 %v811_v33, 14.0  ;;  %v748_v24 = vsub.f32 %v1324_v35, %v34_v5  ;;  %v301_v31 = vand.u32 2147483647, %v293_v20 }
  0x31   :  { %v356_v32 = vmul.f32 65536.0, %v1140_v29  ;;  %v1156_v39 = vadd.f32 2.0, %v819_v37  ;;  %v285_v29 = vadd.f32 %v277_v19, %v261_v18  ;;  %v756_v33 = vand.u32 2147483647, %v748_v24 }
  0x32   :  { %v165_v37 = vsub.f32 0.0, %v157_v27 }
  0x33   :  { %v364_v36 = vfloor.f32 %v356_v32  ;;  %v835_v42 = vmul.f32 65536.0, %v1156_v39  ;;  %v740_v32 = vadd.f32 %v732_v23, %v708_v22  ;;  %v1434_v39 = vadd.f32 %v301_v31, %v285_v29  ;;  %v31_v23 = vld [vmem:[%s2178_s2 + $0xa] sm:$0x3] }
  0x35   :  { %v372_v38 = vmul.f32 8.0, %v364_v36  ;;  %v843_v44 = vfloor.f32 %v835_v42  ;;  %v772_v36 = vsub.f32 %v1336_v45, %v35_v9  ;;  %v636_v42 = vmul.f32 %v1399_v50, %v1367_v12 }
  0x37   :  { %v1386_v40 = vadd.f32 %v372_v38, %v1383_v34  ;;  %v851_v46 = vmul.f32 8.0, %v843_v44  ;;  %v189_v38 = vmul.f32 %v1402_v51, %v1348_v57  ;;  %v780_v44 = vand.u32 2147483647, %v772_v36 }
  0x38   :  { %v644_v49 = vsub.f32 0.0, %v636_v42 }
  0x39   :  { %v391_v43 = vsel %vm390_vm2, %v1386_v40, inf  ;;  %v1391_v47 = vadd.f32 %v851_v46, %v1383_v34  ;;  %v197_v46 = vsub.f32 %v165_v37, %v189_v38  ;;  %vm395_vm5 = vcmp.lt.f32.partialorder %v1386_v40, 16777216.0 }
  0x3a   :  { %392 = vmin.xlane.f32.xlu0 %v391_v43  ;;  %v764_v43 = vadd.f32 %v756_v33, %v740_v32  ;;  %v676_v62 = vsub.f32 %v644_v49, %v668_v55 }
  0x3b   :  { %v868_v48 = vsel %vm390_vm2, %v1391_v47, inf  ;;  %vm872_vm8 = vcmp.lt.f32.partialorder %v1391_v47, 16777216.0 }
  0x3c   :  { %v1441_v59 = vadd.f32 %v780_v44, %v764_v43  ;;  %v42_v44 = vld [vmem:[%s2178_s2 + $0x20] sm:$0x3] }
  0x3d   :  { %vm76_vm13 = vcmp.eq.f32.partialorder %v42_v44, 0.0  ;;  %vm100_vm14 = vcmp.eq.f32.partialorder %v42_v44, 1.0 }
  0x3e   :  { %869 = vmin.xlane.f32.xlu0 %v868_v48  ;;  %v317_v48 = vmul.f32 3.0, %v1434_v39  ;;  %v796_v63 = vmul.f32 3.0, %v1441_v59 }
  0x40   :  { %v325_v61 = vadd.f32 %v317_v48, %v197_v46  ;;  %v804_v5 = vadd.f32 %v796_v63, %v676_v62  ;;  %v1473_v46 = vsel %vm76_vm13, 1.0, %v2180_v52  ;;  %v1476_v48 = vsel %vm100_vm14, 1.0, %v2180_v52  ;;  %v38_v62 = vld [vmem:[%s2178_s2 + $0x18] sm:$0x3]  ;;  %v39_v63 = vld [vmem:[%s2178_s2 + $0x1a] sm:$0x3] }
  0x41   :  { %v174_v49 = vmul.f32 %v1473_v46, %v1357_v0  ;;  %v206_v55 = vmul.f32 %v1476_v48, %v1360_v1  ;;  %v190_v44 = vmul.f32 %v1476_v48, %v1348_v57 }
  0x42   :  { %v333_v2 = vmax.f32 %v325_v61, -2.0  ;;  %v812_v7 = vmax.f32 %v804_v5, -2.0  ;;  %v246_v5 = vsub.f32 %v1282_v15, %v39_v63 }
  0x43   :  { %v1482_v61 = vadd.f32 %v206_v55, %v174_v49  ;;  %v637_v55 = vmul.f32 %v1473_v46, %v1367_v12 }
  0x44   :  { %v341_v6 = vmin.f32 %v333_v2, 14.0  ;;  %v820_v9 = vmin.f32 %v812_v7, 14.0  ;;  %v222_v2 = vsub.f32 %v1277_v14, %v38_v62 }
  0x46   :  { %v1141_v8 = vadd.f32 2.0, %v341_v6  ;;  %v1157_v17 = vadd.f32 2.0, %v820_v9  ;;  %v40_v6 = vld [vmem:[%s2178_s2 + $0x1c] sm:$0x3]  ;;  %v230_v7 = vand.u32 2147483647, %v222_v2 }
  0x47   :  { %v270_v9 = vsub.f32 %v1295_v21, %v40_v6 }
  0x48   :  { %v357_v4 = vmul.f32 65536.0, %v1141_v8  ;;  %v836_v19 = vmul.f32 65536.0, %v1157_v17  ;;  %v254_v8 = vand.u32 2147483647, %v246_v5  ;;  %v701_v17 = vsub.f32 %v1303_v25, %v38_v62 }
  0x4a   :  { %v365_v18 = vfloor.f32 %v357_v4  ;;  %v844_v24 = vfloor.f32 %v836_v19  ;;  %v41_v4 = vld [vmem:[%s2178_s2 + $0x1e] sm:$0x3]  ;;  %v262_v19 = vadd.f32 %v254_v8, %v230_v7  ;;  %v669_v7 = vmul.f32 %v1476_v48, %v1369_v13 }
  0x4c   :  { %v373_v20 = vmul.f32 8.0, %v365_v18  ;;  %v852_v32 = vmul.f32 8.0, %v844_v24  ;;  %v725_v18 = vsub.f32 %v1308_v26, %v39_v63 }
  0x4e   :  { %v381_v29 = vadd.f32 %v373_v20, %v1383_v34  ;;  %v860_v38 = vadd.f32 %v852_v32, %v1383_v34  ;;  %v278_v20 = vand.u32 2147483647, %v270_v9  ;;  %v733_v24 = vand.u32 2147483647, %v725_v18 }
  0x50   :  { %v286_v32 = vadd.f32 %v278_v20, %v262_v19 }
  0xc7   :  { %v393_v22 = vpop.xlane.xlu0 %392 }
  0xc8   :  { %vm394_vm6 = vcmp.eq.f32.partialorder %v1386_v40, %v393_v22  ;;  %v294_v22 = vsub.f32 %v1314_v30, %v41_v4 }
  0xc9   :  { %vm396_vm7 = vmand %vm394_vm6, %vm395_vm5 }
  0xca   :  { %v1148_v27 = vsel %vm396_vm7, 1.0, %v2180_v52 }
  0xcb   :  { %v1451_v31 = vmul.f32 %v1148_v27, %v31_v23  ;;  %v870_v33 = vpop.xlane.xlu0 %869  ;;  %v749_v27 = vsub.f32 %v1324_v35, %v40_v6  ;;  %v645_v6 = vsub.f32 0.0, %v637_v55 }
  0xcc   :  { %vm871_vm10 = vcmp.eq.f32.partialorder %v1391_v47, %v870_v33  ;;  %v302_v33 = vand.u32 2147483647, %v294_v22 }
  0xcd   :  { %vm408_vm9 = vcmp.gt.f32.partialorder %v1451_v31, 0.0  ;;  %vm873_vm11 = vmand %vm871_vm10, %vm872_vm8 }
  0xce   :  { %v1456_v36 = vsel %vm408_vm9, 16777216.0, %v381_v29  ;;  %v1164_v37 = vsel %vm873_vm11, 1.0, %v2180_v52  ;;  %v158_v29 = vmul.f32 %v1473_v46, %v1346_v56  ;;  %v1508_v49 = vadd.f32 %v302_v33, %v286_v32 }
  0xcf   :  { %v410_v40 = vsel %vm390_vm2, %v1456_v36, inf  ;;  %v1462_v42 = vmul.f32 %v1164_v37, %v31_v23  ;;  %v709_v23 = vand.u32 2147483647, %v701_v17  ;;  %v757_v37 = vand.u32 2147483647, %v749_v27 }
  0xd0   :  { %411 = vmin.xlane.f32.xlu1 %v410_v40  ;;  %v318_v5 = vmul.f32 3.0, %v1508_v49  ;;  %vm414_vm15 = vcmp.lt.f32.partialorder %v1456_v36, 16777216.0 }
  0xd1   :  { %vm885_vm12 = vcmp.gt.f32.partialorder %v1462_v42, 0.0  ;;  %v741_v40 = vadd.f32 %v733_v24, %v709_v23  ;;  %v1212_v23 = vpop.eup %1211 }
  0xd2   :  { %v1465_v43 = vsel %vm885_vm12, 16777216.0, %v860_v38  ;;  %v773_v38 = vsub.f32 %v1336_v45, %v41_v4  ;;  %v677_v4 = vsub.f32 %v645_v6, %v669_v7 }
  0xd3   :  { %v887_v47 = vsel %vm390_vm2, %v1465_v43, inf  ;;  %v765_v62 = vadd.f32 %v757_v37, %v741_v40  ;;  %v122_v40 = vmul.f32 0.1, %v1341_v53  ;;  %vm891_vm3 = vcmp.lt.f32.partialorder %v1465_v43, 16777216.0 }
  0xd4   :  { %888 = vmin.xlane.f32.xlu1 %v887_v47  ;;  %v166_v47 = vsub.f32 0.0, %v158_v29  ;;  %v781_v63 = vand.u32 2147483647, %v773_v38  ;;  %v632_v29 = vmul.f32 0.6931472, %v1212_v23 }
  0xd5   :  { %v130_v55 = vadd.f32 %v1344_v54, %v122_v40 }
  0xd6   :  { %v198_v2 = vsub.f32 %v166_v47, %v190_v44  ;;  %v1515_v8 = vadd.f32 %v781_v63, %v765_v62  ;;  %v1521_v37 = vsub.f32 %v1268_v10, %v632_v29  ;;  %v1524_v41 = vsub.f32 %v1270_v11, %v632_v29  ;;  %v37_v10 = vld [vmem:[%s2178_s2 + $0x16] sm:$0x3] }
  0xd7   :  { %v123_v47 = vmul.f32 0.1, %v1399_v50 }
  0xd8   :  { %v326_v9 = vadd.f32 %v318_v5, %v198_v2  ;;  %v797_v17 = vmul.f32 3.0, %v1515_v8  ;;  %v651_v62 = vmul.f32 %v1341_v53, %v1521_v37  ;;  %v683_v2 = vmul.f32 %v1344_v54, %v1524_v41 }
  0xd9   :  { %v131_v5 = vadd.f32 %v1402_v51, %v123_v47  ;;  %v652_v6 = vmul.f32 %v1399_v50, %v1521_v37  ;;  %v684_v53 = vmul.f32 %v1402_v51, %v1524_v41 }
  0xda   :  { %v334_v18 = vmax.f32 %v326_v9, -2.0  ;;  %v805_v19 = vadd.f32 %v797_v17, %v677_v4  ;;  %v401_v9 = vsub.f32 0.0, %v1373_v16  ;;  %v1545_v4 = vmul.f32 %v1451_v31, %v130_v55 }
  0xdc   :  { %v342_v20 = vmin.f32 %v334_v18, 14.0  ;;  %v813_v22 = vmax.f32 %v805_v19, -2.0  ;;  %v691_v18 = vadd.f32 %v683_v2, %v651_v62 }
  0xde   :  { %v1142_v24 = vadd.f32 2.0, %v342_v20  ;;  %v821_v27 = vmin.f32 %v813_v22, 14.0  ;;  %v692_v20 = vadd.f32 %v684_v53, %v652_v6 }
  0xe0   :  { %v358_v32 = vmul.f32 65536.0, %v1142_v24  ;;  %v1158_v33 = vadd.f32 2.0, %v821_v27  ;;  %v878_v24 = vsub.f32 0.0, %v691_v18  ;;  %v1564_v27 = vmul.f32 %v1462_v42, %v130_v55  ;;  %v45_v18 = vld [vmem:[%s2178_s2 + $0x26] sm:$0x3] }
  0xe1   :  { %v897_v40 = vsub.f32 0.0, %v692_v20  ;;  %v247_v20 = vsub.f32 %v1282_v15, %v45_v18 }
  0xe2   :  { %v366_v38 = vfloor.f32 %v358_v32  ;;  %v837_v44 = vmul.f32 65536.0, %v1158_v33  ;;  %v879_v62 = vmul.f32 %v878_v24, %v1564_v27  ;;  %v47_v24 = vld [vmem:[%s2178_s2 + $0x2a] sm:$0x3] }
  0xe3   :  { %v774_v28 = vsub.f32 %v1336_v45, %v47_v24 }
  0xe4   :  { %v374_v11 = vmul.f32 8.0, %v366_v38  ;;  %v845_v7 = vfloor.f32 %v837_v44 }
  0xe6   :  { %v382_v19 = vadd.f32 %v374_v11, %v1383_v34  ;;  %v853_v16 = vmul.f32 8.0, %v845_v7 }
  0xe8   :  { %v861_v47 = vadd.f32 %v853_v16, %v1383_v34 }
 0x15d   :  { %v412_v63 = vpop.xlane.xlu1 %411 }
 0x15e   :  { %vm413_vm0 = vcmp.eq.f32.partialorder %v1456_v36, %v412_v63  ;;  %v420_v36 = vsub.f32 0.0, %v1408_v60  ;;  %v402_v60 = vmul.f32 %v401_v9, %v1545_v4 }
 0x15f   :  { %vm415_vm1 = vmand %vm413_vm0, %vm414_vm15 }
 0x160   :  { %v1149_v54 = vsel %vm415_vm1, 1.0, %v2180_v52 }
 0x161   :  { %v1548_v17 = vmul.f32 %v1149_v54, %v37_v10  ;;  %v889_v51 = vpop.xlane.xlu1 %888 }
 0x162   :  { %vm890_vm4 = vcmp.eq.f32.partialorder %v1465_v43, %v889_v51  ;;  %v46_v51 = vld [vmem:[%s2178_s2 + $0x28] sm:$0x3] }
 0x163   :  { %v1552_v50 = vmul.f32 %v1548_v17, %v131_v5  ;;  %v1556_v22 = vadd.f32 %v1548_v17, %v1451_v31  ;;  %vm892_vm5 = vmand %vm890_vm4, %vm891_vm3 }
 0x164   :  { %v1165_v29 = vsel %vm892_vm5, 1.0, %v2180_v52 }
 0x165   :  { %v421_v23 = vmul.f32 %v420_v36, %v1552_v50  ;;  %vm427_vm6 = vcmp.gt.f32.partialorder %v1556_v22, 0.0  ;;  %v1571_v43 = vmul.f32 %v1165_v29, %v37_v10  ;;  %v44_v36 = vld [vmem:[%s2178_s2 + $0x24] sm:$0x3] }
 0x166   :  { %v1567_v32 = vsel %vm427_vm6, 16777216.0, %v382_v19  ;;  %v223_v19 = vsub.f32 %v1277_v14, %v44_v36  ;;  %v702_v29 = vsub.f32 %v1303_v25, %v44_v36 }
 0x167   :  { %v1569_v33 = vadd.f32 %v421_v23, %v402_v60  ;;  %v429_v38 = vsel %vm390_vm2, %v1567_v32, inf  ;;  %v1577_v44 = vmul.f32 %v1571_v43, %v131_v5  ;;  %v1581_v55 = vadd.f32 %v1571_v43, %v1462_v42  ;;  %v48_v5 = vld [vmem:[%s2178_s2 + $0x2c] sm:$0x3] }
 0x168   :  { %430 = vmin.xlane.f32.xlu0 %v429_v38  ;;  %vm77_vm8 = vcmp.eq.f32.partialorder %v48_v5, 0.0  ;;  %vm101_vm9 = vcmp.eq.f32.partialorder %v48_v5, 1.0  ;;  %v231_v16 = vand.u32 2147483647, %v223_v19  ;;  %v255_v60 = vand.u32 2147483647, %v247_v20 }
 0x169   :  { %v898_v63 = vmul.f32 %v897_v40, %v1577_v44  ;;  %vm904_vm7 = vcmp.gt.f32.partialorder %v1581_v55, 0.0  ;;  %v1596_v6 = vsel %vm77_vm8, 1.0, %v2180_v52  ;;  %v1599_v53 = vsel %vm101_vm9, 1.0, %v2180_v52 }
 0x16a   :  { %v1586_v2 = vsel %vm904_vm7, 16777216.0, %v861_v47  ;;  %v175_v54 = vmul.f32 %v1596_v6, %v1357_v0  ;;  %v207_v7 = vmul.f32 %v1599_v53, %v1360_v1  ;;  %v271_v23 = vsub.f32 %v1295_v21, %v46_v51 }
 0x16b   :  { %v1588_v10 = vadd.f32 %v898_v63, %v879_v62  ;;  %v906_v11 = vsel %vm390_vm2, %v1586_v2, inf  ;;  %v726_v40 = vsub.f32 %v1308_v26, %v45_v18  ;;  %v263_v38 = vadd.f32 %v255_v60, %v231_v16 }
 0x16c   :  { %907 = vmin.xlane.f32.xlu1 %v906_v11  ;;  %v1605_v9 = vadd.f32 %v207_v7, %v175_v54  ;;  %v279_v47 = vand.u32 2147483647, %v271_v23  ;;  %v295_v62 = vsub.f32 %v1314_v30, %v47_v24  ;;  %v710_v63 = vand.u32 2147483647, %v702_v29 }
 0x16d   :  { %v734_v11 = vand.u32 2147483647, %v726_v40  ;;  %v750_v5 = vsub.f32 %v1324_v35, %v46_v51  ;;  %v159_v54 = vmul.f32 %v1596_v6, %v1346_v56  ;;  %v191_v18 = vmul.f32 %v1599_v53, %v1348_v57 }
 0x16e   :  { %2186 = vst [vmem:[#allocation3_spill] sm:$0xff] %v1605_v9  ;;  %v287_v7 = vadd.f32 %v279_v47, %v263_v38  ;;  %v303_v19 = vand.u32 2147483647, %v295_v62  ;;  %v638_v60 = vmul.f32 %v1596_v6, %v1367_v12  ;;  %v782_v51 = vand.u32 2147483647, %v774_v28 }
 0x16f   :  { %v742_v20 = vadd.f32 %v734_v11, %v710_v63  ;;  %v758_v52 = vand.u32 2147483647, %v750_v5  ;;  %v167_v36 = vsub.f32 0.0, %v159_v54  ;;  %v670_v47 = vmul.f32 %v1599_v53, %v1369_v13 }
 0x170   :  { %v1631_v16 = vadd.f32 %v303_v19, %v287_v7  ;;  %v646_v38 = vsub.f32 0.0, %v638_v60  ;;  %vm433_vm10 = vcmp.lt.f32.partialorder %v1567_v32, 16777216.0  ;;  %vm910_vm13 = vcmp.lt.f32.partialorder %v1586_v2, 16777216.0 }
 0x171   :  { %v766_v23 = vadd.f32 %v758_v52, %v742_v20  ;;  %v199_v29 = vsub.f32 %v167_v36, %v191_v18  ;;  %v124_v18 = vmul.f32 0.1, %v1473_v46 }
 0x172   :  { %2187 = vst [vmem:[#allocation4_spill] sm:$0xff] %v1631_v16  ;;  %v319_v40 = vmul.f32 3.0, %v1631_v16  ;;  %v678_v63 = vsub.f32 %v646_v38, %v670_v47  ;;  %v685_v38 = vmul.f32 %v1476_v48, %v1524_v41 }
 0x173   :  { %v1638_v62 = vadd.f32 %v782_v51, %v766_v23  ;;  %v424_v23 = vmul.f32 %v1548_v17, %v1434_v39  ;;  %v43_v51 = vld [vmem:[%s2178_s2 + $0x22] sm:$0x3]  ;;  %v405_v39 = vmul.f32 %v1451_v31, %v1350_v58  ;;  %v2188_v17 = vmov 0.0  }
 0x174   :  { %v327_v24 = vadd.f32 %v319_v40, %v199_v29  ;;  %v653_v40 = vmul.f32 %v1473_v46, %v1521_v37  ;;  %v901_v58 = vmul.f32 %v1571_v43, %v1441_v59 }
 0x175   :  { %v798_v11 = vmul.f32 3.0, %v1638_v62 }
 0x176   :  { %v335_v5 = vmax.f32 %v327_v24, -2.0 }
 0x177   :  { %v806_v54 = vadd.f32 %v798_v11, %v678_v63  ;;  %v439_v63 = vsub.f32 0.0, %v1482_v61 }
 0x178   :  { %v343_v7 = vmin.f32 %v335_v5, 14.0 }
 0x179   :  { %v814_v19 = vmax.f32 %v806_v54, -2.0 }
 0x17a   :  { %v1143_v9 = vadd.f32 2.0, %v343_v7  ;;  %v693_v7 = vadd.f32 %v685_v38, %v653_v40 }
 0x17b   :  { %v822_v52 = vmin.f32 %v814_v19, 14.0 }
 0x17c   :  { %v359_v28 = vmul.f32 65536.0, %v1143_v9  ;;  %v132_v9 = vadd.f32 %v1476_v48, %v124_v18  ;;  %v916_v43 = vsub.f32 0.0, %v693_v7 }
 0x17d   :  { %v1159_v20 = vadd.f32 2.0, %v822_v52 }
 0x17e   :  { %v367_v36 = vfloor.f32 %v359_v28 }
 0x17f   :  { %v838_v60 = vmul.f32 65536.0, %v1159_v20  ;;  %v900_v20 = vadd.f32 %v1577_v44, %v1564_v27 }
 0x180   :  { %v375_v29 = vmul.f32 8.0, %v367_v36 }
 0x181   :  { %v846_v24 = vfloor.f32 %v838_v60 }
 0x182   :  { %v383_v5 = vadd.f32 %v375_v29, %v1383_v34 }
 0x183   :  { %v854_v31 = vmul.f32 8.0, %v846_v24 }
 0x185   :  { %v862_v36 = vadd.f32 %v854_v31, %v1383_v34 }
 0x1f5   :  { %v431_v16 = vpop.xlane.xlu0 %430 }
 0x1f6   :  { %vm432_vm11 = vcmp.eq.f32.partialorder %v1567_v32, %v431_v16  ;;  %v423_v32 = vadd.f32 %v1552_v50, %v1545_v4  ;;  %v425_v16 = vadd.f32 %v424_v23, %v405_v39  ;;  %v50_v39 = vld [vmem:[%s2178_s2 + $0x30] sm:$0x3] }
 0x1f7   :  { %vm434_vm12 = vmand %vm432_vm11, %vm433_vm10  ;;  %v224_v24 = vsub.f32 %v1277_v14, %v50_v39 }
 0x1f8   :  { %v1150_v47 = vsel %vm434_vm12, 1.0, %v2188_v17 }
 0x1f9   :  { %v437_v11 = vmul.f32 %v1150_v47, %v43_v51  ;;  %v908_v48 = vpop.xlane.xlu1 %907  ;;  %v51_v47 = vld [vmem:[%s2178_s2 + $0x32] sm:$0x3] }
 0x1fa   :  { %vm909_vm14 = vcmp.eq.f32.partialorder %v1586_v2, %v908_v48  ;;  %v727_v7 = vsub.f32 %v1308_v26, %v51_v47 }
 0x1fb   :  { %v438_v54 = vmul.f32 %v437_v11, %v132_v9  ;;  %v443_v46 = vmul.f32 %v437_v11, %v1508_v49  ;;  %v1663_v19 = vadd.f32 %v437_v11, %v1556_v22  ;;  %vm911_vm15 = vmand %vm909_vm14, %vm910_vm13  ;;  %v882_v49 = vmul.f32 %v1462_v42, %v1371_v3  ;;  %v52_v11 = vld [vmem:[%s2178_s2 + $0x34] sm:$0x3] }
 0x1fc   :  { %v1166_v22 = vsel %vm911_vm15, 1.0, %v2188_v17 }
 0x1fd   :  { %v440_v61 = vmul.f32 %v439_v63, %v438_v54  ;;  %v1669_v4 = vadd.f32 %v438_v54, %v423_v32  ;;  %v1671_v50 = vadd.f32 %v443_v46, %v425_v16  ;;  %vm446_vm0 = vcmp.gt.f32.partialorder %v1663_v19, 0.0  ;;  %v53_v54 = vld [vmem:[%s2178_s2 + $0x36] sm:$0x3] }
 0x1fe   :  { %v1677_v52 = vsel %vm446_vm0, 16777216.0, %v383_v5  ;;  %v914_v2 = vmul.f32 %v1166_v22, %v43_v51  ;;  %v902_v18 = vadd.f32 %v901_v58, %v882_v49  ;;  %v248_v63 = vsub.f32 %v1282_v15, %v51_v47 }
 0x1ff   :  { %v1680_v59 = vadd.f32 %v440_v61, %v1569_v33  ;;  %v448_v28 = vsel %vm390_vm2, %v1677_v52, inf  ;;  %v232_v32 = vand.u32 2147483647, %v224_v24  ;;  %v272_v5 = vsub.f32 %v1295_v21, %v52_v11 }
 0x200   :  { %449 = vmin.xlane.f32.xlu0 %v448_v28  ;;  %v915_v3 = vmul.f32 %v914_v2, %v132_v9  ;;  %v920_v42 = vmul.f32 %v914_v2, %v1515_v8  ;;  %v1689_v60 = vadd.f32 %v914_v2, %v1581_v55  ;;  %v54_v8 = vld [vmem:[%s2178_s2 + $0x38] sm:$0x3]  ;;  %v256_v16 = vand.u32 2147483647, %v248_v63 }
 0x201   :  { %vm78_vm3 = vcmp.eq.f32.partialorder %v54_v8, 0.0  ;;  %vm102_vm4 = vcmp.eq.f32.partialorder %v54_v8, 1.0  ;;  %v703_v46 = vsub.f32 %v1303_v25, %v50_v39  ;;  %v280_v58 = vand.u32 2147483647, %v272_v5 }
 0x202   :  { %v917_v33 = vmul.f32 %v916_v43, %v915_v3  ;;  %v1691_v23 = vadd.f32 %v915_v3, %v900_v20  ;;  %v1693_v51 = vadd.f32 %v920_v42, %v902_v18  ;;  %vm923_vm1 = vcmp.gt.f32.partialorder %v1689_v60, 0.0 }
 0x203   :  { %v1696_v29 = vsel %vm923_vm1, 16777216.0, %v862_v36  ;;  %v1707_v55 = vsel %vm78_vm3, 1.0, %v2188_v17  ;;  %v1710_v9 = vsel %vm102_vm4, 1.0, %v2188_v17  ;;  %v264_v48 = vadd.f32 %v256_v16, %v232_v32 }
 0x204   :  { %v1699_v27 = vadd.f32 %v917_v33, %v1588_v10  ;;  %v925_v44 = vsel %vm390_vm2, %v1696_v29, inf  ;;  %v176_v10 = vmul.f32 %v1707_v55, %v1357_v0  ;;  %v208_v40 = vmul.f32 %v1710_v9, %v1360_v1 }
 0x205   :  { %926 = vmin.xlane.f32.xlu1 %v925_v44  ;;  %v296_v31 = vsub.f32 %v1314_v30, %v53_v54  ;;  %v711_v61 = vand.u32 2147483647, %v703_v46  ;;  %v735_v49 = vand.u32 2147483647, %v727_v7  ;;  %v751_v22 = vsub.f32 %v1324_v35, %v52_v11 }
 0x206   :  { %v1716_v38 = vadd.f32 %v208_v40, %v176_v10  ;;  %v160_v43 = vmul.f32 %v1707_v55, %v1346_v56  ;;  %v288_v2 = vadd.f32 %v280_v58, %v264_v48  ;;  %v775_v18 = vsub.f32 %v1336_v45, %v53_v54 }
 0x207   :  { %v304_v28 = vand.u32 2147483647, %v296_v31  ;;  %v743_v20 = vadd.f32 %v735_v49, %v711_v61  ;;  %v759_v36 = vand.u32 2147483647, %v751_v22  ;;  %v192_v42 = vmul.f32 %v1710_v9, %v1348_v57 }
 0x208   :  { %v168_v3 = vsub.f32 0.0, %v160_v43  ;;  %v639_v44 = vmul.f32 %v1707_v55, %v1367_v12  ;;  %v783_v10 = vand.u32 2147483647, %v775_v18  ;;  %v671_v24 = vmul.f32 %v1710_v9, %v1369_v13 }
 0x209   :  { %v1742_v33 = vadd.f32 %v304_v28, %v288_v2  ;;  %v767_v8 = vadd.f32 %v759_v36, %v743_v20  ;;  %v125_v22 = vmul.f32 0.1, %v1596_v6  ;;  %v49_v28 = vld [vmem:[%s2178_s2 + $0x2e] sm:$0x3]  ;;  %vm452_vm5 = vcmp.lt.f32.partialorder %v1677_v52, 16777216.0 }
 0x20a   :  { %v200_v40 = vsub.f32 %v168_v3, %v192_v42  ;;  %v647_v47 = vsub.f32 0.0, %v639_v44  ;;  %v654_v18 = vmul.f32 %v1596_v6, %v1521_v37  ;;  %v686_v3 = vmul.f32 %v1599_v53, %v1524_v41 }
 0x20b   :  { %v320_v39 = vmul.f32 3.0, %v1742_v33  ;;  %v1749_v63 = vadd.f32 %v783_v10, %v767_v8  ;;  %v133_v36 = vadd.f32 %v1599_v53, %v125_v22  ;;  %v2189_v8 = vld [vmem:[#allocation3_spill] sm:$0xff]  ;;  %vm929_vm8 = vcmp.lt.f32.partialorder %v1696_v29, 16777216.0 }
 0x20c   :  { %v679_v32 = vsub.f32 %v647_v47, %v671_v24  ;;  %v458_v10 = vsub.f32 0.0, %v2189_v8 }
 0x20d   :  { %v328_v11 = vadd.f32 %v320_v39, %v200_v40  ;;  %v799_v16 = vmul.f32 3.0, %v1749_v63 }
 0x20f   :  { %v336_v5 = vmax.f32 %v328_v11, -2.0  ;;  %v807_v54 = vadd.f32 %v799_v16, %v679_v32  ;;  %v694_v11 = vadd.f32 %v686_v3, %v654_v18 }
 0x211   :  { %v344_v46 = vmin.f32 %v336_v5, 14.0  ;;  %v815_v7 = vmax.f32 %v807_v54, -2.0 }
 0x213   :  { %v1144_v48 = vadd.f32 2.0, %v344_v46  ;;  %v823_v58 = vmin.f32 %v815_v7, 14.0 }
 0x215   :  { %v360_v31 = vmul.f32 65536.0, %v1144_v48  ;;  %v1160_v61 = vadd.f32 2.0, %v823_v58 }
 0x217   :  { %v368_v49 = vfloor.f32 %v360_v31  ;;  %v839_v43 = vmul.f32 65536.0, %v1160_v61 }
 0x219   :  { %v376_v20 = vmul.f32 8.0, %v368_v49  ;;  %v847_v44 = vfloor.f32 %v839_v43 }
 0x21b   :  { %v384_v39 = vadd.f32 %v376_v20, %v1383_v34  ;;  %v855_v6 = vmul.f32 8.0, %v847_v44 }
 0x21d   :  { %v863_v58 = vadd.f32 %v855_v6, %v1383_v34 }
 0x28d   :  { %v450_v2 = vpop.xlane.xlu0 %449 }
 0x28e   :  { %vm451_vm6 = vcmp.eq.f32.partialorder %v1677_v52, %v450_v2  ;;  %v2190_v52 = vld [vmem:[#allocation4_spill] sm:$0xff] }
 0x28f   :  { %vm453_vm7 = vmand %vm451_vm6, %vm452_vm5 }
 0x290   :  { %v1151_v42 = vsel %vm453_vm7, 1.0, %v2188_v17 }
 0x291   :  { %v456_v40 = vmul.f32 %v1151_v42, %v49_v28  ;;  %v59_v42 = vld [vmem:[%s2178_s2 + $0x42] sm:$0x3] }
 0x292   :  { %v927_v32 = vpop.xlane.xlu1 %926 }
 0x293   :  { %v457_v47 = vmul.f32 %v456_v40, %v133_v36  ;;  %v462_v24 = vmul.f32 %v456_v40, %v2190_v52  ;;  %v1768_v16 = vadd.f32 %v456_v40, %v1663_v19  ;;  %vm928_vm9 = vcmp.eq.f32.partialorder %v1696_v29, %v927_v32 }
 0x294   :  { %vm930_vm10 = vmand %vm928_vm9, %vm929_vm8  ;;  %v935_v19 = vsub.f32 0.0, %v694_v11 }
 0x295   :  { %v459_v53 = vmul.f32 %v458_v10, %v457_v47  ;;  %v1773_v5 = vadd.f32 %v457_v47, %v1669_v4  ;;  %v1776_v54 = vadd.f32 %v462_v24, %v1671_v50  ;;  %vm465_vm11 = vcmp.gt.f32.partialorder %v1768_v16, 0.0 }
 0x296   :  { %v1167_v46 = vsel %vm930_vm10, 1.0, %v2188_v17  ;;  %v1780_v7 = vsel %vm465_vm11, 16777216.0, %v384_v39  ;;  %v297_v10 = vsub.f32 %v1314_v30, %v59_v42  ;;  %v776_v30 = vsub.f32 %v1336_v45, %v59_v42 }
 0x297   :  { %v933_v48 = vmul.f32 %v1167_v46, %v49_v28  ;;  %v467_v29 = vsel %vm390_vm2, %v1780_v7, inf  ;;  %vm471_vm15 = vcmp.lt.f32.partialorder %v1780_v7, 16777216.0 }
 0x298   :  { %468 = vmin.xlane.f32.xlu0 %v467_v29  ;;  %v305_v11 = vand.u32 2147483647, %v297_v10 }
 0x299   :  { %v934_v4 = vmul.f32 %v933_v48, %v133_v36  ;;  %v939_v31 = vmul.f32 %v933_v48, %v1638_v62  ;;  %v1787_v50 = vadd.f32 %v933_v48, %v1689_v60  ;;  %v1801_v62 = vadd.f32 %v459_v53, %v1680_v59  ;;  %v58_v59 = vld [vmem:[%s2178_s2 + $0x40] sm:$0x3] }
 0x29a   :  { %v273_v3 = vsub.f32 %v1295_v21, %v58_v59  ;;  %v752_v21 = vsub.f32 %v1324_v35, %v58_v59  ;;  %v784_v48 = vand.u32 2147483647, %v776_v30 }
 0x29b   :  { %v936_v61 = vmul.f32 %v935_v19, %v934_v4  ;;  %v1790_v49 = vadd.f32 %v934_v4, %v1691_v23  ;;  %v1793_v22 = vadd.f32 %v939_v31, %v1693_v51  ;;  %vm942_vm12 = vcmp.gt.f32.partialorder %v1787_v50, 0.0  ;;  %v56_v23 = vld [vmem:[%s2178_s2 + $0x3c] sm:$0x3]  ;;  %v57_v51 = vld [vmem:[%s2178_s2 + $0x3e] sm:$0x3] }
 0x29c   :  { %v1796_v43 = vsel %vm942_vm12, 16777216.0, %v863_v58  ;;  %v225_v28 = vsub.f32 %v1277_v14, %v56_v23  ;;  %v249_v20 = vsub.f32 %v1282_v15, %v57_v51  ;;  %v704_v14 = vsub.f32 %v1303_v25, %v56_v23 }
 0x29d   :  { %v944_v2 = vsel %vm390_vm2, %v1796_v43, inf  ;;  %v1804_v60 = vadd.f32 %v936_v61, %v1699_v27  ;;  %v60_v27 = vld [vmem:[%s2178_s2 + $0x44] sm:$0x3]  ;;  %v728_v15 = vsub.f32 %v1308_v26, %v57_v51  ;;  %v281_v8 = vand.u32 2147483647, %v273_v3 }
 0x29e   :  { %945 = vmin.xlane.f32.xlu1 %v944_v2  ;;  %v233_v36 = vand.u32 2147483647, %v225_v28  ;;  %v257_v18 = vand.u32 2147483647, %v249_v20  ;;  %vm79_vm13 = vcmp.eq.f32.partialorder %v60_v27, 0.0  ;;  %vm103_vm14 = vcmp.eq.f32.partialorder %v60_v27, 1.0 }
 0x29f   :  { %v1828_v40 = vsel %vm79_vm13, 1.0, %v2188_v17  ;;  %v712_v39 = vand.u32 2147483647, %v704_v14  ;;  %v736_v47 = vand.u32 2147483647, %v728_v15  ;;  %v1834_v25 = vsel %vm103_vm14, 1.0, %v2188_v17 }
 0x2a0   :  { %v265_v44 = vadd.f32 %v257_v18, %v233_v36  ;;  %v161_v52 = vmul.f32 %v1828_v40, %v1346_v56  ;;  %v760_v32 = vand.u32 2147483647, %v752_v21  ;;  %v193_v53 = vmul.f32 %v1834_v25, %v1348_v57 }
 0x2a1   :  { %v744_v26 = vadd.f32 %v736_v47, %v712_v39  ;;  %v640_v35 = vmul.f32 %v1828_v40, %v1367_v12  ;;  %v672_v31 = vmul.f32 %v1834_v25, %v1369_v13  ;;  %v126_v14 = vmul.f32 0.1, %v1707_v55 }
 0x2a2   :  { %v289_v24 = vadd.f32 %v281_v8, %v265_v44  ;;  %v169_v6 = vsub.f32 0.0, %v161_v52  ;;  %v55_v8 = vld [vmem:[%s2178_s2 + $0x3a] sm:$0x3]  ;;  %v655_v47 = vmul.f32 %v1707_v55, %v1521_v37  ;;  %v687_v21 = vmul.f32 %v1710_v9, %v1524_v41 }
 0x2a3   :  { %v768_v19 = vadd.f32 %v760_v32, %v744_v26  ;;  %v648_v4 = vsub.f32 0.0, %v640_v35  ;;  %v134_v39 = vadd.f32 %v1710_v9, %v126_v14  ;;  %vm948_vm3 = vcmp.lt.f32.partialorder %v1796_v43, 16777216.0 }
 0x2a4   :  { %v1839_v46 = vadd.f32 %v305_v11, %v289_v24  ;;  %v201_v29 = vsub.f32 %v169_v6, %v193_v53  ;;  %v477_v11 = vsub.f32 0.0, %v1716_v38  ;;  %v695_v6 = vadd.f32 %v687_v21, %v655_v47  ;;  %v1951_v47 = vld [vmem:[%s2177_s1 + $0xa] sm:$0x3] }
 0x2a5   :  { %v1846_v61 = vadd.f32 %v784_v48, %v768_v19  ;;  %v680_v2 = vsub.f32 %v648_v4, %v672_v31 }
 0x2a6   :  { %v321_v58 = vmul.f32 3.0, %v1839_v46 }
 0x2a7   :  { %v800_v23 = vmul.f32 3.0, %v1846_v61 }
 0x2a8   :  { %v329_v45 = vadd.f32 %v321_v58, %v201_v29 }
 0x2a9   :  { %v808_v28 = vadd.f32 %v800_v23, %v680_v2 }
 0x2aa   :  { %v337_v51 = vmax.f32 %v329_v45, -2.0 }
 0x2ab   :  { %v816_v59 = vmax.f32 %v808_v28, -2.0 }
 0x2ac   :  { %v345_v20 = vmin.f32 %v337_v51, 14.0 }
 0x2ad   :  { %v824_v36 = vmin.f32 %v816_v59, 14.0 }
 0x2ae   :  { %v1145_v27 = vadd.f32 2.0, %v345_v20  ;;  %v177_v20 = vmul.f32 %v1828_v40, %v1357_v0 }
 0x2af   :  { %v1161_v3 = vadd.f32 2.0, %v824_v36 }
 0x2b0   :  { %v361_v18 = vmul.f32 65536.0, %v1145_v27  ;;  %v1924_v27 = vld [vmem:[%s2177_s1 + $0x2] sm:$0x3] }
 0x2b1   :  { %v840_v15 = vmul.f32 65536.0, %v1161_v3  ;;  %v66_v3 = vld [vmem:[%s2178_s2 + $0x50] sm:$0x3] }
 0x2b2   :  { %v369_v42 = vfloor.f32 %v361_v18  ;;  %v64_v18 = vld [vmem:[%s2178_s2 + $0x4c] sm:$0x3]  ;;  %vm80_vm8 = vcmp.eq.f32.partialorder %v66_v3, 0.0  ;;  %vm104_vm9 = vcmp.eq.f32.partialorder %v66_v3, 1.0 }
 0x2b3   :  { %v848_v24 = vfloor.f32 %v840_v15  ;;  %v1936_v15 = vld [vmem:[%s2177_s1 + $0x4] sm:$0x3] }
 0x2b4   :  { %v377_v10 = vmul.f32 8.0, %v369_v42 }
 0x2b5   :  { %v856_v55 = vmul.f32 8.0, %v848_v24 }
 0x2b6   :  { %v385_v32 = vadd.f32 %v377_v10, %v1383_v34  ;;  %v1945_v10 = vld [vmem:[%s2177_s1 + $0x8] sm:$0x3] }
 0x2b7   :  { %v864_v58 = vadd.f32 %v856_v55, %v1383_v34 }
 0x325   :  { %v469_v44 = vpop.xlane.xlu0 %468 }
 0x326   :  { %vm470_vm0 = vcmp.eq.f32.partialorder %v1780_v7, %v469_v44  ;;  %v274_v44 = vsub.f32 %v1936_v15, %v64_v18 }
 0x327   :  { %vm472_vm1 = vmand %vm470_vm0, %vm471_vm15 }
 0x328   :  { %v1152_v52 = vsel %vm472_vm1, 1.0, %v2188_v17  ;;  %v282_v24 = vand.u32 2147483647, %v274_v44 }
 0x329   :  { %v475_v26 = vmul.f32 %v1152_v52, %v55_v8 }
 0x32b   :  { %v476_v30 = vmul.f32 %v475_v26, %v134_v39  ;;  %v481_v7 = vmul.f32 %v475_v26, %v1742_v33  ;;  %v946_v53 = vpop.xlane.xlu1 %945  ;;  %v1865_v35 = vadd.f32 %v475_v26, %v1768_v16  ;;  %v954_v16 = vsub.f32 0.0, %v695_v6  ;;  %v1966_v6 = vld [vmem:[%s2177_s1 + $0xc] sm:$0x3] }
 0x32c   :  { %vm947_vm4 = vcmp.eq.f32.partialorder %v1796_v43, %v946_v53  ;;  %v753_v53 = vsub.f32 %v1966_v6, %v64_v18 }
 0x32d   :  { %v478_v9 = vmul.f32 %v477_v11, %v476_v30  ;;  %vm949_vm5 = vmand %vm947_vm4, %vm948_vm3  ;;  %vm484_vm6 = vcmp.gt.f32.partialorder %v1865_v35, 0.0  ;;  %v1871_v38 = vadd.f32 %v476_v30, %v1773_v5  ;;  %v1874_v19 = vadd.f32 %v481_v7, %v1776_v54  ;;  %v1957_v11 = vld [vmem:[%s2177_s1 + $0x6] sm:$0x3] }
 0x32e   :  { %v1168_v33 = vsel %vm949_vm5, 1.0, %v2188_v17  ;;  %v1877_v48 = vsel %vm484_vm6, 16777216.0, %v385_v32  ;;  %v1961_v32 = vsel %vm80_vm8, 1.0, %v2188_v17 }
 0x32f   :  { %v952_v29 = vmul.f32 %v1168_v33, %v55_v8  ;;  %v486_v43 = vsel %vm390_vm2, %v1877_v48, inf  ;;  %v1892_v23 = vadd.f32 %v478_v9, %v1801_v62  ;;  %v62_v62 = vld [vmem:[%s2178_s2 + $0x48] sm:$0x3]  ;;  %v65_v8 = vld [vmem:[%s2178_s2 + $0x4e] sm:$0x3]  ;;  %v162_v55 = vmul.f32 %v1961_v32, %v1346_v56 }
 0x330   :  { %487 = vmin.xlane.f32.xlu0 %v486_v43  ;;  %v298_v26 = vsub.f32 %v1957_v11, %v65_v8  ;;  %v761_v43 = vand.u32 2147483647, %v753_v53  ;;  %vm490_vm10 = vcmp.lt.f32.partialorder %v1877_v48, 16777216.0 }
 0x331   :  { %v953_v4 = vmul.f32 %v952_v29, %v134_v39  ;;  %v1883_v31 = vadd.f32 %v952_v29, %v1787_v50  ;;  %v958_v45 = vmul.f32 %v952_v29, %v1749_v63  ;;  %v209_v63 = vmul.f32 %v1834_v25, %v1360_v1 }
 0x332   :  { %v705_v39 = vsub.f32 %v1945_v10, %v62_v62  ;;  %v306_v33 = vand.u32 2147483647, %v298_v26 }
 0x333   :  { %v955_v5 = vmul.f32 %v954_v16, %v953_v4  ;;  %vm961_vm7 = vcmp.gt.f32.partialorder %v1883_v31, 0.0  ;;  %v1898_v50 = vadd.f32 %v953_v4, %v1790_v49  ;;  %v1901_v28 = vadd.f32 %v958_v45, %v1793_v22  ;;  %v63_v49 = vld [vmem:[%s2178_s2 + $0x4a] sm:$0x3]  ;;  %v1918_v22 = vld [vmem:[%s2177_s1] sm:$0x3] }
 0x334   :  { %v1886_v54 = vsel %vm961_vm7, 16777216.0, %v864_v58  ;;  %v1907_v59 = vadd.f32 %v209_v63, %v177_v20  ;;  %v250_v36 = vsub.f32 %v1924_v27, %v63_v49  ;;  %v729_v21 = vsub.f32 %v1951_v47, %v63_v49  ;;  %v1977_v58 = vld [vmem:[%s2177_s1 + $0xe] sm:$0x3] }
 0x335   :  { %v963_v2 = vsel %vm390_vm2, %v1886_v54, inf  ;;  %v1895_v51 = vadd.f32 %v955_v5, %v1804_v60  ;;  %v226_v60 = vsub.f32 %v1918_v22, %v62_v62  ;;  %v713_v30 = vand.u32 2147483647, %v705_v39 }
 0x336   :  { %964 = vmin.xlane.f32.xlu1 %v963_v2  ;;  %v258_v14 = vand.u32 2147483647, %v250_v36  ;;  %v737_v7 = vand.u32 2147483647, %v729_v21  ;;  %v1972_v16 = vsel %vm104_vm9, 1.0, %v2188_v17  ;;  %v777_v4 = vsub.f32 %v1977_v58, %v65_v8 }
 0x337   :  { %v234_v42 = vand.u32 2147483647, %v226_v60  ;;  %v170_v5 = vsub.f32 0.0, %v162_v55  ;;  %v194_v45 = vmul.f32 %v1972_v16, %v1348_v57  ;;  %v641_v20 = vmul.f32 %v1961_v32, %v1367_v12 }
 0x338   :  { %v745_v29 = vadd.f32 %v737_v7, %v713_v30  ;;  %v785_v62 = vand.u32 2147483647, %v777_v4  ;;  %v673_v18 = vmul.f32 %v1972_v16, %v1369_v13  ;;  %v127_v55 = vmul.f32 0.1, %v1828_v40 }
 0x339   :  { %v266_v52 = vadd.f32 %v258_v14, %v234_v42  ;;  %v202_v49 = vsub.f32 %v170_v5, %v194_v45  ;;  %v649_v36 = vsub.f32 0.0, %v641_v20  ;;  %vm967_vm13 = vcmp.lt.f32.partialorder %v1886_v54, 16777216.0 }
 0x33a   :  { %v769_v63 = vadd.f32 %v761_v43, %v745_v29  ;;  %v61_v29 = vld [vmem:[%s2178_s2 + $0x46] sm:$0x3]  ;;  %v135_v4 = vadd.f32 %v1834_v25, %v127_v55 }
 0x33b   :  { %v290_v9 = vadd.f32 %v282_v24, %v266_v52  ;;  %v681_v14 = vsub.f32 %v649_v36, %v673_v18 }
 0x33c   :  { %v1989_v3 = vadd.f32 %v785_v62, %v769_v63  ;;  %v496_v63 = vsub.f32 0.0, %v1907_v59 }
 0x33d   :  { %v1982_v2 = vadd.f32 %v306_v33, %v290_v9 }
 0x33e   :  { %v801_v44 = vmul.f32 3.0, %v1989_v3 }
 0x33f   :  { %v322_v60 = vmul.f32 3.0, %v1982_v2 }
 0x340   :  { %v809_v39 = vadd.f32 %v801_v44, %v681_v14 }
 0x341   :  { %v330_v42 = vadd.f32 %v322_v60, %v202_v49  ;;  %v656_v49 = vmul.f32 %v1828_v40, %v1521_v37 }
 0x342   :  { %v817_v52 = vmax.f32 %v809_v39, -2.0 }
 0x343   :  { %v338_v8 = vmax.f32 %v330_v42, -2.0  ;;  %v688_v42 = vmul.f32 %v1834_v25, %v1524_v41 }
 0x344   :  { %v825_v26 = vmin.f32 %v817_v52, 14.0 }
 0x345   :  { %v346_v21 = vmin.f32 %v338_v8, 14.0 }
 0x346   :  { %v1162_v7 = vadd.f32 2.0, %v825_v26 }
 0x347   :  { %v1146_v24 = vadd.f32 2.0, %v346_v21 }
 0x348   :  { %v841_v9 = vmul.f32 65536.0, %v1162_v7 }
 0x349   :  { %v362_v30 = vmul.f32 65536.0, %v1146_v24 }
 0x34a   :  { %v849_v45 = vfloor.f32 %v841_v9  ;;  %v210_v9 = vmul.f32 %v1972_v16, %v1360_v1 }
 0x34b   :  { %v370_v53 = vfloor.f32 %v362_v30 }
 0x34c   :  { %v857_v59 = vmul.f32 8.0, %v849_v45 }
 0x34d   :  { %v378_v43 = vmul.f32 8.0, %v370_v53 }
 0x34e   :  { %v865_v39 = vadd.f32 %v857_v59, %v1383_v34 }
 0x34f   :  { %v386_v62 = vadd.f32 %v378_v43, %v1383_v34  ;;  %v72_v43 = vld [vmem:[%s2178_s2 + $0x5c] sm:$0x3] }
 0x350   :  { %vm81_vm3 = vcmp.eq.f32.partialorder %v72_v43, 0.0  ;;  %vm105_vm4 = vcmp.eq.f32.partialorder %v72_v43, 1.0 }
 0x3bd   :  { %v488_v33 = vpop.xlane.xlu0 %487 }
 0x3be   :  { %vm489_vm11 = vcmp.eq.f32.partialorder %v1877_v48, %v488_v33 }
 0x3bf   :  { %vm491_vm12 = vmand %vm489_vm11, %vm490_vm10 }
 0x3c0   :  { %v1153_v5 = vsel %vm491_vm12, 1.0, %v2188_v17 }
 0x3c1   :  { %v494_v20 = vmul.f32 %v1153_v5, %v61_v29 }
 0x3c3   :  { %v495_v60 = vmul.f32 %v494_v20, %v135_v4  ;;  %v500_v36 = vmul.f32 %v494_v20, %v1839_v46  ;;  %v965_v18 = vpop.xlane.xlu1 %964  ;;  %v2006_v48 = vadd.f32 %v494_v20, %v1865_v35  ;;  %v71_v20 = vld [vmem:[%s2178_s2 + $0x5a] sm:$0x3] }
 0x3c4   :  { %vm966_vm14 = vcmp.eq.f32.partialorder %v1886_v54, %v965_v18  ;;  %v696_v54 = vadd.f32 %v688_v42, %v656_v49  ;;  %v299_v49 = vsub.f32 %v1957_v11, %v71_v20  ;;  %v778_v11 = vsub.f32 %v1977_v58, %v71_v20 }
 0x3c5   :  { %vm968_vm15 = vmand %vm966_vm14, %vm967_vm13  ;;  %vm503_vm0 = vcmp.gt.f32.partialorder %v2006_v48, 0.0  ;;  %v2014_v40 = vadd.f32 %v495_v60, %v1871_v38  ;;  %v2017_v46 = vadd.f32 %v500_v36, %v1874_v19  ;;  %v497_v14 = vmul.f32 %v496_v63, %v495_v60 }
 0x3c6   :  { %v1169_v35 = vsel %vm968_vm15, 1.0, %v2188_v17  ;;  %v2020_v44 = vsel %vm503_vm0, 16777216.0, %v386_v62  ;;  %v973_v19 = vsub.f32 0.0, %v696_v54  ;;  %v2074_v60 = vsel %vm81_vm3, 1.0, %v2188_v17 }
 0x3c7   :  { %v971_v25 = vmul.f32 %v1169_v35, %v61_v29  ;;  %v505_v8 = vsel %vm390_vm2, %v2020_v44, inf  ;;  %v2035_v30 = vadd.f32 %v497_v14, %v1892_v23  ;;  %v68_v23 = vld [vmem:[%s2178_s2 + $0x54] sm:$0x3]  ;;  %v70_v29 = vld [vmem:[%s2178_s2 + $0x58] sm:$0x3]  ;;  %v163_v42 = vmul.f32 %v2074_v60, %v1346_v56 }
 0x3c8   :  { %506 = vmin.xlane.f32.xlu0 %v505_v8  ;;  %v275_v45 = vsub.f32 %v1936_v15, %v70_v29  ;;  %v754_v15 = vsub.f32 %v1966_v6, %v70_v29  ;;  %v307_v14 = vand.u32 2147483647, %v299_v49  ;;  %v642_v6 = vmul.f32 %v2074_v60, %v1367_v12 }
 0x3c9   :  { %v2026_v21 = vadd.f32 %v971_v25, %v1883_v31  ;;  %v972_v38 = vmul.f32 %v971_v25, %v135_v4  ;;  %v977_v24 = vmul.f32 %v971_v25, %v1846_v61  ;;  %v178_v61 = vmul.f32 %v1961_v32, %v1357_v0 }
 0x3ca   :  { %v283_v62 = vand.u32 2147483647, %v275_v45  ;;  %v762_v35 = vand.u32 2147483647, %v754_v15  ;;  %v171_v25 = vsub.f32 0.0, %v163_v42  ;;  %vm509_vm5 = vcmp.lt.f32.partialorder %v2020_v44, 16777216.0 }
 0x3cb   :  { %vm980_vm1 = vcmp.gt.f32.partialorder %v2026_v21, 0.0  ;;  %v974_v7 = vmul.f32 %v973_v19, %v972_v38  ;;  %v2041_v31 = vadd.f32 %v972_v38, %v1898_v50  ;;  %v2044_v55 = vadd.f32 %v977_v24, %v1901_v28 }
 0x3cc   :  { %v2029_v52 = vsel %vm980_vm1, 16777216.0, %v865_v39  ;;  %v2050_v33 = vadd.f32 %v210_v9, %v178_v61  ;;  %v227_v50 = vsub.f32 %v1918_v22, %v68_v23  ;;  %v706_v22 = vsub.f32 %v1945_v10, %v68_v23 }
 0x3cd   :  { %v982_v26 = vsel %vm390_vm2, %v2029_v52, inf  ;;  %v2038_v53 = vadd.f32 %v974_v7, %v1895_v51  ;;  %v69_v51 = vld [vmem:[%s2178_s2 + $0x56] sm:$0x3]  ;;  %v2080_v10 = vsel %vm105_vm4, 1.0, %v2188_v17  ;;  %v786_v56 = vand.u32 2147483647, %v778_v11 }
 0x3ce   :  { %983 = vmin.xlane.f32.xlu1 %v982_v26  ;;  %v251_v28 = vsub.f32 %v1924_v27, %v69_v51  ;;  %v235_v4 = vand.u32 2147483647, %v227_v50  ;;  %v730_v27 = vsub.f32 %v1951_v47, %v69_v51  ;;  %v714_v36 = vand.u32 2147483647, %v706_v22 }
 0x3cf   :  { %v195_v8 = vmul.f32 %v2080_v10, %v1348_v57  ;;  %v650_v24 = vsub.f32 0.0, %v642_v6  ;;  %v674_v26 = vmul.f32 %v2080_v10, %v1369_v13  ;;  %v67_v13 = vld [vmem:[%s2178_s2 + $0x52] sm:$0x3]  ;;  %v515_v15 = vsub.f32 0.0, %v2050_v33 }
 0x3d0   :  { %v259_v5 = vand.u32 2147483647, %v251_v28  ;;  %v738_v18 = vand.u32 2147483647, %v730_v27  ;;  %vm986_vm8 = vcmp.lt.f32.partialorder %v2029_v52, 16777216.0 }
 0x3d1   :  { %v203_v38 = vsub.f32 %v171_v25, %v195_v8  ;;  %v682_v61 = vsub.f32 %v650_v24, %v674_v26 }
 0x3d2   :  { %v267_v63 = vadd.f32 %v259_v5, %v235_v4  ;;  %v746_v47 = vadd.f32 %v738_v18, %v714_v36  ;;  %v128_v5 = vmul.f32 0.1, %v1961_v32 }
 0x3d4   :  { %v291_v59 = vadd.f32 %v283_v62, %v267_v63  ;;  %v770_v39 = vadd.f32 %v762_v35, %v746_v47  ;;  %v136_v27 = vadd.f32 %v1972_v16, %v128_v5  ;;  %v657_v63 = vmul.f32 %v1961_v32, %v1521_v37 }
 0x3d5   :  { %v689_v62 = vmul.f32 %v1972_v16, %v1524_v41 }
 0x3d6   :  { %v2085_v54 = vadd.f32 %v307_v14, %v291_v59  ;;  %v2092_v7 = vadd.f32 %v786_v56, %v770_v39 }
 0x3d7   :  { %v697_v35 = vadd.f32 %v689_v62, %v657_v63  ;;  %v1030_v63 = vsub.f32 0.0, %v1521_v37 }
 0x3d8   :  { %v323_v19 = vmul.f32 3.0, %v2085_v54  ;;  %v802_v57 = vmul.f32 3.0, %v2092_v7 }
 0x3d9   :  { %v992_v39 = vsub.f32 0.0, %v697_v35 }
 0x3da   :  { %v331_v58 = vadd.f32 %v323_v19, %v203_v38  ;;  %v810_v23 = vadd.f32 %v802_v57, %v682_v61  ;;  %v129_v61 = vmul.f32 0.1, %v2074_v60 }
 0x3dc   :  { %v339_v9 = vmax.f32 %v331_v58, -2.0  ;;  %v818_v50 = vmax.f32 %v810_v23, -2.0 }
 0x3de   :  { %v347_v51 = vmin.f32 %v339_v9, 14.0  ;;  %v826_v28 = vmin.f32 %v818_v50, 14.0  ;;  %v690_v9 = vmul.f32 %v2080_v10, %v1524_v41 }
 0x3e0   :  { %v1147_v12 = vadd.f32 2.0, %v347_v51  ;;  %v1163_v43 = vadd.f32 2.0, %v826_v28 }
 0x3e2   :  { %v363_v29 = vmul.f32 65536.0, %v1147_v12  ;;  %v842_v45 = vmul.f32 65536.0, %v1163_v43 }
 0x3e4   :  { %v371_v4 = vfloor.f32 %v363_v29  ;;  %v850_v36 = vfloor.f32 %v842_v45  ;;  %v553_v45 = vsub.f32 0.0, %v1357_v0 }
 0x3e6   :  { %v379_v22 = vmul.f32 8.0, %v371_v4  ;;  %v858_v32 = vmul.f32 8.0, %v850_v36 }
 0x3e8   :  { %v387_v42 = vadd.f32 %v379_v22, %v1383_v34 }
 0x455   :  { %v507_v20 = vpop.xlane.xlu0 %506 }
 0x456   :  { %vm508_vm6 = vcmp.eq.f32.partialorder %v2020_v44, %v507_v20 }
 0x457   :  { %vm510_vm7 = vmand %vm508_vm6, %vm509_vm5 }
 0x458   :  { %v1154_v49 = vsel %vm510_vm7, 1.0, %v2188_v17 }
 0x459   :  { %v513_v18 = vmul.f32 %v1154_v49, %v67_v13 }
 0x45b   :  { %v984_v59 = vpop.xlane.xlu1 %983  ;;  %v521_v44 = vadd.f32 %v513_v18, %v2006_v48  ;;  %v514_v14 = vmul.f32 %v513_v18, %v136_v27  ;;  %v519_v47 = vmul.f32 %v513_v18, %v1982_v2 }
 0x45c   :  { %vm985_vm9 = vcmp.eq.f32.partialorder %v2029_v52, %v984_v59  ;;  %v866_v52 = vadd.f32 %v858_v32, %v1383_v34  ;;  %v179_v34 = vmul.f32 %v2074_v60, %v1357_v0 }
 0x45d   :  { %vm987_vm10 = vmand %vm985_vm9, %vm986_vm8  ;;  %vm522_vm11 = vcmp.gt.f32.partialorder %v521_v44, 0.0  ;;  %v518_v16 = vadd.f32 %v514_v14, %v2014_v40  ;;  %v520_v33 = vadd.f32 %v519_v47, %v2017_v46  ;;  %v516_v11 = vmul.f32 %v515_v15, %v514_v14 }
 0x45e   :  { %v1170_v25 = vsel %vm987_vm10, 1.0, %v2188_v17  ;;  %v523_v8 = vsel %vm522_vm11, 16777216.0, %v387_v42 }
 0x45f   :  { %v990_v48 = vmul.f32 %v1170_v25, %v67_v13  ;;  %v524_v6 = vsel %vm390_vm2, %v523_v8, inf  ;;  %v517_v2 = vadd.f32 %v516_v11, %v2035_v30  ;;  %vm528_vm13 = vcmp.lt.f32.partialorder %v523_v8, 16777216.0 }
 0x460   :  { %525 = vmin.xlane.f32.xlu0 %v524_v6 }
 0x461   :  { %v991_v56 = vmul.f32 %v990_v48, %v136_v27  ;;  %v998_v38 = vadd.f32 %v990_v48, %v2026_v21  ;;  %v996_v40 = vmul.f32 %v990_v48, %v1989_v3  ;;  %v211_v21 = vmul.f32 %v2080_v10, %v1360_v1 }
 0x463   :  { %vm999_vm12 = vcmp.gt.f32.partialorder %v998_v38, 0.0  ;;  %v993_v46 = vmul.f32 %v992_v39, %v991_v56  ;;  %v995_v19 = vadd.f32 %v991_v56, %v2041_v31  ;;  %v2123_v24 = vadd.f32 %v996_v40, %v2044_v55  ;;  %v73_v31 = vld [vmem:[%s2178_s2 + $0x5e] sm:$0x3] }
 0x464   :  { %v1000_v26 = vsel %vm999_vm12, 16777216.0, %v866_v52  ;;  %v219_v3 = vadd.f32 %v211_v21, %v179_v34  ;;  %v658_v55 = vmul.f32 %v2074_v60, %v1521_v37 }
 0x465   :  { %v1001_v58 = vsel %vm390_vm2, %v1000_v26, inf  ;;  %v994_v30 = vadd.f32 %v993_v46, %v2038_v53  ;;  %v137_v53 = vadd.f32 %v2080_v10, %v129_v61  ;;  %vm1005_vm0 = vcmp.lt.f32.partialorder %v1000_v26, 16777216.0 }
 0x466   :  { %1002 = vmin.xlane.f32.xlu1 %v1001_v58  ;;  %v534_v51 = vsub.f32 0.0, %v219_v3  ;;  %v698_v43 = vadd.f32 %v690_v9, %v658_v55 }
 0x468   :  { %v1011_v27 = vsub.f32 0.0, %v698_v43 }
 0x4ed   :  { %v526_v57 = vpop.xlane.xlu0 %525 }
 0x4ee   :  { %vm527_vm14 = vcmp.eq.f32.partialorder %v523_v8, %v526_v57 }
 0x4ef   :  { %vm529_vm15 = vmand %vm527_vm14, %vm528_vm13 }
 0x4f0   :  { %v1155_v1 = vsel %vm529_vm15, 1.0, %v2188_v17 }
 0x4f1   :  { %v532_v23 = vmul.f32 %v1155_v1, %v73_v31 }
 0x4f3   :  { %v1003_v50 = vpop.xlane.xlu1 %1002  ;;  %v540_v12 = vadd.f32 %v532_v23, %v521_v44  ;;  %v533_v28 = vmul.f32 %v532_v23, %v137_v53  ;;  %v538_v29 = vmul.f32 %v532_v23, %v2085_v54 }
 0x4f4   :  { %vm1004_vm1 = vcmp.eq.f32.partialorder %v1000_v26, %v1003_v50 }
 0x4f5   :  { %vm1006_vm3 = vmand %vm1004_vm1, %vm1005_vm0  ;;  %v603_v4 = vsel %vm390_vm2, %v540_v12, 0.0  ;;  %v537_v5 = vadd.f32 %v533_v28, %v518_v16  ;;  %v541_v60 = vsub.f32 1.0, %v540_v12  ;;  %v535_v10 = vmul.f32 %v534_v51, %v533_v28 }
 0x4f6   :  { %v1171_v41 = vsel %vm1006_vm3, 1.0, %v2188_v17  ;;  %604 = vadd.xlane.f32.xlu1 %v603_v4  ;;  %v539_v22 = vadd.f32 %v538_v29, %v520_v33 }
 0x4f7   :  { %v1009_v20 = vmul.f32 %v1171_v41, %v73_v31  ;;  %v568_v13 = vsel %vm390_vm2, %v537_v5, 0.0  ;;  %v536_v54 = vadd.f32 %v535_v10, %v517_v2  ;;  %v579_v62 = vsel %vm390_vm2, %v541_v60, 0.0 }
 0x4f8   :  { %569 = vadd.xlane.f32.xlu0 %v568_v13  ;;  %v554_v49 = vmul.f32 %v553_v45, %v541_v60  ;;  %v592_v0 = vsel %vm390_vm2, %v539_v22, 0.0 }
 0x4f9   :  { %v1017_v36 = vadd.f32 %v1009_v20, %v998_v38  ;;  %v1010_v18 = vmul.f32 %v1009_v20, %v137_v53  ;;  %v542_v14 = vsel %vm390_vm2, %v536_v54, 0.0  ;;  %v1015_v32 = vmul.f32 %v1009_v20, %v2092_v7 }
 0x4fa   :  { %580 = vadd.xlane.f32.xlu1 %v579_v62  ;;  %v555_v42 = vsel %vm390_vm2, %v554_v49, 0.0 }
 0x4fb   :  { %v1018_v17 = vsub.f32 1.0, %v1017_v36  ;;  %v1012_v15 = vmul.f32 %v1011_v27, %v1010_v18  ;;  %v1014_v35 = vadd.f32 %v1010_v18, %v995_v19  ;;  %v1016_v11 = vadd.f32 %v1015_v32, %v2123_v24 }
 0x4fc   :  { %593 = vadd.xlane.f32.xlu0 %v592_v0  ;;  %v1080_v25 = vsel %vm390_vm2, %v1017_v36, 0.0 }
 0x4fd   :  { %v1031_v59 = vmul.f32 %v1030_v63, %v1018_v17  ;;  %v1013_v44 = vadd.f32 %v1012_v15, %v994_v30  ;;  %v1056_v16 = vsel %vm390_vm2, %v1018_v17, 0.0  ;;  %v1045_v33 = vsel %vm390_vm2, %v1014_v35, 0.0 }
 0x4fe   :  { %556 = vadd.xlane.f32.xlu1 %v555_v42  ;;  %v1069_v8 = vsel %vm390_vm2, %v1016_v11, 0.0 }
 0x4ff   :  { %v1032_v37 = vsel %vm390_vm2, %v1031_v59, 0.0  ;;  %v1019_v47 = vsel %vm390_vm2, %v1013_v44, 0.0 }
 0x500   :  { %543 = vadd.xlane.f32.xlu0 %v542_v14 }
 0x502   :  { %1033 = vadd.xlane.f32.xlu1 %v1032_v37 }
 0x504   :  { %1020 = vadd.xlane.f32.xlu0 %v1019_v47 }
 0x506   :  { %1057 = vadd.xlane.f32.xlu1 %v1056_v16 }
 0x508   :  { %1046 = vadd.xlane.f32.xlu0 %v1045_v33 }
 0x50a   :  { %1081 = vadd.xlane.f32.xlu1 %v1080_v25 }
 0x50c   :  { %1070 = vadd.xlane.f32.xlu0 %v1069_v8 }
 0x583   :  { %v605_v48 = vpop.xlane.xlu1 %604 }
 0x584   :  { %v606_v52 = vrot.slane %v605_v48, 4 }
 0x585   :  { %v570_v6 = vpop.xlane.xlu0 %569 }
 0x586   :  { %v571_v2 = vrot.slane %v570_v6, 4  ;;  %v607_v58 = vadd.f32 %v606_v52, %v605_v48 }
 0x587   :  { %v581_v39 = vpop.xlane.xlu1 %580 }
 0x588   :  { %v582_v7 = vrot.slane %v581_v39, 4  ;;  %v572_v56 = vadd.f32 %v571_v2, %v570_v6  ;;  %v608_v1 = vrot.slane %v607_v58, 2 }
 0x589   :  { %v594_v38 = vpop.xlane.xlu0 %593 }
 0x58a   :  { %v595_v40 = vrot.slane %v594_v38, 4  ;;  %v583_v46 = vadd.f32 %v582_v7, %v581_v39  ;;  %v573_v30 = vrot.slane %v572_v56, 2  ;;  %v609_v27 = vadd.f32 %v608_v1, %v607_v58 }
 0x58b   :  { %v557_v19 = vpop.xlane.xlu1 %556 }
 0x58c   :  { %v596_v26 = vadd.f32 %v595_v40, %v594_v38  ;;  %v558_v24 = vrot.slane %v557_v19, 4  ;;  %v584_v61 = vrot.slane %v583_v46, 2  ;;  %v574_v51 = vadd.f32 %v573_v30, %v572_v56 }
 0x58d   :  { %v544_v34 = vpop.xlane.xlu0 %543  ;;  %v610_v35 = vrot.slane %v609_v27, 1 }
 0x58e   :  { %v559_v21 = vadd.f32 %v558_v24, %v557_v19  ;;  %v545_v3 = vrot.slane %v544_v34, 4  ;;  %v597_v57 = vrot.slane %v596_v26, 2  ;;  %v585_v4 = vadd.f32 %v584_v61, %v583_v46 }
 0x58f   :  { %v1034_v31 = vpop.xlane.xlu1 %1033  ;;  %v575_v22 = vrot.slane %v574_v51, 1  ;;  %v611_v56 = vadd.f32 %v610_v35, %v609_v27 }
 0x590   :  { %v560_v53 = vrot.slane %v559_v21, 2  ;;  %v546_v55 = vadd.f32 %v545_v3, %v544_v34  ;;  %v1035_v9 = vrot.slane %v1034_v31, 4  ;;  %v598_v5 = vadd.f32 %v597_v57, %v596_v26 }
 0x591   :  { %v1021_v23 = vpop.xlane.xlu0 %1020  ;;  %v586_v18 = vrot.slane %v585_v4, 1  ;;  %v576_v47 = vadd.f32 %v575_v22, %v574_v51 }
 0x592   :  { %v547_v50 = vrot.slane %v546_v55, 2  ;;  %v1036_v12 = vadd.f32 %v1035_v9, %v1034_v31  ;;  %v1022_v28 = vrot.slane %v1021_v23, 4  ;;  %v561_v29 = vadd.f32 %v560_v53, %v559_v21 }
 0x593   :  { %v1058_v43 = vpop.xlane.xlu1 %1057  ;;  %v599_v0 = vrot.slane %v598_v5, 1  ;;  %v587_v8 = vadd.f32 %v586_v18, %v585_v4 }
 0x594   :  { %v1037_v60 = vrot.slane %v1036_v12, 2  ;;  %v1023_v45 = vadd.f32 %v1022_v28, %v1021_v23  ;;  %v1059_v41 = vrot.slane %v1058_v43, 4  ;;  %v548_v10 = vadd.f32 %v547_v50, %v546_v55 }
 0x595   :  { %v1047_v20 = vpop.xlane.xlu0 %1046  ;;  %v562_v13 = vrot.slane %v561_v29, 1  ;;  %v600_v7 = vadd.f32 %v599_v0, %v598_v5 }
 0x596   :  { %v1024_v54 = vrot.slane %v1023_v45, 2  ;;  %v1060_v63 = vadd.f32 %v1059_v41, %v1058_v43  ;;  %v1048_v62 = vrot.slane %v1047_v20, 4  ;;  %v549_v49 = vrot.slane %v548_v10, 1 }
 0x597   :  { %v1082_v36 = vpop.xlane.xlu1 %1081  ;;  %v1038_v17 = vadd.f32 %v1037_v60, %v1036_v12  ;;  %v563_v37 = vadd.f32 %v562_v13, %v561_v29 }
 0x598   :  { %v1061_v15 = vrot.slane %v1060_v63, 2  ;;  %v1049_v42 = vadd.f32 %v1048_v62, %v1047_v20  ;;  %v1083_v59 = vrot.slane %v1082_v36, 4  ;;  %v550_v44 = vadd.f32 %v549_v49, %v548_v10 }
 0x599   :  { %v1071_v14 = vpop.xlane.xlu0 %1070  ;;  %v1025_v32 = vadd.f32 %v1024_v54, %v1023_v45  ;;  %v1039_v6 = vrot.slane %v1038_v17, 1 }
 0x59a   :  { %v1050_v16 = vrot.slane %v1049_v42, 2  ;;  %v1084_v33 = vadd.f32 %v1083_v59, %v1082_v36  ;;  %v1072_v11 = vrot.slane %v1071_v14, 4  ;;  %1172 = vpush %v550_v44  ;;  %v1062_v25 = vadd.f32 %v1061_v15, %v1060_v63 }
 0x59b   :  { %1174 = vpush %v563_v37  ;;  %v1026_v48 = vrot.slane %v1025_v32, 1  ;;  %v1040_v24 = vadd.f32 %v1039_v6, %v1038_v17 }
 0x59c   :  { %v1085_v2 = vrot.slane %v1084_v33, 2  ;;  %v1073_v39 = vadd.f32 %v1072_v11, %v1071_v14  ;;  %1176 = vpush %v576_v47  ;;  %v1051_v52 = vadd.f32 %v1050_v16, %v1049_v42  ;;  %v1063_v40 = vrot.slane %v1062_v25, 1 }
 0x59d   :  { %1178 = vpush %v587_v8  ;;  %v1027_v38 = vadd.f32 %v1026_v48, %v1025_v32  ;;  %v2191_v32 = vld [vmem:[#allocation2_spill] sm:$0xff] }
 0x59e   :  { %v1086_v46 = vadd.f32 %v1085_v2, %v1084_v33  ;;  %v1074_v19 = vrot.slane %v1073_v39, 2  ;;  %1180 = vpush %v600_v7  ;;  %v1052_v26 = vrot.slane %v1051_v52, 1  ;;  %v1064_v34 = vadd.f32 %v1063_v40, %v1062_v25 }
 0x59f   :  { %1182 = vpush %v611_v56  ;;  %vm1107_vm2 = vcmp.eq.s32.totalorder %v2191_v32, 1  ;;  %vm1105_vm4 = vcmp.eq.s32.totalorder %v2191_v32, 0  ;;  %vm1110_vm5 = vcmp.eq.s32.totalorder %v2191_v32, 3  ;;  %vm1113_vm6 = vcmp.eq.s32.totalorder %v2191_v32, 2 }
 0x5a0   :  { %v1075_v58 = vadd.f32 %v1074_v19, %v1073_v39  ;;  %1184 = vpush %v1027_v38  ;;  %v1053_v30 = vadd.f32 %v1052_v26, %v1051_v52  ;;  %v1087_v21 = vrot.slane %v1086_v46, 1  ;;  %vm1116_vm7 = vcmp.eq.s32.totalorder %v2191_v32, 4 }
 0x5a1   :  { %1186 = vpush %v1040_v24 }
 0x5a2   :  { %1188 = vpush %v1053_v30  ;;  %v1076_v3 = vrot.slane %v1075_v58, 1  ;;  %v1088_v57 = vadd.f32 %v1087_v21, %v1086_v46 }
 0x5a3   :  { %1190 = vpush %v1064_v34 }
 0x5a4   :  { %v1077_v61 = vadd.f32 %v1076_v3, %v1075_v58 }
 0x5a6   :  { %1192 = vpush %v1077_v61 }
 0x5a7   :  { %1194 = vpush %v1088_v57 }
 0x5cb   :  { %s2159_s2 = spop %1172 }
 0x5cc   :  { %s1175_s7 = spop %1174  ;;  %v552_v41 = vstv %s2159_s2 }
 0x5cd   :  { %s1177_s8 = spop %1176  ;;  %v565_v29 = vstv %s1175_s7 }
 0x5ce   :  { %s1179_s9 = spop %1178  ;;  %v578_v55 = vstv %s1177_s8  ;;  %v566_v45 = vmul.f32 0.1, %v565_v29 }
 0x5cf   :  { %v589_v31 = vstv %s1179_s9  ;;  %s2161_s10 = spop %1180 }
 0x5d0   :  { %v590_v53 = vmul.f32 0.1, %v589_v31  ;;  %s1183_s11 = spop %1182  ;;  %v567_v13 = vadd.f32 %v566_v45, %v552_v41  ;;  %v602_v63 = vstv %s2161_s10 }
 0x5d1   :  { %v613_v9 = vstv %s1183_s11  ;;  %s2163_s12 = spop %1184 }
 0x5d2   :  { %v591_v1 = vadd.f32 %v590_v53, %v578_v55  ;;  %v617_v23 = vmax.f32 %v613_v9, 1.0  ;;  %s1187_s13 = spop %1186  ;;  %v1029_v49 = vstv %s2163_s12 }
 0x5d3   :  { %s1189_s14 = spop %1188  ;;  %v1042_v10 = vstv %s1187_s13 }
 0x5d4   :  { %v614_v51 = vmax.f32 %v591_v1, 1e-06  ;;  %s1191_s15 = spop %1190  ;;  %1213 = vrcp.f32 %v617_v23  ;;  %v1055_v28 = vstv %s1189_s14  ;;  %v1043_v54 = vmul.f32 0.1, %v1042_v10 }
 0x5d5   :  { %v1066_v50 = vstv %s1191_s15 }
 0x5d6   :  { %1215 = vrcp.f32 %v614_v51  ;;  %v1067_v12 = vmul.f32 0.1, %v1066_v50  ;;  %v1044_v18 = vadd.f32 %v1043_v54, %v1029_v49 }
 0x5d7   :  { %s1193_s16 = spop %1192 }
 0x5d8   :  { %v1068_v43 = vadd.f32 %v1067_v12, %v1055_v28  ;;  %s1195_s17 = spop %1194  ;;  %v1079_v59 = vstv %s1193_s16 }
 0x5d9   :  { %v1090_v4 = vstv %s1195_s17 }
 0x5da   :  { %v1091_v5 = vmax.f32 %v1068_v43, 1e-06  ;;  %v1094_v60 = vmax.f32 %v1090_v4, 1.0 }
 0x5dc   :  { %1217 = vrcp.f32 %v1091_v5 }
 0x5dd   :  { %1219 = vrcp.f32 %v1094_v60 }
 0x5de   :  { %v1214_v20 = vpop.eup %1213 }
 0x5df   :  { %v619_v62 = vmul.f32 %v1214_v20, %v602_v63 }
 0x5e0   :  { %v1216_v22 = vpop.eup %1215 }
 0x5e1   :  { %v616_v27 = vmul.f32 %v1216_v22, %v567_v13  ;;  %v1099_v15 = vmul.f32 6.0, %v619_v62  ;;  %v1111_v8 = vsel %vm1110_vm5, %v619_v62, 0.0 }
 0x5e3   :  { %v1097_v36 = vmul.f32 2.0, %v616_v27  ;;  %v1108_v33 = vsel %vm1107_vm2, %v616_v27, 0.0 }
 0x5e5   :  { %v1100_v14 = vadd.f32 %v1099_v15, %v1097_v36 }
 0x5e6   :  { %v1218_v0 = vpop.eup %1217 }
 0x5e7   :  { %v1220_v17 = vpop.eup %1219  ;;  %v1093_v42 = vmul.f32 %v1218_v0, %v1044_v18 }
 0x5e8   :  { %v1096_v44 = vmul.f32 %v1220_v17, %v1079_v59 }
 0x5e9   :  { %v1101_v37 = vmul.f32 2.0, %v1093_v42  ;;  %v1114_v6 = vsel %vm1113_vm6, %v1093_v42, 0.0 }
 0x5ea   :  { %v1103_v35 = vmul.f32 6.0, %v1096_v44  ;;  %v1117_v39 = vsel %vm1116_vm7, %v1096_v44, 0.0 }
 0x5eb   :  { %v1102_v47 = vadd.f32 %v1101_v37, %v1100_v14 }
 0x5ed   :  { %v1104_v16 = vadd.f32 %v1103_v35, %v1102_v47 }
 0x5ef   :  { %v1106_v11 = vsel %vm1105_vm4, %v1104_v16, 0.0 }
 0x5f0   :  { %v1109_v25 = vadd.f32 %v1108_v33, %v1106_v11 }
 0x5f2   :  { %v1112_v48 = vadd.f32 %v1111_v8, %v1109_v25 }
 0x5f4   :  { %v1115_v2 = vadd.f32 %v1114_v6, %v1112_v48 }
 0x5f6   :  { %v1118_v7 = vadd.f32 %v1117_v39, %v1115_v2 }
 0x5f8   :  { %1119 = vst [vmem:[%s2179_s3] sm:$0xff] %v1118_v7 }

</bundles_post_ra>
